<compile_context>
chip_gen: v6e
topology: v6e:2x2x1
jax: 0.10.0
libtpu: 0.0.40
codegen_flags: <defaults>
</compile_context>

<pallas_src>
import functools

import jax
import jax.numpy as jnp
from jax import lax
from jax.experimental import pallas as pl
from jax.experimental.pallas import tpu as pltpu


def _inv_res_kernel(x_ref, w1_ref, b1_ref, wd_ref, b2_ref, w3_ref, b3_ref,
                    o_ref, pad_ref, y2_ref, *, H, W, use_res_connect):
    # x_ref : (Nb, H*W, Cin) f32     flat-spatial tile, Nb images per step
    # w1_ref: (Cin, Chid)    bf16    1x1 expand weight
    # wd_ref: (3, 3, Chid)   f32     depthwise 3x3 weight
    # w3_ref: (Chid, Cout)   bf16    1x1 project weight
    # b*_ref: (1, C)         f32     biases
    # pad_ref: (H+2, W+2, Chid) f32  zero-padded depthwise input (scratch)
    # y2_ref : (Nb*H*W, Chid)  bf16  staging for the project matmul (scratch)
    Nb, HW, Cin = x_ref.shape
    Chid = w1_ref.shape[1]
    Cout = w3_ref.shape[1]

    # Refresh only the 1-pixel zero halo of the persistent pad scratch (the
    # interior is fully overwritten for every image below).  Unconditional so
    # correctness does not depend on which core sees grid index 0.
    zero_row = jnp.zeros((1, W + 2, Chid), jnp.float32)
    zero_col = jnp.zeros((H + 2, 1, Chid), jnp.float32)
    pad_ref[0:1, :, :] = zero_row
    pad_ref[H + 1:H + 2, :, :] = zero_row
    pad_ref[:, 0:1, :] = zero_col
    pad_ref[:, W + 1:W + 2, :] = zero_col

    # ---- 1x1 expand: bf16 MXU matmul over all Nb*H*W rows, f32 accumulate ---
    x_f32 = x_ref[...].reshape(Nb * HW, Cin)
    y1 = jnp.dot(x_f32.astype(jnp.bfloat16), w1_ref[...],
                 preferred_element_type=jnp.float32) + b1_ref[...]
    y1 = jnp.clip(y1, 0.0, 6.0)                          # (Nb*HW, Chid) f32

    # ---- depthwise 3x3 (stride 1, pad 1): f32 VPU tap accumulation ----------
    for b in range(Nb):                                  # static, small Nb
        pad_ref[1:H + 1, 1:W + 1, :] = (
            y1[b * HW:(b + 1) * HW].reshape(H, W, Chid))
        acc = jnp.zeros((H, W, Chid), jnp.float32)
        # Hoist the dx (column) windows: 3 sublane slices (2 misaligned)
        # instead of 9 (6 misaligned); dy shifts only index the leading dim.
        for dx in range(3):
            col = pad_ref[:, dx:dx + W, :]               # (H+2, W, Chid)
            for dy in range(3):
                acc = acc + col[dy:dy + H] * wd_ref[dy, dx, :]
        y2_b = jnp.clip(acc + b2_ref[...], 0.0, 6.0)
        y2_ref[b * HW:(b + 1) * HW, :] = (
            y2_b.reshape(HW, Chid).astype(y2_ref.dtype))

    # ---- 1x1 project: bf16 MXU matmul, f32 accumulate, residual in f32 ------
    y3 = jnp.dot(y2_ref[...], w3_ref[...],
                 preferred_element_type=jnp.float32) + b3_ref[...]
    if use_res_connect:
        y3 = y3 + x_f32
    # Block-level activation_function is StraightThrough and act quant is
    # disabled by default -> identity.
    o_ref[...] = y3.reshape(Nb, HW, Cout).astype(o_ref.dtype)


def quant_inverted_residual(x_nchw, params, *, use_res_connect=True,
                            images_per_step=1):
    """x_nchw: (N, Cin, H, W) float32. Returns (N, Cout, H, W) float32."""
    w1, b1, wd, b2, w3, b3 = params
    N, Cin, H, W = x_nchw.shape
    Chid = w1.shape[1]
    Cout = w3.shape[1]
    HW = H * W
    Nb = images_per_step
    assert N % Nb == 0, "batch must be divisible by images_per_step"
    if use_res_connect:
        assert Cin == Cout, "residual connection requires Cin == Cout (stride 1)"

    # NCHW -> flat NHWC (N, H*W, C): channels on the lane axis, spatial on
    # sublanes; keeps the in-kernel intermediates 2-D.
    x = jnp.transpose(x_nchw, (0, 2, 3, 1)).reshape(N, HW, Cin)

    # bf16 weights for the two 1x1 MXU matmuls (f32 accumulation in-kernel).
    # TODO(synk): for an int8-quantized deployment, run these matmuls as int8
    # on v5e/v6e (integer MXU); keep bf16/fp8 on v7x (no integer MXU mode).
    w1_bf = w1.astype(jnp.bfloat16)
    w3_bf = w3.astype(jnp.bfloat16)
    wd_f32 = wd.astype(jnp.float32)
    b1_2d = b1.reshape(1, Chid).astype(jnp.float32)
    b2_2d = b2.reshape(1, Chid).astype(jnp.float32)
    b3_2d = b3.reshape(1, Cout).astype(jnp.float32)

    kernel = functools.partial(_inv_res_kernel, H=H, W=W,
                               use_res_connect=use_res_connect)

    # TODO(synk): for production resolutions (e.g. 112x112x96) tile the grid
    # over H with a 1-row halo and set vmem_limit_bytes for v7x's 64 MiB VMEM.
    out_flat = pl.pallas_call(
        kernel,
        out_shape=jax.ShapeDtypeStruct((N, HW, Cout), jnp.float32),
        grid_spec=pltpu.PrefetchScalarGridSpec(
            num_scalar_prefetch=0,
            grid=(N // Nb,),
            in_specs=[
                pl.BlockSpec((Nb, HW, Cin), lambda n: (n, 0, 0)),
                pl.BlockSpec((Cin, Chid), lambda n: (0, 0)),
                pl.BlockSpec((1, Chid), lambda n: (0, 0)),
                pl.BlockSpec((3, 3, Chid), lambda n: (0, 0, 0)),
                pl.BlockSpec((1, Chid), lambda n: (0, 0)),
                pl.BlockSpec((Chid, Cout), lambda n: (0, 0)),
                pl.BlockSpec((1, Cout), lambda n: (0, 0)),
            ],
            out_specs=pl.BlockSpec((Nb, HW, Cout), lambda n: (n, 0, 0)),
            scratch_shapes=[
                pltpu.VMEM((H + 2, W + 2, Chid), jnp.float32),   # padded dw in
                pltpu.VMEM((Nb * HW, Chid), jnp.bfloat16),       # y2 staging
            ],
        ),
        compiler_params=pltpu.CompilerParams(
            dimension_semantics=("parallel",)),  # batch axis -> both TCs on v7x
    )(x, w1_bf, b1_2d, wd_f32, b2_2d, w3_bf, b3_2d)

    return jnp.transpose(out_flat.reshape(N, H, W, Cout), (0, 3, 1, 2))


def _reference(x_nchw, params, *, use_res_connect=True,
               matmul_dtype=jnp.float32):
    """Pure-JAX NCHW reference matching PyTorch conv semantics.

    With matmul_dtype=bfloat16 it mirrors the kernel's numerics (bf16 inputs to
    the two 1x1 convs and to the project conv's activation, f32 accumulation).
    """
    w1, b1, wd, b2, w3, b3 = params
    Chid = w1.shape[1]
    dn = ("NCHW", "OIHW", "NCHW")
    hi = lax.Precision.HIGHEST

    # 1x1 expand
    w1_oihw = jnp.transpose(w1, (1, 0))[:, :, None, None].astype(matmul_dtype)
    y = lax.conv_general_dilated(x_nchw.astype(matmul_dtype), w1_oihw, (1, 1),
                                 "VALID", dimension_numbers=dn,
                                 precision=hi,
                                 preferred_element_type=jnp.float32)
    y = jnp.clip(y + b1[None, :, None, None], 0.0, 6.0)
    # depthwise 3x3 (f32, matches in-kernel tap math)
    wd_oihw = jnp.transpose(wd, (2, 0, 1))[:, None, :, :]
    y = lax.conv_general_dilated(y, wd_oihw, (1, 1), "SAME",
                                 dimension_numbers=dn,
                                 feature_group_count=Chid, precision=hi,
                                 preferred_element_type=jnp.float32)
    y = jnp.clip(y + b2[None, :, None, None], 0.0, 6.0)
    # 1x1 project
    w3_oihw = jnp.transpose(w3, (1, 0))[:, :, None, None].astype(matmul_dtype)
    y = lax.conv_general_dilated(y.astype(matmul_dtype), w3_oihw, (1, 1),
                                 "VALID", dimension_numbers=dn, precision=hi,
                                 preferred_element_type=jnp.float32)
    y = y + b3[None, :, None, None]
    return x_nchw + y if use_res_connect else y


if __name__ == "__main__":
    # Small InvertedResidual config: stride=1, expand_ratio=6, Cin == Cout.
    N, Cin, H, W = 4, 16, 16, 16
    expand_ratio = 6
    Chid = Cin * expand_ratio        # 96
    Cout = Cin                       # 16
    use_res_connect = True           # stride == 1 and Cin == Cout

    key = jax.random.PRNGKey(0)
    k = jax.random.split(key, 7)
    x = jax.random.normal(k[0], (N, Cin, H, W), jnp.float32)
    w1 = jax.random.normal(k[1], (Cin, Chid), jnp.float32) * 0.2
    b1 = jax.random.normal(k[2], (Chid,), jnp.float32) * 0.1
    wd = jax.random.normal(k[3], (3, 3, Chid), jnp.float32) * 0.2
    b2 = jax.random.normal(k[4], (Chid,), jnp.float32) * 0.1
    w3 = jax.random.normal(k[5], (Chid, Cout), jnp.float32) * 0.2
    b3 = jax.random.normal(k[6], (Cout,), jnp.float32) * 0.1
    params = (w1, b1, wd, b2, w3, b3)

    out = quant_inverted_residual(x, params, use_res_connect=use_res_connect,
                                  images_per_step=2)
    out = jax.block_until_ready(out)

    ref = _reference(x, params, use_res_connect=use_res_connect,
                     matmul_dtype=jnp.bfloat16)
    assert out.shape == (N, Cout, H, W)
    assert jnp.allclose(out, ref, atol=2e-2, rtol=2e-2), \
        f"max abs err {jnp.max(jnp.abs(out - ref))}"

    print("KERNEL_OK")
</pallas_src>

<mosaic_0001>
module attributes {stable_mosaic.version = 11 : i64} {
  func.func @_inv_res_kernel(%arg0: i32, %arg1: memref<2x256x16xf32, #tpu.memory_space<vmem>>, %arg2: memref<16x96xbf16, #tpu.memory_space<vmem>>, %arg3: memref<1x96xf32, #tpu.memory_space<vmem>>, %arg4: memref<3x3x96xf32, #tpu.memory_space<vmem>>, %arg5: memref<1x96xf32, #tpu.memory_space<vmem>>, %arg6: memref<96x16xbf16, #tpu.memory_space<vmem>>, %arg7: memref<1x16xf32, #tpu.memory_space<vmem>>, %arg8: memref<2x256x16xf32, #tpu.memory_space<vmem>>, %arg9: memref<18x18x96xf32, #tpu.memory_space<vmem>>, %arg10: memref<512x96xbf16, #tpu.memory_space<vmem>>) attributes {dimension_semantics = [#tpu.dimension_semantics<parallel>], iteration_bounds = array<i64: 2>, scalar_prefetch = 0 : i64, scratch_operands = 2 : i64, tpu.core_type = #tpu.core_type<tc>, window_params = [{transform_indices = @transform_0, window_bounds = array<i64: 2, 256, 16>}, {pipeline_mode = #tpu.pipeline_mode<synchronous>, transform_indices = @transform_1, window_bounds = array<i64: 16, 96>}, {pipeline_mode = #tpu.pipeline_mode<synchronous>, transform_indices = @transform_2, window_bounds = array<i64: 1, 96>}, {pipeline_mode = #tpu.pipeline_mode<synchronous>, transform_indices = @transform_3, window_bounds = array<i64: 3, 3, 96>}, {pipeline_mode = #tpu.pipeline_mode<synchronous>, transform_indices = @transform_4, window_bounds = array<i64: 1, 96>}, {pipeline_mode = #tpu.pipeline_mode<synchronous>, transform_indices = @transform_5, window_bounds = array<i64: 96, 16>}, {pipeline_mode = #tpu.pipeline_mode<synchronous>, transform_indices = @transform_6, window_bounds = array<i64: 1, 16>}, {transform_indices = @transform_7, window_bounds = array<i64: 2, 256, 16>}]} {
    %cst = arith.constant 0.000000e+00 : f32
    %0 = vector.broadcast %cst : f32 to vector<1x18x96xf32>
    %cst_0 = arith.constant 0.000000e+00 : f32
    %1 = vector.broadcast %cst_0 : f32 to vector<18x1x96xf32>
    %c0 = arith.constant 0 : index
    %c0_1 = arith.constant 0 : index
    %c0_2 = arith.constant 0 : index
    %2 = vector.load %arg9[%c0, %c0_1, %c0_2] : memref<18x18x96xf32, #tpu.memory_space<vmem>>, vector<1x18x96xf32>
    tpu.vector_store %arg9[%c0, %c0_1, %c0_2], %0 {strides = array<i32>} : memref<18x18x96xf32, #tpu.memory_space<vmem>>, vector<1x18x96xf32>,
    %c17 = arith.constant 17 : index
    %c0_3 = arith.constant 0 : index
    %c0_4 = arith.constant 0 : index
    %3 = vector.load %arg9[%c17, %c0_3, %c0_4] : memref<18x18x96xf32, #tpu.memory_space<vmem>>, vector<1x18x96xf32>
    tpu.vector_store %arg9[%c17, %c0_3, %c0_4], %0 {strides = array<i32>} : memref<18x18x96xf32, #tpu.memory_space<vmem>>, vector<1x18x96xf32>,
    %c0_5 = arith.constant 0 : index
    %c0_6 = arith.constant 0 : index
    %c0_7 = arith.constant 0 : index
    %4 = vector.load %arg9[%c0_5, %c0_6, %c0_7] : memref<18x18x96xf32, #tpu.memory_space<vmem>>, vector<18x1x96xf32>
    tpu.vector_store %arg9[%c0_5, %c0_6, %c0_7], %1 {strides = array<i32>} : memref<18x18x96xf32, #tpu.memory_space<vmem>>, vector<18x1x96xf32>,
    %c0_8 = arith.constant 0 : index
    %c17_9 = arith.constant 17 : index
    %c0_10 = arith.constant 0 : index
    %5 = vector.load %arg9[%c0_8, %c17_9, %c0_10] : memref<18x18x96xf32, #tpu.memory_space<vmem>>, vector<18x1x96xf32>
    tpu.vector_store %arg9[%c0_8, %c17_9, %c0_10], %1 {strides = array<i32>} : memref<18x18x96xf32, #tpu.memory_space<vmem>>, vector<18x1x96xf32>,
    %c0_11 = arith.constant 0 : index
    %c0_12 = arith.constant 0 : index
    %c0_13 = arith.constant 0 : index
    %6 = vector.load %arg1[%c0_11, %c0_12, %c0_13] : memref<2x256x16xf32, #tpu.memory_space<vmem>>, vector<2x256x16xf32>
    %7 = vector.shape_cast %6 : vector<2x256x16xf32> to vector<512x16xf32>
    %8 = arith.truncf %7 : vector<512x16xf32> to vector<512x16xbf16>
    %c0_14 = arith.constant 0 : index
    %c0_15 = arith.constant 0 : index
    %9 = vector.load %arg2[%c0_14, %c0_15] : memref<16x96xbf16, #tpu.memory_space<vmem>>, vector<16x96xbf16>
    %cst_16 = arith.constant dense<0.000000e+00> : vector<512x96xf32>
    %10 = tpu.matmul %8, %9, %cst_16 {dimension_numbers = #tpu.dot_dimension_numbers<[1], [0], [0], [1], [0, 0, 1, 1], [], []>} : vector<512x16xbf16>, vector<16x96xbf16>, vector<512x96xf32> -> vector<512x96xf32>
    %c0_17 = arith.constant 0 : index
    %c0_18 = arith.constant 0 : index
    %11 = vector.load %arg3[%c0_17, %c0_18] : memref<1x96xf32, #tpu.memory_space<vmem>>, vector<1x96xf32>
    %12 = vector.broadcast %11 : vector<1x96xf32> to vector<512x96xf32>
    %13 = arith.addf %10, %12 : vector<512x96xf32>
    %cst_19 = arith.constant 0.000000e+00 : f32
    %cst_20 = arith.constant 6.000000e+00 : f32
    %14 = vector.broadcast %cst_19 : f32 to vector<512x96xf32>
    %15 = arith.maximumf %14, %13 : vector<512x96xf32>
    %16 = vector.broadcast %cst_20 : f32 to vector<512x96xf32>
    %17 = arith.minimumf %16, %15 : vector<512x96xf32>
    %18 = vector.extract_strided_slice %17 {offsets = [0, 0], sizes = [256, 96], strides = [1, 1]} : vector<512x96xf32> to vector<256x96xf32>
    %19 = vector.shape_cast %18 : vector<256x96xf32> to vector<16x16x96xf32>
    %c1 = arith.constant 1 : index
    %c1_21 = arith.constant 1 : index
    %c0_22 = arith.constant 0 : index
    %20 = vector.load %arg9[%c1, %c1_21, %c0_22] : memref<18x18x96xf32, #tpu.memory_space<vmem>>, vector<16x16x96xf32>
    tpu.vector_store %arg9[%c1, %c1_21, %c0_22], %19 {strides = array<i32>} : memref<18x18x96xf32, #tpu.memory_space<vmem>>, vector<16x16x96xf32>,
    %cst_23 = arith.constant 0.000000e+00 : f32
    %21 = vector.broadcast %cst_23 : f32 to vector<16x16x96xf32>
    %c0_24 = arith.constant 0 : index
    %c0_25 = arith.constant 0 : index
    %c0_26 = arith.constant 0 : index
    %22 = vector.load %arg9[%c0_24, %c0_25, %c0_26] : memref<18x18x96xf32, #tpu.memory_space<vmem>>, vector<18x16x96xf32>
    %23 = vector.extract_strided_slice %22 {offsets = [0, 0, 0], sizes = [16, 16, 96], strides = [1, 1, 1]} : vector<18x16x96xf32> to vector<16x16x96xf32>
    %c0_27 = arith.constant 0 : index
    %c0_28 = arith.constant 0 : index
    %c0_29 = arith.constant 0 : index
    %24 = vector.load %arg4[%c0_27, %c0_28, %c0_29] : memref<3x3x96xf32, #tpu.memory_space<vmem>>, vector<1x1x96xf32>
    %25 = vector.shape_cast %24 : vector<1x1x96xf32> to vector<96xf32>
    %26 = vector.shape_cast %25 : vector<96xf32> to vector<1x1x96xf32>
    %27 = vector.broadcast %26 : vector<1x1x96xf32> to vector<16x16x96xf32>
    %28 = arith.mulf %23, %27 : vector<16x16x96xf32>
    %29 = arith.addf %21, %28 : vector<16x16x96xf32>
    %30 = vector.extract_strided_slice %22 {offsets = [1, 0, 0], sizes = [16, 16, 96], strides = [1, 1, 1]} : vector<18x16x96xf32> to vector<16x16x96xf32>
    %c1_30 = arith.constant 1 : index
    %c0_31 = arith.constant 0 : index
    %c0_32 = arith.constant 0 : index
    %31 = vector.load %arg4[%c1_30, %c0_31, %c0_32] : memref<3x3x96xf32, #tpu.memory_space<vmem>>, vector<1x1x96xf32>
    %32 = vector.shape_cast %31 : vector<1x1x96xf32> to vector<96xf32>
    %33 = vector.shape_cast %32 : vector<96xf32> to vector<1x1x96xf32>
    %34 = vector.broadcast %33 : vector<1x1x96xf32> to vector<16x16x96xf32>
    %35 = arith.mulf %30, %34 : vector<16x16x96xf32>
    %36 = arith.addf %29, %35 : vector<16x16x96xf32>
    %37 = vector.extract_strided_slice %22 {offsets = [2, 0, 0], sizes = [16, 16, 96], strides = [1, 1, 1]} : vector<18x16x96xf32> to vector<16x16x96xf32>
    %c2 = arith.constant 2 : index
    %c0_33 = arith.constant 0 : index
    %c0_34 = arith.constant 0 : index
    %38 = vector.load %arg4[%c2, %c0_33, %c0_34] : memref<3x3x96xf32, #tpu.memory_space<vmem>>, vector<1x1x96xf32>
    %39 = vector.shape_cast %38 : vector<1x1x96xf32> to vector<96xf32>
    %40 = vector.shape_cast %39 : vector<96xf32> to vector<1x1x96xf32>
    %41 = vector.broadcast %40 : vector<1x1x96xf32> to vector<16x16x96xf32>
    %42 = arith.mulf %37, %41 : vector<16x16x96xf32>
    %43 = arith.addf %36, %42 : vector<16x16x96xf32>
    %c0_35 = arith.constant 0 : index
    %c1_36 = arith.constant 1 : index
    %c0_37 = arith.constant 0 : index
    %44 = vector.load %arg9[%c0_35, %c1_36, %c0_37] : memref<18x18x96xf32, #tpu.memory_space<vmem>>, vector<18x16x96xf32>
    %45 = vector.extract_strided_slice %44 {offsets = [0, 0, 0], sizes = [16, 16, 96], strides = [1, 1, 1]} : vector<18x16x96xf32> to vector<16x16x96xf32>
    %c0_38 = arith.constant 0 : index
    %c1_39 = arith.constant 1 : index
    %c0_40 = arith.constant 0 : index
    %46 = vector.load %arg4[%c0_38, %c1_39, %c0_40] : memref<3x3x96xf32, #tpu.memory_space<vmem>>, vector<1x1x96xf32>
    %47 = vector.shape_cast %46 : vector<1x1x96xf32> to vector<96xf32>
    %48 = vector.shape_cast %47 : vector<96xf32> to vector<1x1x96xf32>
    %49 = vector.broadcast %48 : vector<1x1x96xf32> to vector<16x16x96xf32>
    %50 = arith.mulf %45, %49 : vector<16x16x96xf32>
    %51 = arith.addf %43, %50 : vector<16x16x96xf32>
    %52 = vector.extract_strided_slice %44 {offsets = [1, 0, 0], sizes = [16, 16, 96], strides = [1, 1, 1]} : vector<18x16x96xf32> to vector<16x16x96xf32>
    %c1_41 = arith.constant 1 : index
    %c1_42 = arith.constant 1 : index
    %c0_43 = arith.constant 0 : index
    %53 = vector.load %arg4[%c1_41, %c1_42, %c0_43] : memref<3x3x96xf32, #tpu.memory_space<vmem>>, vector<1x1x96xf32>
    %54 = vector.shape_cast %53 : vector<1x1x96xf32> to vector<96xf32>
    %55 = vector.shape_cast %54 : vector<96xf32> to vector<1x1x96xf32>
    %56 = vector.broadcast %55 : vector<1x1x96xf32> to vector<16x16x96xf32>
    %57 = arith.mulf %52, %56 : vector<16x16x96xf32>
    %58 = arith.addf %51, %57 : vector<16x16x96xf32>
    %59 = vector.extract_strided_slice %44 {offsets = [2, 0, 0], sizes = [16, 16, 96], strides = [1, 1, 1]} : vector<18x16x96xf32> to vector<16x16x96xf32>
    %c2_44 = arith.constant 2 : index
    %c1_45 = arith.constant 1 : index
    %c0_46 = arith.constant 0 : index
    %60 = vector.load %arg4[%c2_44, %c1_45, %c0_46] : memref<3x3x96xf32, #tpu.memory_space<vmem>>, vector<1x1x96xf32>
    %61 = vector.shape_cast %60 : vector<1x1x96xf32> to vector<96xf32>
    %62 = vector.shape_cast %61 : vector<96xf32> to vector<1x1x96xf32>
    %63 = vector.broadcast %62 : vector<1x1x96xf32> to vector<16x16x96xf32>
    %64 = arith.mulf %59, %63 : vector<16x16x96xf32>
    %65 = arith.addf %58, %64 : vector<16x16x96xf32>
    %c0_47 = arith.constant 0 : index
    %c2_48 = arith.constant 2 : index
    %c0_49 = arith.constant 0 : index
    %66 = vector.load %arg9[%c0_47, %c2_48, %c0_49] : memref<18x18x96xf32, #tpu.memory_space<vmem>>, vector<18x16x96xf32>
    %67 = vector.extract_strided_slice %66 {offsets = [0, 0, 0], sizes = [16, 16, 96], strides = [1, 1, 1]} : vector<18x16x96xf32> to vector<16x16x96xf32>
    %c0_50 = arith.constant 0 : index
    %c2_51 = arith.constant 2 : index
    %c0_52 = arith.constant 0 : index
    %68 = vector.load %arg4[%c0_50, %c2_51, %c0_52] : memref<3x3x96xf32, #tpu.memory_space<vmem>>, vector<1x1x96xf32>
    %69 = vector.shape_cast %68 : vector<1x1x96xf32> to vector<96xf32>
    %70 = vector.shape_cast %69 : vector<96xf32> to vector<1x1x96xf32>
    %71 = vector.broadcast %70 : vector<1x1x96xf32> to vector<16x16x96xf32>
    %72 = arith.mulf %67, %71 : vector<16x16x96xf32>
    %73 = arith.addf %65, %72 : vector<16x16x96xf32>
    %74 = vector.extract_strided_slice %66 {offsets = [1, 0, 0], sizes = [16, 16, 96], strides = [1, 1, 1]} : vector<18x16x96xf32> to vector<16x16x96xf32>
    %c1_53 = arith.constant 1 : index
    %c2_54 = arith.constant 2 : index
    %c0_55 = arith.constant 0 : index
    %75 = vector.load %arg4[%c1_53, %c2_54, %c0_55] : memref<3x3x96xf32, #tpu.memory_space<vmem>>, vector<1x1x96xf32>
    %76 = vector.shape_cast %75 : vector<1x1x96xf32> to vector<96xf32>
    %77 = vector.shape_cast %76 : vector<96xf32> to vector<1x1x96xf32>
    %78 = vector.broadcast %77 : vector<1x1x96xf32> to vector<16x16x96xf32>
    %79 = arith.mulf %74, %78 : vector<16x16x96xf32>
    %80 = arith.addf %73, %79 : vector<16x16x96xf32>
    %81 = vector.extract_strided_slice %66 {offsets = [2, 0, 0], sizes = [16, 16, 96], strides = [1, 1, 1]} : vector<18x16x96xf32> to vector<16x16x96xf32>
    %c2_56 = arith.constant 2 : index
    %c2_57 = arith.constant 2 : index
    %c0_58 = arith.constant 0 : index
    %82 = vector.load %arg4[%c2_56, %c2_57, %c0_58] : memref<3x3x96xf32, #tpu.memory_space<vmem>>, vector<1x1x96xf32>
    %83 = vector.shape_cast %82 : vector<1x1x96xf32> to vector<96xf32>
    %84 = vector.shape_cast %83 : vector<96xf32> to vector<1x1x96xf32>
    %85 = vector.broadcast %84 : vector<1x1x96xf32> to vector<16x16x96xf32>
    %86 = arith.mulf %81, %85 : vector<16x16x96xf32>
    %87 = arith.addf %80, %86 : vector<16x16x96xf32>
    %c0_59 = arith.constant 0 : index
    %c0_60 = arith.constant 0 : index
    %88 = vector.load %arg5[%c0_59, %c0_60] : memref<1x96xf32, #tpu.memory_space<vmem>>, vector<1x96xf32>
    %89 = vector.shape_cast %88 : vector<1x96xf32> to vector<1x1x96xf32>
    %90 = vector.broadcast %89 : vector<1x1x96xf32> to vector<16x16x96xf32>
    %91 = arith.addf %87, %90 : vector<16x16x96xf32>
    %cst_61 = arith.constant 0.000000e+00 : f32
    %cst_62 = arith.constant 6.000000e+00 : f32
    %92 = vector.broadcast %cst_61 : f32 to vector<16x16x96xf32>
    %93 = arith.maximumf %92, %91 : vector<16x16x96xf32>
    %94 = vector.broadcast %cst_62 : f32 to vector<16x16x96xf32>
    %95 = arith.minimumf %94, %93 : vector<16x16x96xf32>
    %96 = vector.shape_cast %95 : vector<16x16x96xf32> to vector<256x96xf32>
    %97 = arith.truncf %96 : vector<256x96xf32> to vector<256x96xbf16>
    %c0_63 = arith.constant 0 : index
    %c0_64 = arith.constant 0 : index
    %98 = vector.load %arg10[%c0_63, %c0_64] : memref<512x96xbf16, #tpu.memory_space<vmem>>, vector<256x96xbf16>
    tpu.vector_store %arg10[%c0_63, %c0_64], %97 {strides = array<i32>} : memref<512x96xbf16, #tpu.memory_space<vmem>>, vector<256x96xbf16>,
    %99 = vector.extract_strided_slice %17 {offsets = [256, 0], sizes = [256, 96], strides = [1, 1]} : vector<512x96xf32> to vector<256x96xf32>
    %100 = vector.shape_cast %99 : vector<256x96xf32> to vector<16x16x96xf32>
    %c1_65 = arith.constant 1 : index
    %c1_66 = arith.constant 1 : index
    %c0_67 = arith.constant 0 : index
    %101 = vector.load %arg9[%c1_65, %c1_66, %c0_67] : memref<18x18x96xf32, #tpu.memory_space<vmem>>, vector<16x16x96xf32>
    tpu.vector_store %arg9[%c1_65, %c1_66, %c0_67], %100 {strides = array<i32>} : memref<18x18x96xf32, #tpu.memory_space<vmem>>, vector<16x16x96xf32>,
    %cst_68 = arith.constant 0.000000e+00 : f32
    %102 = vector.broadcast %cst_68 : f32 to vector<16x16x96xf32>
    %c0_69 = arith.constant 0 : index
    %c0_70 = arith.constant 0 : index
    %c0_71 = arith.constant 0 : index
    %103 = vector.load %arg9[%c0_69, %c0_70, %c0_71] : memref<18x18x96xf32, #tpu.memory_space<vmem>>, vector<18x16x96xf32>
    %104 = vector.extract_strided_slice %103 {offsets = [0, 0, 0], sizes = [16, 16, 96], strides = [1, 1, 1]} : vector<18x16x96xf32> to vector<16x16x96xf32>
    %c0_72 = arith.constant 0 : index
    %c0_73 = arith.constant 0 : index
    %c0_74 = arith.constant 0 : index
    %105 = vector.load %arg4[%c0_72, %c0_73, %c0_74] : memref<3x3x96xf32, #tpu.memory_space<vmem>>, vector<1x1x96xf32>
    %106 = vector.shape_cast %105 : vector<1x1x96xf32> to vector<96xf32>
    %107 = vector.shape_cast %106 : vector<96xf32> to vector<1x1x96xf32>
    %108 = vector.broadcast %107 : vector<1x1x96xf32> to vector<16x16x96xf32>
    %109 = arith.mulf %104, %108 : vector<16x16x96xf32>
    %110 = arith.addf %102, %109 : vector<16x16x96xf32>
    %111 = vector.extract_strided_slice %103 {offsets = [1, 0, 0], sizes = [16, 16, 96], strides = [1, 1, 1]} : vector<18x16x96xf32> to vector<16x16x96xf32>
    %c1_75 = arith.constant 1 : index
    %c0_76 = arith.constant 0 : index
    %c0_77 = arith.constant 0 : index
    %112 = vector.load %arg4[%c1_75, %c0_76, %c0_77] : memref<3x3x96xf32, #tpu.memory_space<vmem>>, vector<1x1x96xf32>
    %113 = vector.shape_cast %112 : vector<1x1x96xf32> to vector<96xf32>
    %114 = vector.shape_cast %113 : vector<96xf32> to vector<1x1x96xf32>
    %115 = vector.broadcast %114 : vector<1x1x96xf32> to vector<16x16x96xf32>
    %116 = arith.mulf %111, %115 : vector<16x16x96xf32>
    %117 = arith.addf %110, %116 : vector<16x16x96xf32>
    %118 = vector.extract_strided_slice %103 {offsets = [2, 0, 0], sizes = [16, 16, 96], strides = [1, 1, 1]} : vector<18x16x96xf32> to vector<16x16x96xf32>
    %c2_78 = arith.constant 2 : index
    %c0_79 = arith.constant 0 : index
    %c0_80 = arith.constant 0 : index
    %119 = vector.load %arg4[%c2_78, %c0_79, %c0_80] : memref<3x3x96xf32, #tpu.memory_space<vmem>>, vector<1x1x96xf32>
    %120 = vector.shape_cast %119 : vector<1x1x96xf32> to vector<96xf32>
    %121 = vector.shape_cast %120 : vector<96xf32> to vector<1x1x96xf32>
    %122 = vector.broadcast %121 : vector<1x1x96xf32> to vector<16x16x96xf32>
    %123 = arith.mulf %118, %122 : vector<16x16x96xf32>
    %124 = arith.addf %117, %123 : vector<16x16x96xf32>
    %c0_81 = arith.constant 0 : index
    %c1_82 = arith.constant 1 : index
    %c0_83 = arith.constant 0 : index
    %125 = vector.load %arg9[%c0_81, %c1_82, %c0_83] : memref<18x18x96xf32, #tpu.memory_space<vmem>>, vector<18x16x96xf32>
    %126 = vector.extract_strided_slice %125 {offsets = [0, 0, 0], sizes = [16, 16, 96], strides = [1, 1, 1]} : vector<18x16x96xf32> to vector<16x16x96xf32>
    %c0_84 = arith.constant 0 : index
    %c1_85 = arith.constant 1 : index
    %c0_86 = arith.constant 0 : index
    %127 = vector.load %arg4[%c0_84, %c1_85, %c0_86] : memref<3x3x96xf32, #tpu.memory_space<vmem>>, vector<1x1x96xf32>
    %128 = vector.shape_cast %127 : vector<1x1x96xf32> to vector<96xf32>
    %129 = vector.shape_cast %128 : vector<96xf32> to vector<1x1x96xf32>
    %130 = vector.broadcast %129 : vector<1x1x96xf32> to vector<16x16x96xf32>
    %131 = arith.mulf %126, %130 : vector<16x16x96xf32>
    %132 = arith.addf %124, %131 : vector<16x16x96xf32>
    %133 = vector.extract_strided_slice %125 {offsets = [1, 0, 0], sizes = [16, 16, 96], strides = [1, 1, 1]} : vector<18x16x96xf32> to vector<16x16x96xf32>
    %c1_87 = arith.constant 1 : index
    %c1_88 = arith.constant 1 : index
    %c0_89 = arith.constant 0 : index
    %134 = vector.load %arg4[%c1_87, %c1_88, %c0_89] : memref<3x3x96xf32, #tpu.memory_space<vmem>>, vector<1x1x96xf32>
    %135 = vector.shape_cast %134 : vector<1x1x96xf32> to vector<96xf32>
    %136 = vector.shape_cast %135 : vector<96xf32> to vector<1x1x96xf32>
    %137 = vector.broadcast %136 : vector<1x1x96xf32> to vector<16x16x96xf32>
    %138 = arith.mulf %133, %137 : vector<16x16x96xf32>
    %139 = arith.addf %132, %138 : vector<16x16x96xf32>
    %140 = vector.extract_strided_slice %125 {offsets = [2, 0, 0], sizes = [16, 16, 96], strides = [1, 1, 1]} : vector<18x16x96xf32> to vector<16x16x96xf32>
    %c2_90 = arith.constant 2 : index
    %c1_91 = arith.constant 1 : index
    %c0_92 = arith.constant 0 : index
    %141 = vector.load %arg4[%c2_90, %c1_91, %c0_92] : memref<3x3x96xf32, #tpu.memory_space<vmem>>, vector<1x1x96xf32>
    %142 = vector.shape_cast %141 : vector<1x1x96xf32> to vector<96xf32>
    %143 = vector.shape_cast %142 : vector<96xf32> to vector<1x1x96xf32>
    %144 = vector.broadcast %143 : vector<1x1x96xf32> to vector<16x16x96xf32>
    %145 = arith.mulf %140, %144 : vector<16x16x96xf32>
    %146 = arith.addf %139, %145 : vector<16x16x96xf32>
    %c0_93 = arith.constant 0 : index
    %c2_94 = arith.constant 2 : index
    %c0_95 = arith.constant 0 : index
    %147 = vector.load %arg9[%c0_93, %c2_94, %c0_95] : memref<18x18x96xf32, #tpu.memory_space<vmem>>, vector<18x16x96xf32>
    %148 = vector.extract_strided_slice %147 {offsets = [0, 0, 0], sizes = [16, 16, 96], strides = [1, 1, 1]} : vector<18x16x96xf32> to vector<16x16x96xf32>
    %c0_96 = arith.constant 0 : index
    %c2_97 = arith.constant 2 : index
    %c0_98 = arith.constant 0 : index
    %149 = vector.load %arg4[%c0_96, %c2_97, %c0_98] : memref<3x3x96xf32, #tpu.memory_space<vmem>>, vector<1x1x96xf32>
    %150 = vector.shape_cast %149 : vector<1x1x96xf32> to vector<96xf32>
    %151 = vector.shape_cast %150 : vector<96xf32> to vector<1x1x96xf32>
    %152 = vector.broadcast %151 : vector<1x1x96xf32> to vector<16x16x96xf32>
    %153 = arith.mulf %148, %152 : vector<16x16x96xf32>
    %154 = arith.addf %146, %153 : vector<16x16x96xf32>
    %155 = vector.extract_strided_slice %147 {offsets = [1, 0, 0], sizes = [16, 16, 96], strides = [1, 1, 1]} : vector<18x16x96xf32> to vector<16x16x96xf32>
    %c1_99 = arith.constant 1 : index
    %c2_100 = arith.constant 2 : index
    %c0_101 = arith.constant 0 : index
    %156 = vector.load %arg4[%c1_99, %c2_100, %c0_101] : memref<3x3x96xf32, #tpu.memory_space<vmem>>, vector<1x1x96xf32>
    %157 = vector.shape_cast %156 : vector<1x1x96xf32> to vector<96xf32>
    %158 = vector.shape_cast %157 : vector<96xf32> to vector<1x1x96xf32>
    %159 = vector.broadcast %158 : vector<1x1x96xf32> to vector<16x16x96xf32>
    %160 = arith.mulf %155, %159 : vector<16x16x96xf32>
    %161 = arith.addf %154, %160 : vector<16x16x96xf32>
    %162 = vector.extract_strided_slice %147 {offsets = [2, 0, 0], sizes = [16, 16, 96], strides = [1, 1, 1]} : vector<18x16x96xf32> to vector<16x16x96xf32>
    %c2_102 = arith.constant 2 : index
    %c2_103 = arith.constant 2 : index
    %c0_104 = arith.constant 0 : index
    %163 = vector.load %arg4[%c2_102, %c2_103, %c0_104] : memref<3x3x96xf32, #tpu.memory_space<vmem>>, vector<1x1x96xf32>
    %164 = vector.shape_cast %163 : vector<1x1x96xf32> to vector<96xf32>
    %165 = vector.shape_cast %164 : vector<96xf32> to vector<1x1x96xf32>
    %166 = vector.broadcast %165 : vector<1x1x96xf32> to vector<16x16x96xf32>
    %167 = arith.mulf %162, %166 : vector<16x16x96xf32>
    %168 = arith.addf %161, %167 : vector<16x16x96xf32>
    %c0_105 = arith.constant 0 : index
    %c0_106 = arith.constant 0 : index
    %169 = vector.load %arg5[%c0_105, %c0_106] : memref<1x96xf32, #tpu.memory_space<vmem>>, vector<1x96xf32>
    %170 = vector.shape_cast %169 : vector<1x96xf32> to vector<1x1x96xf32>
    %171 = vector.broadcast %170 : vector<1x1x96xf32> to vector<16x16x96xf32>
    %172 = arith.addf %168, %171 : vector<16x16x96xf32>
    %cst_107 = arith.constant 0.000000e+00 : f32
    %cst_108 = arith.constant 6.000000e+00 : f32
    %173 = vector.broadcast %cst_107 : f32 to vector<16x16x96xf32>
    %174 = arith.maximumf %173, %172 : vector<16x16x96xf32>
    %175 = vector.broadcast %cst_108 : f32 to vector<16x16x96xf32>
    %176 = arith.minimumf %175, %174 : vector<16x16x96xf32>
    %177 = vector.shape_cast %176 : vector<16x16x96xf32> to vector<256x96xf32>
    %178 = arith.truncf %177 : vector<256x96xf32> to vector<256x96xbf16>
    %c256 = arith.constant 256 : index
    %c0_109 = arith.constant 0 : index
    %179 = vector.load %arg10[%c256, %c0_109] : memref<512x96xbf16, #tpu.memory_space<vmem>>, vector<256x96xbf16>
    tpu.vector_store %arg10[%c256, %c0_109], %178 {strides = array<i32>} : memref<512x96xbf16, #tpu.memory_space<vmem>>, vector<256x96xbf16>,
    %c0_110 = arith.constant 0 : index
    %c0_111 = arith.constant 0 : index
    %180 = vector.load %arg10[%c0_110, %c0_111] : memref<512x96xbf16, #tpu.memory_space<vmem>>, vector<512x96xbf16>
    %c0_112 = arith.constant 0 : index
    %c0_113 = arith.constant 0 : index
    %181 = vector.load %arg6[%c0_112, %c0_113] : memref<96x16xbf16, #tpu.memory_space<vmem>>, vector<96x16xbf16>
    %cst_114 = arith.constant dense<0.000000e+00> : vector<512x16xf32>
    %182 = tpu.matmul %180, %181, %cst_114 {dimension_numbers = #tpu.dot_dimension_numbers<[1], [0], [0], [1], [0, 0, 1, 1], [], []>} : vector<512x96xbf16>, vector<96x16xbf16>, vector<512x16xf32> -> vector<512x16xf32>
    %c0_115 = arith.constant 0 : index
    %c0_116 = arith.constant 0 : index
    %183 = vector.load %arg7[%c0_115, %c0_116] : memref<1x16xf32, #tpu.memory_space<vmem>>, vector<1x16xf32>
    %184 = vector.broadcast %183 : vector<1x16xf32> to vector<512x16xf32>
    %185 = arith.addf %182, %184 : vector<512x16xf32>
    %186 = arith.addf %185, %7 : vector<512x16xf32>
    %187 = vector.shape_cast %186 : vector<512x16xf32> to vector<2x256x16xf32>
    %c0_117 = arith.constant 0 : index
    %c0_118 = arith.constant 0 : index
    %c0_119 = arith.constant 0 : index
    %188 = vector.load %arg8[%c0_117, %c0_118, %c0_119] : memref<2x256x16xf32, #tpu.memory_space<vmem>>, vector<2x256x16xf32>
    tpu.vector_store %arg8[%c0_117, %c0_118, %c0_119], %187 {strides = array<i32>} : memref<2x256x16xf32, #tpu.memory_space<vmem>>, vector<2x256x16xf32>,
    return
  }
  func.func @transform_0(%arg0: i32) -> (i32, i32, i32) {
    %c0_i32 = arith.constant 0 : i32
    %c0_i32_0 = arith.constant 0 : i32
    %c0_i32_1 = arith.constant 0 : i32
    return %arg0, %c0_i32, %c0_i32_0 : i32, i32, i32
  }
  func.func @transform_1(%arg0: i32) -> (i32, i32) {
    %c0_i32 = arith.constant 0 : i32
    %c0_i32_0 = arith.constant 0 : i32
    %c0_i32_1 = arith.constant 0 : i32
    return %c0_i32, %c0_i32_0 : i32, i32
  }
  func.func @transform_2(%arg0: i32) -> (i32, i32) {
    %c0_i32 = arith.constant 0 : i32
    %c0_i32_0 = arith.constant 0 : i32
    %c0_i32_1 = arith.constant 0 : i32
    return %c0_i32, %c0_i32_0 : i32, i32
  }
  func.func @transform_3(%arg0: i32) -> (i32, i32, i32) {
    %c0_i32 = arith.constant 0 : i32
    %c0_i32_0 = arith.constant 0 : i32
    %c0_i32_1 = arith.constant 0 : i32
    %c0_i32_2 = arith.constant 0 : i32
    return %c0_i32, %c0_i32_0, %c0_i32_1 : i32, i32, i32
  }
  func.func @transform_4(%arg0: i32) -> (i32, i32) {
    %c0_i32 = arith.constant 0 : i32
    %c0_i32_0 = arith.constant 0 : i32
    %c0_i32_1 = arith.constant 0 : i32
    return %c0_i32, %c0_i32_0 : i32, i32
  }
  func.func @transform_5(%arg0: i32) -> (i32, i32) {
    %c0_i32 = arith.constant 0 : i32
    %c0_i32_0 = arith.constant 0 : i32
    %c0_i32_1 = arith.constant 0 : i32
    return %c0_i32, %c0_i32_0 : i32, i32
  }
  func.func @transform_6(%arg0: i32) -> (i32, i32) {
    %c0_i32 = arith.constant 0 : i32
    %c0_i32_0 = arith.constant 0 : i32
    %c0_i32_1 = arith.constant 0 : i32
    return %c0_i32, %c0_i32_0 : i32, i32
  }
  func.func @transform_7(%arg0: i32) -> (i32, i32, i32) {
    %c0_i32 = arith.constant 0 : i32
    %c0_i32_0 = arith.constant 0 : i32
    %c0_i32_1 = arith.constant 0 : i32
    return %arg0, %c0_i32, %c0_i32_0 : i32, i32, i32
  }
}

</mosaic_0001>

<bundles_post_ra>
// kernel: tpu_custom_call.1
= control target key start
LH: loop header
LB: loop body
LE: loop exit
PB: predicated region body
PF: predicated region fallthrough
CT: control target
= control target key end

     0   :  { %s4561_s24 = smov 0   ;;  %s7438_s0 = inlined_call_operand.vmem [shape: f32[4,256,16], index: 0, kind: input, shape index: {}]   ;;  %s7439_s1 = inlined_call_operand.vmem [shape: bf16[16,96], index: 1, kind: input, shape index: {}]   ;;  %s7440_s2 = inlined_call_operand.vmem [shape: f32[1,96], index: 2, kind: input, shape index: {}]   ;;  %s7441_s3 = inlined_call_operand.vmem [shape: f32[3,3,96], index: 3, kind: input, shape index: {}]   ;;  %s7442_s4 = inlined_call_operand.vmem [shape: f32[1,96], index: 4, kind: input, shape index: {}]   ;;  %s7443_s5 = inlined_call_operand.vmem [shape: bf16[96,16], index: 5, kind: input, shape index: {}]   ;;  %s7444_s6 = inlined_call_operand.vmem [shape: f32[1,16], index: 6, kind: input, shape index: {}]   ;;  %s7445_s7 = inlined_call_operand.vmem [shape: f32[4,256,16], index: 7, kind: output, shape index: {}]  }
   0x1 LB: > { %s3861_s25 = sadd.s32 4294967295, %s4518_s24   ;;  %p3865_p0 = scmp.ge.s32.totalorder %s4518_s24, 1  ;;  %s4518_s24 = sphi %s4561_s24, %s17_s24  }
   0x2   : > { %p239_p1 = scmp.lt.s32.totalorder %s4518_s24, 3 }
   0x4   : > { %p240_p2 = pnand %p3865_p0, %p239_p1 }
   0x6   : > { %243 = sbr.rel (%p240_p2) target bundleno = 847 (0x34f), region = 48 }
   0xb   : > { %v4375_v0 = vld [vmem:[%s7439_s1] sm:$0xff]   ;;  %s3866_s28 = sshll.u32 %s3861_s25, 1  ;;  %vm288_vm0 = vcmask 785408   ;;  %vm297_vm1 = vcmask 778240   ;;  %v4520_v1 = vmov 0.0   ;;  %vm445_vm2 = vcmask 130048  }
   0xc   : > { %p274_p3 = scmp.lt.s32.totalorder %s3866_s28, 3  ;;  %4212 = vmatprep.subr.bf16.mxu0 %v4375_v0  ;;  %300 = vst.msk [vmem:[#allocation2 + $0x30] sm:$0x1] %vm297_vm1, %v4520_v1  ;;  %299 = vst.msk [vmem:[#allocation2 + $0x18] sm:$0x1] %vm297_vm1, %v4520_v1  ;;  %vm291_vm3 = vcmask 779264  }
   0xd   : > { %4213 = vmatpush3.bf16.msra.mxu0 %v4375_v0  ;;  %289 = vst.msk [vmem:[#allocation2] sm:$0xff] %vm288_vm0, %v4520_v1  ;;  %290 = vst.msk [vmem:[#allocation2 + $0x8] sm:$0xff] %vm288_vm0, %v4520_v1  ;;  %vm1954_vm4 = vcmask 781312  }
   0xe   : > { %s7673_s28 = smov (!%p274_p3, %s3866_s28), 3  ;;  %294 = vst.msk [vmem:[#allocation2 + $0x198] sm:$0xff] %vm288_vm0, %v4520_v1  ;;  %295 = vst.msk [vmem:[#allocation2 + $0x1a0] sm:$0xff] %vm288_vm0, %v4520_v1 }
   0xf   : > { %301 = vst.msk [vmem:[#allocation2 + $0x48] sm:$0x1] %vm297_vm1, %v4520_v1  ;;  %302 = vst.msk [vmem:[#allocation2 + $0x60] sm:$0x1] %vm297_vm1, %v4520_v1  ;;  %s4075_s29 = sshll.u32 %s7673_s28, 8 }
  0x10   : > { %303 = vst.msk [vmem:[#allocation2 + $0x78] sm:$0x1] %vm297_vm1, %v4520_v1  ;;  %304 = vst.msk [vmem:[#allocation2 + $0x90] sm:$0x1] %vm297_vm1, %v4520_v1  ;;  %s4656_s9 = scalar_lea.vmem %s7438_s0, %s4075_s29  ;;  %s7169_s21 = scalar_lea.vmem %s7445_s7, %s4075_s29 }
  0x11   : > { %305 = vst.msk [vmem:[#allocation2 + $0xa8] sm:$0x1] %vm297_vm1, %v4520_v1  ;;  %306 = vst.msk [vmem:[#allocation2 + $0xc0] sm:$0x1] %vm297_vm1, %v4520_v1  ;;  %v334_v2 = vld [vmem:[%s4656_s9] sm:$0xff]  ;;  %v335_v3 = vld [vmem:[%s4656_s9 + $0x8] sm:$0xff] }
  0x12   : > { %307 = vst.msk [vmem:[#allocation2 + $0xd8] sm:$0x1] %vm297_vm1, %v4520_v1  ;;  %308 = vst.msk [vmem:[#allocation2 + $0xf0] sm:$0x1] %vm297_vm1, %v4520_v1  ;;  %v336_v4 = vld [vmem:[%s4656_s9 + $0x10] sm:$0xff]  ;;  %v398_v5 = vpack.c.bf16 %v335_v3, %v334_v2  ;;  %v337_v6 = vld [vmem:[%s4656_s9 + $0x18] sm:$0xff] }
  0x13   : > { %309 = vst.msk [vmem:[#allocation2 + $0x108] sm:$0x1] %vm297_vm1, %v4520_v1  ;;  %310 = vst.msk [vmem:[#allocation2 + $0x120] sm:$0x1] %vm297_vm1, %v4520_v1  ;;  %v338_v7 = vld [vmem:[%s4656_s9 + $0x20] sm:$0xff]  ;;  %v339_v8 = vld [vmem:[%s4656_s9 + $0x28] sm:$0xff]  ;;  %v399_v9 = vpack.c.bf16 %v337_v6, %v336_v4 }
  0x14   : > { %311 = vst.msk [vmem:[#allocation2 + $0x138] sm:$0x1] %vm297_vm1, %v4520_v1  ;;  %312 = vst.msk [vmem:[#allocation2 + $0x150] sm:$0x1] %vm297_vm1, %v4520_v1  ;;  %v400_v10 = vpack.c.bf16 %v339_v8, %v338_v7  ;;  %4214 = vmatprep.mubr.msk.bf16.mxu0 %vm445_vm2, %v398_v5  ;;  %v340_v11 = vld [vmem:[%s4656_s9 + $0x30] sm:$0xff]  ;;  %v341_v12 = vld [vmem:[%s4656_s9 + $0x38] sm:$0xff] }
  0x15   : > { %313 = vst.msk [vmem:[#allocation2 + $0x168] sm:$0x1] %vm297_vm1, %v4520_v1  ;;  %314 = vst.msk [vmem:[#allocation2 + $0x180] sm:$0x1] %vm297_vm1, %v4520_v1  ;;  %4215 = vmatmul.mubr.msk.bf16.vlgmr.msra.gmra.mxu0 %vm445_vm2, %v399_v9  ;;  %v342_v13 = vld [vmem:[%s4656_s9 + $0x40] sm:$0xff]  ;;  %v343_v14 = vld [vmem:[%s4656_s9 + $0x48] sm:$0xff]  ;;  %v401_v15 = vpack.c.bf16 %v341_v12, %v340_v11 }
  0x16   : > { %317 = vst.msk [vmem:[#allocation2 + $0x29] sm:$0x1] %vm297_vm1, %v4520_v1  ;;  %318 = vst.msk [vmem:[#allocation2 + $0x41] sm:$0x1] %vm297_vm1, %v4520_v1  ;;  %4218 = vmatprep.mubr.msk.bf16.mxu0 %vm445_vm2, %v400_v10  ;;  %v402_v16 = vpack.c.bf16 %v343_v14, %v342_v13  ;;  %v344_v17 = vld [vmem:[%s4656_s9 + $0x50] sm:$0xff]  ;;  %v345_v18 = vld [vmem:[%s4656_s9 + $0x58] sm:$0xff] }
  0x17   : > { %319 = vst.msk [vmem:[#allocation2 + $0x59] sm:$0x1] %vm297_vm1, %v4520_v1  ;;  %320 = vst.msk [vmem:[#allocation2 + $0x71] sm:$0x1] %vm297_vm1, %v4520_v1  ;;  %v346_v19 = vld [vmem:[%s4656_s9 + $0x60] sm:$0xff]  ;;  %v347_v20 = vld [vmem:[%s4656_s9 + $0x68] sm:$0xff]  ;;  %v403_v21 = vpack.c.bf16 %v345_v18, %v344_v17 }
  0x18   : > { %321 = vst.msk [vmem:[#allocation2 + $0x89] sm:$0x1] %vm297_vm1, %v4520_v1  ;;  %322 = vst.msk [vmem:[#allocation2 + $0xa1] sm:$0x1] %vm297_vm1, %v4520_v1  ;;  %v404_v22 = vpack.c.bf16 %v347_v20, %v346_v19  ;;  %v348_v23 = vld [vmem:[%s4656_s9 + $0x70] sm:$0xff]  ;;  %v349_v24 = vld [vmem:[%s4656_s9 + $0x78] sm:$0xff] }
  0x19   : > { %323 = vst.msk [vmem:[#allocation2 + $0xb9] sm:$0x1] %vm297_vm1, %v4520_v1  ;;  %324 = vst.msk [vmem:[#allocation2 + $0xd1] sm:$0x1] %vm297_vm1, %v4520_v1  ;;  %v350_v25 = vld [vmem:[%s4656_s9 + $0x80] sm:$0xff]  ;;  %v351_v26 = vld [vmem:[%s4656_s9 + $0x88] sm:$0xff]  ;;  %v405_v27 = vpack.c.bf16 %v349_v24, %v348_v23 }
  0x1a   : > { %325 = vst.msk [vmem:[#allocation2 + $0xe9] sm:$0x1] %vm297_vm1, %v4520_v1  ;;  %326 = vst.msk [vmem:[#allocation2 + $0x101] sm:$0x1] %vm297_vm1, %v4520_v1  ;;  %v406_v28 = vpack.c.bf16 %v351_v26, %v350_v25  ;;  %v352_v29 = vld [vmem:[%s4656_s9 + $0x90] sm:$0xff]  ;;  %v353_v30 = vld [vmem:[%s4656_s9 + $0x98] sm:$0xff] }
  0x1b   : > { %327 = vst.msk [vmem:[#allocation2 + $0x119] sm:$0x1] %vm297_vm1, %v4520_v1  ;;  %328 = vst.msk [vmem:[#allocation2 + $0x131] sm:$0x1] %vm297_vm1, %v4520_v1  ;;  %v354_v31 = vld [vmem:[%s4656_s9 + $0xa0] sm:$0xff]  ;;  %v355_v32 = vld [vmem:[%s4656_s9 + $0xa8] sm:$0xff]  ;;  %v407_v33 = vpack.c.bf16 %v353_v30, %v352_v29 }
  0x1c   : > { %329 = vst.msk [vmem:[#allocation2 + $0x149] sm:$0x1] %vm297_vm1, %v4520_v1  ;;  %330 = vst.msk [vmem:[#allocation2 + $0x161] sm:$0x1] %vm297_vm1, %v4520_v1  ;;  %v408_v34 = vpack.c.bf16 %v355_v32, %v354_v31  ;;  %v356_v35 = vld [vmem:[%s4656_s9 + $0xb0] sm:$0xff]  ;;  %v357_v36 = vld [vmem:[%s4656_s9 + $0xb8] sm:$0xff] }
  0x1d   : > { %331 = vst.msk [vmem:[#allocation2 + $0x179] sm:$0x1] %vm297_vm1, %v4520_v1  ;;  %332 = vst.msk [vmem:[#allocation2 + $0x191] sm:$0x1] %vm297_vm1, %v4520_v1  ;;  %4219 = vmatmul.mubr.msk.bf16.gmra.mxu0 %vm445_vm2, %v401_v15  ;;  %v358_v37 = vld [vmem:[%s4656_s9 + $0xc0] sm:$0xff]  ;;  %v359_v38 = vld [vmem:[%s4656_s9 + $0xc8] sm:$0xff]  ;;  %v409_v39 = vpack.c.bf16 %v357_v36, %v356_v35 }
  0x1e   : > { %298 = vst.msk [vmem:[#allocation2] sm:$0x1] %vm297_vm1, %v4520_v1  ;;  %315 = vst.msk [vmem:[#allocation2 + $0x198] sm:$0x1] %vm297_vm1, %v4520_v1  ;;  %4222 = vmatprep.mubr.msk.bf16.mxu0 %vm445_vm2, %v402_v16  ;;  %v410_v40 = vpack.c.bf16 %v359_v38, %v358_v37  ;;  %v360_v41 = vld [vmem:[%s4656_s9 + $0xd0] sm:$0xff]  ;;  %v361_v42 = vld [vmem:[%s4656_s9 + $0xd8] sm:$0xff] }
  0x1f   : > { %v362_v43 = vld [vmem:[%s4656_s9 + $0xe0] sm:$0xff]  ;;  %v363_v44 = vld [vmem:[%s4656_s9 + $0xe8] sm:$0xff]  ;;  %v411_v45 = vpack.c.bf16 %v361_v42, %v360_v41  ;;  %v364_v47 = vld [vmem:[%s4656_s9 + $0xf0] sm:$0xff]  ;;  %292 = vst.msk [vmem:[#allocation2 + $0x10] sm:$0x3] %vm291_vm3, %v4520_v1 }
  0x20   : > { %v412_v46 = vpack.c.bf16 %v363_v44, %v362_v43  ;;  %v365_v48 = vld [vmem:[%s4656_s9 + $0xf8] sm:$0xff]  ;;  %v366_v49 = vld [vmem:[%s4656_s9 + $0x100] sm:$0xff]  ;;  %v367_v50 = vld [vmem:[%s4656_s9 + $0x108] sm:$0xff]  ;;  %296 = vst.msk [vmem:[#allocation2 + $0x1a8] sm:$0x3] %vm291_vm3, %v4520_v1 }
  0x21   : > { %v413_v51 = vpack.c.bf16 %v365_v48, %v364_v47  ;;  %v414_v52 = vpack.c.bf16 %v367_v50, %v366_v49  ;;  %v368_v53 = vld [vmem:[%s4656_s9 + $0x110] sm:$0xff]  ;;  %v369_v54 = vld [vmem:[%s4656_s9 + $0x118] sm:$0xff]  ;;  %v370_v55 = vld [vmem:[%s4656_s9 + $0x120] sm:$0xff]  ;;  %316 = vst.msk [vmem:[#allocation2 + $0x11] sm:$0x1] %vm297_vm1, %v4520_v1 }
  0x22   : > { %v371_v56 = vld [vmem:[%s4656_s9 + $0x128] sm:$0xff]  ;;  %v415_v57 = vpack.c.bf16 %v369_v54, %v368_v53  ;;  %v372_v59 = vld [vmem:[%s4656_s9 + $0x130] sm:$0xff]  ;;  %v373_v60 = vld [vmem:[%s4656_s9 + $0x138] sm:$0xff]  ;;  %333 = vst.msk [vmem:[#allocation2 + $0x1a9] sm:$0x1] %vm297_vm1, %v4520_v1 }
  0x23   : > { %v416_v58 = vpack.c.bf16 %v371_v56, %v370_v55  ;;  %v374_v61 = vld [vmem:[%s4656_s9 + $0x140] sm:$0xff]  ;;  %v375_v62 = vld [vmem:[%s4656_s9 + $0x148] sm:$0xff]  ;;  %v417_v63 = vpack.c.bf16 %v373_v60, %v372_v59  ;;  %v376_v2 = vld [vmem:[%s4656_s9 + $0x150] sm:$0xff] }
  0x24   : > { %v418_v0 = vpack.c.bf16 %v375_v62, %v374_v61  ;;  %v377_v3 = vld [vmem:[%s4656_s9 + $0x158] sm:$0xff]  ;;  %v378_v4 = vld [vmem:[%s4656_s9 + $0x160] sm:$0xff]  ;;  %v379_v5 = vld [vmem:[%s4656_s9 + $0x168] sm:$0xff] }
  0x25   : > { %4223 = vmatmul.mubr.msk.bf16.gmra.mxu0 %vm445_vm2, %v403_v21  ;;  %v419_v6 = vpack.c.bf16 %v377_v3, %v376_v2  ;;  %v420_v7 = vpack.c.bf16 %v379_v5, %v378_v4  ;;  %v380_v8 = vld [vmem:[%s4656_s9 + $0x170] sm:$0xff]  ;;  %v381_v9 = vld [vmem:[%s4656_s9 + $0x178] sm:$0xff]  ;;  %v382_v10 = vld [vmem:[%s4656_s9 + $0x180] sm:$0xff] }
  0x26   : > { %4226 = vmatprep.mubr.msk.bf16.mxu0 %vm445_vm2, %v404_v22  ;;  %v383_v11 = vld [vmem:[%s4656_s9 + $0x188] sm:$0xff]  ;;  %v421_v12 = vpack.c.bf16 %v381_v9, %v380_v8  ;;  %v384_v14 = vld [vmem:[%s4656_s9 + $0x190] sm:$0xff]  ;;  %v385_v15 = vld [vmem:[%s4656_s9 + $0x198] sm:$0xff] }
  0x27   : > { %v422_v13 = vpack.c.bf16 %v383_v11, %v382_v10  ;;  %v386_v16 = vld [vmem:[%s4656_s9 + $0x1a0] sm:$0xff]  ;;  %v387_v17 = vld [vmem:[%s4656_s9 + $0x1a8] sm:$0xff]  ;;  %v423_v18 = vpack.c.bf16 %v385_v15, %v384_v14  ;;  %v388_v20 = vld [vmem:[%s4656_s9 + $0x1b0] sm:$0xff] }
  0x28   : > { %v424_v19 = vpack.c.bf16 %v387_v17, %v386_v16  ;;  %v389_v1 = vld [vmem:[%s4656_s9 + $0x1b8] sm:$0xff]  ;;  %v390_v21 = vld [vmem:[%s4656_s9 + $0x1c0] sm:$0xff]  ;;  %v391_v22 = vld [vmem:[%s4656_s9 + $0x1c8] sm:$0xff] }
  0x29   : > { %v425_v23 = vpack.c.bf16 %v389_v1, %v388_v20  ;;  %v426_v24 = vpack.c.bf16 %v391_v22, %v390_v21  ;;  %v392_v25 = vld [vmem:[%s4656_s9 + $0x1d0] sm:$0xff]  ;;  %v393_v26 = vld [vmem:[%s4656_s9 + $0x1d8] sm:$0xff]  ;;  %v4377_v35 = vld [vmem:[%s7443_s5 + $0x20] sm:$0xff]  }
  0x2a   : > { %v427_v29 = vpack.c.bf16 %v393_v26, %v392_v25  ;;  %v396_v31 = vld [vmem:[%s4656_s9 + $0x1f0] sm:$0xff]  ;;  %v397_v32 = vld [vmem:[%s4656_s9 + $0x1f8] sm:$0xff]  ;;  %v4775_v38 = vld [vmem:[%s7440_s2] ss:$0 sm:$0xff] }
  0x2b   : > { %v4378_v36 = vld [vmem:[%s7443_s5 + $0x18] sm:$0xff]   ;;  %v4379_v37 = vld [vmem:[%s7443_s5 + $0x10] sm:$0xff]   ;;  %v4380_v53 = vld [vmem:[%s7443_s5 + $0x8] sm:$0xff]  }
  0x2c   : > { %v992_v59 = vld [vmem:[#allocation2] sm:$0xff]  ;;  %v4802_v5 = vld [vmem:[%s7441_s3 + $0x8] ss:$0 sm:$0xff]  ;;  %v4825_v17 = vld [vmem:[%s7441_s3 + $0x9] ss:$0 sm:$0xff] }
  0x2d   : > { %4227 = vmatmul.mubr.msk.bf16.gmra.mxu0 %vm445_vm2, %v405_v27  ;;  %v394_v27 = vld [vmem:[%s4656_s9 + $0x1e0] sm:$0xff] }
  0x2e   : > { %4230 = vmatprep.mubr.msk.bf16.mxu0 %vm445_vm2, %v406_v28  ;;  %v395_v28 = vld [vmem:[%s4656_s9 + $0x1e8] sm:$0xff]  ;;  %v4812_v9 = vld [vmem:[%s7441_s3 + $0x5] ss:$0 sm:$0xff]  ;;  %v4818_v11 = vld [vmem:[%s7441_s3 + $0x2] ss:$0 sm:$0xff] }
  0x2f   : > { %v428_v30 = vpack.c.bf16 %v395_v28, %v394_v27  ;;  %v1237_v60 = vld [vmem:[#allocation2 + $0x1] sm:$0xff] }
  0x30   : > { %v1480_v2 = vld [vmem:[#allocation2 + $0x2] sm:$0xff] }
  0x31   : > { %v4835_v1 = vmul.f32 %v4818_v11, %v1480_v2 }
  0x35   : > { %4231 = vmatmul.mubr.msk.bf16.gmra.mxu0 %vm445_vm2, %v407_v33  ;;  %v429_v33 = vpack.c.bf16 %v397_v32, %v396_v31 }
  0x36   : > { %4234 = vmatprep.mubr.msk.bf16.mxu0 %vm445_vm2, %v408_v34  ;;  %v4376_v34 = vld [vmem:[%s7443_s5 + $0x28] sm:$0xff]  }
  0x37   : > { %4278 = vmatprep.subr.bf16.mxu0 %v4376_v34  ;;  %4354 = vmatprep.subr.bf16.mxu1 %v4376_v34 }
  0x38   : > { %4279 = vmatpush3.bf16.msra.mxu0 %v4376_v34  ;;  %4360 = vmatpush3.bf16.msra.mxu1 %v4376_v34 }
  0x39   : > { %4280 = vmatprep.subr.bf16.mxu0 %v4377_v35  ;;  %4355 = vmatprep.subr.bf16.mxu1 %v4377_v35 }
  0x3c   : > { %4281 = vmatpush3.bf16.msra.mxu0 %v4377_v35  ;;  %4361 = vmatpush3.bf16.msra.mxu1 %v4377_v35 }
  0x3d   : > { %4235 = vmatmul.mubr.msk.bf16.gmra.mxu0 %vm445_vm2, %v409_v39  ;;  %4282 = vmatprep.subr.bf16.mxu0 %v4378_v36 }
  0x3e   : > { %4238 = vmatprep.mubr.msk.bf16.mxu0 %vm445_vm2, %v410_v40  ;;  %4356 = vmatprep.subr.bf16.mxu1 %v4378_v36 }
  0x40   : > { %4283 = vmatpush3.bf16.msra.mxu0 %v4378_v36  ;;  %4362 = vmatpush3.bf16.msra.mxu1 %v4378_v36 }
  0x41   : > { %4284 = vmatprep.subr.bf16.mxu0 %v4379_v37  ;;  %4357 = vmatprep.subr.bf16.mxu1 %v4379_v37 }
  0x44   : > { %4285 = vmatpush3.bf16.msra.mxu0 %v4379_v37  ;;  %4363 = vmatpush3.bf16.msra.mxu1 %v4379_v37  ;;  %v4861_v37 = vld [vmem:[%s7441_s3 + $0x6] ss:$0 sm:$0xff] }
  0x45   : > { %4239 = vmatmul.mubr.msk.bf16.gmra.mxu0 %vm445_vm2, %v411_v45  ;;  %4286 = vmatprep.subr.bf16.mxu0 %v4380_v53 }
  0x46   : > { %4242 = vmatprep.mubr.msk.bf16.mxu0 %vm445_vm2, %v412_v46  ;;  %4358 = vmatprep.subr.bf16.mxu1 %v4380_v53 }
  0x48   : > { %4287 = vmatpush3.bf16.msra.mxu0 %v4380_v53  ;;  %4364 = vmatpush3.bf16.msra.mxu1 %v4380_v53 }
  0x4d   : > { %4243 = vmatmul.mubr.msk.bf16.gmra.mxu0 %vm445_vm2, %v413_v51 }
  0x4e   : > { %4246 = vmatprep.mubr.msk.bf16.mxu0 %vm445_vm2, %v414_v52 }
  0x55   : > { %4247 = vmatmul.mubr.msk.bf16.gmra.mxu0 %vm445_vm2, %v415_v57  ;;  %v4790_v57 = vld [vmem:[%s7441_s3] ss:$0 sm:$0xff] }
  0x56   : > { %4250 = vmatprep.mubr.msk.bf16.mxu0 %vm445_vm2, %v416_v58  ;;  %v4795_v58 = vld [vmem:[%s7441_s3 + $0x4] ss:$0 sm:$0xff]  ;;  %v1033_v10 = vmul.f32 %v4790_v57, %v992_v59 }
  0x5d   : > { %4251 = vmatmul.mubr.msk.bf16.gmra.mxu0 %vm445_vm2, %v417_v63  ;;  %v993_v63 = vld [vmem:[#allocation2 + $0x8] sm:$0xff] }
  0x5e   : > { %4254 = vmatprep.mubr.msk.bf16.mxu0 %vm445_vm2, %v418_v0  ;;  %v1238_v0 = vld [vmem:[#allocation2 + $0x9] sm:$0xff] }
  0x65   : > { %4255 = vmatmul.mubr.msk.bf16.gmra.mxu0 %vm445_vm2, %v419_v6  ;;  %v4807_v6 = vld [vmem:[%s7441_s3 + $0x1] ss:$0 sm:$0xff] }
  0x66   : > { %4258 = vmatprep.mubr.msk.bf16.mxu0 %vm445_vm2, %v420_v7  ;;  %v1481_v7 = vld [vmem:[#allocation2 + $0xa] sm:$0xff]  ;;  %v4832_v20 = vmul.f32 %v4807_v6, %v1238_v0 }
  0x67   : > { %v4843_v25 = vmul.f32 %v4818_v11, %v1481_v7 }
  0x6d   : > { %4259 = vmatmul.mubr.msk.bf16.gmra.mxu0 %vm445_vm2, %v421_v12 }
  0x6e   : > { %4262 = vmatprep.mubr.msk.bf16.mxu0 %vm445_vm2, %v422_v13 }
  0x75   : > { %4263 = vmatmul.mubr.msk.bf16.gmra.mxu0 %vm445_vm2, %v423_v18  ;;  %v1278_v18 = vmul.f32 %v4807_v6, %v1237_v60 }
  0x76   : > { %4266 = vmatprep.mubr.msk.bf16.mxu0 %vm445_vm2, %v424_v19  ;;  %v4829_v19 = vmul.f32 %v4790_v57, %v993_v63 }
  0x7d   : > { %4267 = vmatmul.mubr.msk.bf16.gmra.mxu0 %vm445_vm2, %v425_v23 }
  0x7e   : > { %4270 = vmatprep.mubr.msk.bf16.mxu0 %vm445_vm2, %v426_v24 }
  0x85   : > { %4271 = vmatmul.mubr.msk.bf16.gmra.mxu0 %vm445_vm2, %v427_v29 }
  0x86   : > { %4274 = vmatprep.mubr.msk.bf16.mxu0 %vm445_vm2, %v428_v30 }
  0x8d   : > { %4275 = vmatmul.mubr.msk.bf16.gmra.mxu0 %vm445_vm2, %v429_v33 }
  0xd5   : > { %v4216_v39 = vpop.f32.mrf.mxu0 }
  0xd6   : > { %v585_v40 = vadd.f32 %v4216_v39, %v4775_v38 }
  0xd7   : > { %v576_v41 = vpop.f32.mrf.mxu0 }
  0xd8   : > { %v833_v42 = vmax.f32 %v585_v40, 0.0  ;;  %v577_v43 = vadd.f32 %v4775_v38, %v576_v41 }
  0xd9   : > { %v4217_v44 = vpop.f32.mrf.mxu0 }
  0xda   : > { %v897_v45 = vmin.f32 %v833_v42, 6.0  ;;  %v831_v46 = vmax.f32 %v577_v43, 0.0  ;;  %v588_v47 = vadd.f32 %v4217_v44, %v4775_v38 }
  0xdb   : > { %v579_v48 = vpop.f32.mrf.mxu0 }
  0xdc   : > { %962 = vst.msk [vmem:[#allocation2 + $0x31] sm:$0xff] %vm288_vm0, %v897_v45  ;;  %v895_v49 = vmin.f32 %v831_v46, 6.0  ;;  %v834_v50 = vmax.f32 %v588_v47, 0.0  ;;  %v580_v51 = vadd.f32 %v4775_v38, %v579_v48 }
  0xdd   : > { %v4220_v52 = vpop.f32.mrf.mxu0 }
  0xde   : > { %960 = vst.msk [vmem:[#allocation2 + $0x19] sm:$0xff] %vm288_vm0, %v895_v49  ;;  %v898_v54 = vmin.f32 %v834_v50, 6.0  ;;  %v832_v55 = vmax.f32 %v580_v51, 0.0  ;;  %v601_v56 = vadd.f32 %v4220_v52, %v4775_v38  ;;  %v4880_v52 = vld [vmem:[%s7441_s3 + $0xa] ss:$0 sm:$0xff] }
  0xdf   : > { %v592_v61 = vpop.f32.mrf.mxu0 }
  0xe0   : > { %963 = vst.msk [vmem:[#allocation2 + $0x39] sm:$0xff] %vm288_vm0, %v898_v54  ;;  %v896_v62 = vmin.f32 %v832_v55, 6.0  ;;  %v837_v3 = vmax.f32 %v601_v56, 0.0  ;;  %v593_v4 = vadd.f32 %v4775_v38, %v592_v61 }
  0xe1   : > { %v4221_v8 = vpop.f32.mrf.mxu0 }
  0xe2   : > { %961 = vst.msk [vmem:[#allocation2 + $0x21] sm:$0xff] %vm288_vm0, %v896_v62  ;;  %v901_v12 = vmin.f32 %v837_v3, 6.0  ;;  %v835_v13 = vmax.f32 %v593_v4, 0.0  ;;  %v604_v14 = vadd.f32 %v4221_v8, %v4775_v38 }
  0xe3   : > { %v996_v15 = vld [vmem:[#allocation2 + $0x30] sm:$0xff]  ;;  %v595_v21 = vpop.f32.mrf.mxu0 }
  0xe4   : > { %v1241_v16 = vld [vmem:[#allocation2 + $0x31] sm:$0xff]  ;;  %v4838_v22 = vmul.f32 %v4790_v57, %v996_v15  ;;  %v1105_v23 = vmul.f32 %v4795_v58, %v996_v15  ;;  %v1173_v24 = vmul.f32 %v4802_v5, %v996_v15  ;;  %966 = vst.msk [vmem:[#allocation2 + $0x61] sm:$0xff] %vm288_vm0, %v901_v12  ;;  %v899_v30 = vmin.f32 %v835_v13, 6.0 }
  0xe5   : > { %v4847_v26 = vmul.f32 %v4807_v6, %v1241_v16  ;;  %v4850_v27 = vmul.f32 %v4812_v9, %v1241_v16  ;;  %v994_v28 = vld [vmem:[#allocation2 + $0x18] sm:$0xff]  ;;  %v838_v31 = vmax.f32 %v604_v14, 0.0  ;;  %v4224_v32 = vpop.f32.mrf.mxu0  ;;  %v1416_v33 = vmul.f32 %v4825_v17, %v1241_v16 }
  0xe6   : > { %v1239_v29 = vld [vmem:[#allocation2 + $0x19] sm:$0xff]  ;;  %v1035_v34 = vmul.f32 %v4790_v57, %v994_v28  ;;  %v1103_v35 = vmul.f32 %v4795_v58, %v994_v28  ;;  %964 = vst.msk [vmem:[#allocation2 + $0x49] sm:$0xff] %vm288_vm0, %v899_v30  ;;  %v4866_v44 = vadd.f32 %v4775_v38, %v595_v21  ;;  %v4869_v45 = vadd.f32 %v4224_v32, %v4775_v38 }
  0xe7   : > { %v4856_v36 = vmul.f32 %v4807_v6, %v1239_v29  ;;  %v1347_v39 = vmul.f32 %v4812_v9, %v1239_v29  ;;  %v997_v40 = vld [vmem:[#allocation2 + $0x38] sm:$0xff]  ;;  %v902_v43 = vmin.f32 %v838_v31, 6.0  ;;  %v4871_v46 = vpop.f32.mrf.mxu0 }
  0xe8   : > { %v1242_v41 = vld [vmem:[#allocation2 + $0x39] sm:$0xff]  ;;  %v1135_v47 = vadd.f32 %v1103_v35, %v1033_v10  ;;  %v1137_v48 = vadd.f32 %v1105_v23, %v1035_v34  ;;  %v4874_v49 = vmul.f32 %v4790_v57, %v997_v40  ;;  %v1106_v50 = vmul.f32 %v4795_v58, %v997_v40 }
  0xe9   : > { %v1484_v42 = vld [vmem:[#allocation2 + $0x32] sm:$0xff]  ;;  %v1485_v51 = vld [vmem:[#allocation2 + $0x3a] sm:$0xff]  ;;  %v1174_v53 = vmul.f32 %v4802_v5, %v997_v40  ;;  %v4884_v54 = vmul.f32 %v4807_v6, %v1242_v41  ;;  %v4887_v55 = vmul.f32 %v4812_v9, %v1242_v41  ;;  %v4890_v56 = vmul.f32 %v4825_v17, %v1242_v41  ;;  %967 = vst.msk [vmem:[#allocation2 + $0x69] sm:$0xff] %vm288_vm0, %v902_v43  ;;  %v4893_v61 = vpop.f32.mrf.mxu0  ;;  %v1483_v4 = vld [vmem:[#allocation2 + $0x22] sm:$0xff] }
  0xea   : > { %v995_v59 = vld [vmem:[#allocation2 + $0x20] sm:$0xff]  ;;  %v1205_v62 = vadd.f32 %v1173_v24, %v1135_v47  ;;  %v4896_v63 = vmul.f32 %v4818_v11, %v1484_v42  ;;  %v4899_v0 = vmul.f32 %v4818_v11, %v1485_v51  ;;  %v4902_v2 = vmul.f32 %v4861_v37, %v1484_v42 }
  0xeb   : > { %v1240_v60 = vld [vmem:[#allocation2 + $0x21] sm:$0xff]  ;;  %v4905_v7 = vmul.f32 %v4861_v37, %v1485_v51  ;;  %v1659_v8 = vmul.f32 %v4880_v52, %v1484_v42  ;;  %v4909_v10 = vmul.f32 %v4880_v52, %v1485_v51  ;;  %v1036_v12 = vmul.f32 %v4790_v57, %v995_v59  ;;  %v4912_v14 = vpop.f32.mrf.mxu0 }
  0xec   : > { %7459 = vst [vmem:[#allocation4_spill] sm:$0xff] %v4896_v63  ;;  %7460 = vst [vmem:[#allocation5_spill] sm:$0xff] %v4899_v0  ;;  %v1482_v3 = vld [vmem:[#allocation2 + $0x1a] sm:$0xff]  ;;  %v1310_v15 = vadd.f32 %v1278_v18, %v1205_v62  ;;  %v1104_v16 = vmul.f32 %v4795_v58, %v995_v59  ;;  %v4916_v21 = vmul.f32 %v4807_v6, %v1240_v60 }
  0xed   : > { %7461 = vst [vmem:[#allocation6_spill] sm:$0xff] %v4905_v7  ;;  %v1000_v13 = vld [vmem:[#allocation2 + $0x60] sm:$0xff]  ;;  %v1348_v23 = vmul.f32 %v4812_v9, %v1240_v60  ;;  %v4919_v28 = vadd.f32 %v1106_v50, %v1036_v12  ;;  %v4922_v29 = vmul.f32 %v4818_v11, %v1482_v3  ;;  %v4925_v30 = vmul.f32 %v4818_v11, %v1483_v4  ;;  %v4928_v32 = vpop.f32.mrf.mxu0  ;;  %v998_v41 = vld [vmem:[#allocation2 + $0x48] sm:$0xff] }
  0xee   : > { %v1245_v24 = vld [vmem:[#allocation2 + $0x61] sm:$0xff]  ;;  %v1590_v31 = vmul.f32 %v4861_v37, %v1482_v3  ;;  %v1379_v18 = vadd.f32 %v1347_v39, %v1310_v15  ;;  %v1136_v34 = vadd.f32 %v1104_v16, %v4829_v19  ;;  %v4932_v35 = vmul.f32 %v4861_v37, %v1483_v4  ;;  %v1243_v42 = vld [vmem:[#allocation2 + $0x49] sm:$0xff] }
  0xef   : > { %7462 = vst [vmem:[#allocation7_spill] sm:$0xff] %v4925_v30  ;;  %v4935_v40 = vmul.f32 %v4790_v57, %v1000_v13  ;;  %v1109_v43 = vmul.f32 %v4795_v58, %v1000_v13  ;;  %v1177_v47 = vmul.f32 %v4802_v5, %v1000_v13  ;;  %v4940_v50 = vmul.f32 %v4807_v6, %v1245_v24  ;;  %v4945_v39 = vpop.f32.mrf.mxu0 }
  0xf0   : > { %v4943_v51 = vmul.f32 %v4812_v9, %v1245_v24  ;;  %v1448_v19 = vadd.f32 %v1416_v33, %v1379_v18  ;;  %v1206_v59 = vadd.f32 %v1174_v53, %v1136_v34  ;;  %v1420_v60 = vmul.f32 %v4825_v17, %v1245_v24  ;;  %v1001_v3 = vld [vmem:[#allocation2 + $0x68] sm:$0xff] }
  0xf1   : > { %7463 = vst [vmem:[#allocation8_spill] sm:$0xff] %v4940_v50  ;;  %v1039_v62 = vmul.f32 %v4790_v57, %v998_v41  ;;  %v1107_v4 = vmul.f32 %v4795_v58, %v998_v41  ;;  %v1175_v12 = vmul.f32 %v4802_v5, %v998_v41  ;;  %v4952_v13 = vmul.f32 %v4807_v6, %v1243_v42  ;;  %v1246_v16 = vld [vmem:[#allocation2 + $0x69] sm:$0xff]  ;;  %v4955_v63 = vpop.f32.mrf.mxu0 }
  0xf2   : > { %7464 = vst [vmem:[#allocation9_spill] sm:$0xff] %v4943_v51  ;;  %v1351_v15 = vmul.f32 %v4812_v9, %v1243_v42  ;;  %v1311_v33 = vadd.f32 %v4832_v20, %v1206_v59  ;;  %v1553_v53 = vadd.f32 %v4835_v1, %v1448_v19  ;;  %v1418_v18 = vmul.f32 %v4825_v17, %v1243_v42  ;;  %v1488_v7 = vld [vmem:[#allocation2 + $0x62] sm:$0xff]  ;;  %v1489_v0 = vld [vmem:[#allocation2 + $0x6a] sm:$0xff] }
  0xf3   : > { %7465 = vst [vmem:[#allocation10_spill] sm:$0xff] %v4952_v13  ;;  %v4959_v24 = vadd.f32 %v1109_v43, %v1039_v62  ;;  %v1139_v34 = vadd.f32 %v1107_v4, %v4838_v22  ;;  %v1207_v51 = vadd.f32 %v1175_v12, %v1137_v48  ;;  %v4964_v41 = vmul.f32 %v4790_v57, %v1001_v3  ;;  %v627_v13 = vpop.f32.mrf.mxu0  ;;  %v4382_v22 = vld [vmem:[%s7443_s5] sm:$0xff]  }
  0xf4   : > { %v4967_v50 = vmul.f32 %v4795_v58, %v1001_v3  ;;  %v1380_v30 = vadd.f32 %v1348_v23, %v1311_v33  ;;  %v1622_v20 = vadd.f32 %v1590_v31, %v1553_v53  ;;  %v4970_v1 = vmul.f32 %v4802_v5, %v1001_v3  ;;  %4288 = vmatprep.subr.bf16.mxu0 %v4382_v22 }
  0xf5   : > { %v4973_v43 = vmul.f32 %v4807_v6, %v1246_v16  ;;  %v1209_v48 = vadd.f32 %v1177_v47, %v1139_v34  ;;  %v1312_v42 = vadd.f32 %v4856_v36, %v1207_v51  ;;  %v4980_v19 = vmul.f32 %v4812_v9, %v1246_v16  ;;  %v4232_v23 = vpop.f32.mrf.mxu0  ;;  %4289 = vmatpush3.bf16.msra.mxu0 %v4382_v22 }
  0xf6   : > { %v4983_v59 = vmul.f32 %v4825_v17, %v1246_v16  ;;  %v1449_v31 = vadd.f32 %v4890_v56, %v1380_v30  ;;  %v4986_v62 = vadd.f32 %v1659_v8, %v1622_v20  ;;  %v4989_v3 = vmul.f32 %v4818_v11, %v1488_v7  ;;  %4359 = vmatprep.subr.bf16.mxu1 %v4382_v22 }
  0xf7   : > { %v4992_v4 = vmul.f32 %v4818_v11, %v1489_v0  ;;  %v1314_v36 = vadd.f32 %v4847_v26, %v1209_v48  ;;  %v1381_v47 = vadd.f32 %v4850_v27, %v1312_v42  ;;  %v4997_v51 = vmul.f32 %v4861_v37, %v1488_v7  ;;  %v640_v56 = vpop.f32.mrf.mxu0  ;;  %4365 = vmatpush3.bf16.msra.mxu1 %v4382_v22 }
  0xf8   : > { %7466 = vst [vmem:[#allocation11_spill] sm:$0xff] %v4986_v62  ;;  %v5000_v12 = vmul.f32 %v4861_v37, %v1489_v0  ;;  %v1554_v8 = vadd.f32 %v4843_v25, %v1449_v31  ;;  %v5004_v30 = vmul.f32 %v4880_v52, %v1488_v7  ;;  %v5007_v16 = vmul.f32 %v4880_v52, %v1489_v0 }
  0xf9   : > { %v836_v26 = vmax.f32 %v4866_v44, 0.0  ;;  %v1383_v27 = vadd.f32 %v1351_v15, %v1314_v36  ;;  %v1450_v33 = vadd.f32 %v1418_v18, %v1381_v47  ;;  %v841_v53 = vmax.f32 %v4869_v45, 0.0  ;;  %v4233_v20 = vpop.f32.mrf.mxu0 }
  0xfa   : > { %7467 = vst [vmem:[#allocation12_spill] sm:$0xff] %v5004_v30  ;;  %7468 = vst [vmem:[#allocation13_spill] sm:$0xff] %v5007_v16  ;;  %v609_v34 = vadd.f32 %v4775_v38, %v4871_v46  ;;  %v1623_v25 = vadd.f32 %v4932_v35, %v1554_v8  ;;  %v620_v7 = vadd.f32 %v4893_v61, %v4775_v38  ;;  %v5028_v61 = vld [vmem:[%s7442_s4] ss:$0 sm:$0xff] }
  0xfb   : > { %v900_v48 = vmin.f32 %v836_v26, 6.0  ;;  %v612_v0 = vadd.f32 %v4775_v38, %v4912_v14  ;;  %v5018_v44 = vadd.f32 %v1420_v60, %v1383_v27  ;;  %v1555_v15 = vadd.f32 %v4922_v29, %v1450_v33  ;;  %v643_v42 = vpop.f32.mrf.mxu0 }
  0xfc   : > { %v905_v18 = vmin.f32 %v841_v53, 6.0  ;;  %v839_v45 = vmax.f32 %v609_v34, 0.0  ;;  %v1692_v46 = vadd.f32 %v4909_v10, %v1623_v25  ;;  %v842_v22 = vmax.f32 %v620_v7, 0.0 }
  0xfd   : > { %7469 = vst [vmem:[#allocation14_spill] sm:$0xff] %v5018_v44  ;;  %965 = vst.msk [vmem:[#allocation2 + $0x51] sm:$0xff] %vm288_vm0, %v900_v48  ;;  %v840_v35 = vmax.f32 %v612_v0, 0.0  ;;  %v633_v31 = vadd.f32 %v4928_v32, %v4775_v38  ;;  %v5031_v14 = vadd.f32 %v4902_v2, %v1555_v15  ;;  %v625_v10 = vadd.f32 %v4775_v38, %v4945_v39  ;;  %v4236_v36 = vpop.f32.mrf.mxu0  ;;  %v7472_v44 = vld [vmem:[#allocation7_spill] sm:$0xff] }
  0xfe   : > { %970 = vst.msk [vmem:[#allocation2 + $0x91] sm:$0xff] %vm288_vm0, %v905_v18  ;;  %v903_v29 = vmin.f32 %v839_v45, 6.0  ;;  %v636_v60 = vadd.f32 %v4955_v63, %v4775_v38  ;;  %v5039_v32 = vadd.f32 %v5028_v61, %v1692_v46  ;;  %v906_v47 = vmin.f32 %v842_v22, 6.0 }
  0xff   : > { %v904_v8 = vmin.f32 %v840_v35, 6.0  ;;  %v845_v26 = vmax.f32 %v633_v31, 0.0  ;;  %v843_v2 = vmax.f32 %v625_v10, 0.0  ;;  %v628_v33 = vadd.f32 %v4775_v38, %v627_v13  ;;  %v656_v34 = vpop.f32.mrf.mxu0 }
 0x100   : > { %7470 = vst [vmem:[#allocation15_spill] sm:$0xff] %v5039_v32  ;;  %968 = vst.msk [vmem:[#allocation2 + $0x79] sm:$0xff] %vm288_vm0, %v903_v29  ;;  %v846_v27 = vmax.f32 %v636_v60, 0.0  ;;  %v649_v53 = vadd.f32 %v4232_v23, %v4775_v38  ;;  %v5047_v39 = vadd.f32 %v4775_v38, %v640_v56  ;;  %v5050_v25 = vadd.f32 %v4233_v20, %v4775_v38 }
 0x101   : > { %971 = vst.msk [vmem:[#allocation2 + $0x99] sm:$0xff] %vm288_vm0, %v906_v47  ;;  %969 = vst.msk [vmem:[#allocation2 + $0x81] sm:$0xff] %vm288_vm0, %v904_v8  ;;  %v909_v63 = vmin.f32 %v845_v26, 6.0  ;;  %v5053_v48 = vadd.f32 %v4775_v38, %v643_v42  ;;  %v907_v7 = vmin.f32 %v843_v2, 6.0  ;;  %v844_v13 = vmax.f32 %v628_v33, 0.0  ;;  %v4237_v23 = vpop.f32.mrf.mxu0 }
 0x102   : > { %v910_v0 = vmin.f32 %v846_v27, 6.0  ;;  %v849_v15 = vmax.f32 %v649_v53, 0.0  ;;  %v5060_v46 = vadd.f32 %v4236_v36, %v4775_v38  ;;  %v5065_v29 = vadd.f32 %v4775_v38, %v656_v34 }
 0x103   : > { %974 = vst.msk [vmem:[#allocation2 + $0xc1] sm:$0xff] %vm288_vm0, %v909_v63  ;;  %972 = vst.msk [vmem:[#allocation2 + $0xa9] sm:$0xff] %vm288_vm0, %v907_v7  ;;  %v908_v35 = vmin.f32 %v844_v13, 6.0  ;;  %v5068_v10 = vadd.f32 %v4237_v23, %v4775_v38 }
 0x104   : > { %v999_v20 = vld [vmem:[#allocation2 + $0x50] sm:$0xff]  ;;  %975 = vst.msk [vmem:[#allocation2 + $0xc9] sm:$0xff] %vm288_vm0, %v910_v0  ;;  %v913_v31 = vmin.f32 %v849_v15, 6.0 }
 0x105   : > { %v1244_v22 = vld [vmem:[#allocation2 + $0x51] sm:$0xff]  ;;  %v1040_v60 = vmul.f32 %v4790_v57, %v999_v20  ;;  %v1108_v36 = vmul.f32 %v4795_v58, %v999_v20  ;;  %v1176_v47 = vmul.f32 %v4802_v5, %v999_v20  ;;  %973 = vst.msk [vmem:[#allocation2 + $0xb1] sm:$0xff] %vm288_vm0, %v908_v35 }
 0x106   : > { %v1486_v42 = vld [vmem:[#allocation2 + $0x4a] sm:$0xff]  ;;  %v5074_v8 = vmul.f32 %v4807_v6, %v1244_v22  ;;  %v1487_v26 = vld [vmem:[#allocation2 + $0x52] sm:$0xff]  ;;  %v1352_v27 = vmul.f32 %v4812_v9, %v1244_v22  ;;  %v1419_v33 = vmul.f32 %v4825_v17, %v1244_v22  ;;  %978 = vst.msk [vmem:[#allocation2 + $0xf1] sm:$0xff] %vm288_vm0, %v913_v31 }
 0x107   : > { %v1004_v2 = vld [vmem:[#allocation2 + $0x90] sm:$0xff]  ;;  %v5079_v53 = vmul.f32 %v4818_v11, %v1486_v42  ;;  %v5082_v34 = vmul.f32 %v4818_v11, %v1487_v26  ;;  %v1140_v63 = vadd.f32 %v1108_v36, %v4874_v49  ;;  %v5088_v7 = vadd.f32 %v4967_v50, %v1040_v60  ;;  %v1002_v31 = vld [vmem:[#allocation2 + $0x78] sm:$0xff] }
 0x108   : > { %v1208_v0 = vadd.f32 %v1176_v47, %v4919_v28  ;;  %v5092_v13 = vmul.f32 %v4861_v37, %v1486_v42  ;;  %v1249_v15 = vld [vmem:[#allocation2 + $0x91] sm:$0xff]  ;;  %v1595_v23 = vmul.f32 %v4861_v37, %v1487_v26  ;;  %v1661_v20 = vmul.f32 %v4880_v52, %v1486_v42  ;;  %v1247_v36 = vld [vmem:[#allocation2 + $0x79] sm:$0xff] }
 0x109   : > { %v1662_v22 = vmul.f32 %v4880_v52, %v1487_v26  ;;  %v5098_v35 = vmul.f32 %v4790_v57, %v1004_v2  ;;  %v1210_v49 = vadd.f32 %v4970_v1, %v1140_v63  ;;  %v1113_v28 = vmul.f32 %v4795_v58, %v1004_v2  ;;  %v1005_v63 = vld [vmem:[#allocation2 + $0x98] sm:$0xff] }
 0x10a   : > { %7471 = vst [vmem:[#allocation16_spill] sm:$0xff] %v5092_v13  ;;  %v1313_v50 = vadd.f32 %v4916_v21, %v1208_v0  ;;  %v1181_v60 = vmul.f32 %v4802_v5, %v1004_v2  ;;  %v1693_v47 = vadd.f32 %v1661_v20, %v5031_v14  ;;  %v5106_v56 = vmul.f32 %v4807_v6, %v1249_v15 }
 0x10b   : > { %v5109_v42 = vmul.f32 %v4812_v9, %v1249_v15  ;;  %v1424_v26 = vmul.f32 %v4825_v17, %v1249_v15  ;;  %v1315_v45 = vadd.f32 %v4884_v54, %v1210_v49  ;;  %v1043_v21 = vmul.f32 %v4790_v57, %v1002_v31  ;;  %v1250_v49 = vld [vmem:[#allocation2 + $0x99] sm:$0xff] }
 0x10c   : > { %v1382_v1 = vadd.f32 %v4887_v55, %v1313_v50  ;;  %v1111_v2 = vmul.f32 %v4795_v58, %v1002_v31  ;;  %v1732_v14 = vadd.f32 %v5028_v61, %v1693_v47  ;;  %v1179_v0 = vmul.f32 %v4802_v5, %v1002_v31 }
 0x10d   : > { %v5119_v20 = vmul.f32 %v4807_v6, %v1247_v36  ;;  %v1355_v18 = vmul.f32 %v4812_v9, %v1247_v36  ;;  %v1384_v15 = vadd.f32 %v1352_v27, %v1315_v45  ;;  %v5123_v55 = vadd.f32 %v1113_v28, %v1043_v21  ;;  %v1492_v27 = vld [vmem:[#allocation2 + $0x92] sm:$0xff] }
 0x10e   : > { %v1451_v30 = vadd.f32 %v1419_v33, %v1382_v1  ;;  %v1143_v54 = vadd.f32 %v1111_v2, %v4935_v40  ;;  %v1764_v50 = vmax.f32 %v1732_v14, 0.0  ;;  %v1211_v13 = vadd.f32 %v1179_v0, %v4959_v24  ;;  %v7473_v33 = vld [vmem:[#allocation10_spill] sm:$0xff]  ;;  %v7474_v21 = vld [vmem:[#allocation5_spill] sm:$0xff] }
 0x10f   : > { %v1422_v16 = vmul.f32 %v4825_v17, %v1247_v36  ;;  %v5128_v47 = vmul.f32 %v4790_v57, %v1005_v63  ;;  %v1453_v31 = vadd.f32 %v4983_v59, %v1384_v15  ;;  %v1114_v45 = vmul.f32 %v4795_v58, %v1005_v63  ;;  %v1493_v36 = vld [vmem:[#allocation2 + $0x9a] sm:$0xff]  ;;  %v7476_v59 = vld [vmem:[#allocation8_spill] sm:$0xff] }
 0x110   : > { %v1556_v32 = vadd.f32 %v7472_v44, %v1451_v30  ;;  %v1213_v62 = vadd.f32 %v1181_v60, %v1143_v54  ;;  %v1796_v40 = vmin.f32 %v1764_v50, 6.0  ;;  %v1316_v28 = vadd.f32 %v7473_v33, %v1211_v13  ;;  %v7475_v14 = vld [vmem:[#allocation6_spill] sm:$0xff]  ;;  %v7477_v60 = vld [vmem:[#allocation9_spill] sm:$0xff] }
 0x111   : > { %v1182_v1 = vmul.f32 %v4802_v5, %v1005_v63  ;;  %v5136_v24 = vmul.f32 %v4807_v6, %v1250_v49  ;;  %v1558_v2 = vadd.f32 %v7474_v21, %v1453_v31  ;;  %v5142_v30 = vmul.f32 %v4812_v9, %v1250_v49  ;;  %v1003_v50 = vld [vmem:[#allocation2 + $0x80] sm:$0xff] }
 0x112   : > { %v1625_v0 = vadd.f32 %v7475_v14, %v1556_v32  ;;  %v1318_v15 = vadd.f32 %v7476_v59, %v1213_v62  ;;  %v4079_v44 = vpack.c.bf16 %v1796_v40, %v1796_v40  ;;  %v1385_v54 = vadd.f32 %v7477_v60, %v1316_v28  ;;  %v1248_v62 = vld [vmem:[#allocation2 + $0x81] sm:$0xff] }
 0x113   : > { %v5146_v13 = vmul.f32 %v4825_v17, %v1250_v49  ;;  %v5149_v63 = vmul.f32 %v4818_v11, %v1492_v27  ;;  %v5151_v33 = vadd.f32 %v1595_v23, %v1558_v2  ;;  %v5154_v32 = vmul.f32 %v4818_v11, %v1493_v36  ;;  %v1491_v60 = vld [vmem:[#allocation2 + $0x82] sm:$0xff] }
 0x114   : > { %v1694_v31 = vadd.f32 %v1662_v22, %v1625_v0  ;;  %v1387_v21 = vadd.f32 %v1355_v18, %v1318_v15  ;;  %1957 = vst.msk [vmem:[#allocation3 + $0x8] sm:$0xf] %vm1954_vm4, %v4079_v44  ;;  %v1454_v40 = vadd.f32 %v1422_v16, %v1385_v54  ;;  %v5158_v28 = vmul.f32 %v4861_v37, %v1492_v27  ;;  %v1490_v44 = vld [vmem:[#allocation2 + $0x7a] sm:$0xff] }
 0x115   : > { %7478 = vst [vmem:[#allocation7_spill] sm:$0xff] %v5151_v33  ;;  %7479 = vst [vmem:[#allocation10_spill] sm:$0xff] %v5154_v32  ;;  %v5161_v49 = vmul.f32 %v4861_v37, %v1493_v36  ;;  %v1667_v14 = vmul.f32 %v4880_v52, %v1492_v27  ;;  %v5166_v18 = vmul.f32 %v4880_v52, %v1493_v36 }
 0x116   : > { %v1733_v23 = vadd.f32 %v5028_v61, %v1694_v31  ;;  %v1456_v2 = vadd.f32 %v1424_v26, %v1387_v21  ;;  %v1044_v22 = vmul.f32 %v4790_v57, %v1003_v50  ;;  %v1559_v0 = vadd.f32 %v5079_v53, %v1454_v40  ;;  %v1008_v40 = vld [vmem:[#allocation2 + $0xc0] sm:$0xff] }
 0x117   : > { %7480 = vst [vmem:[#allocation5_spill] sm:$0xff] %v5161_v49  ;;  %v1112_v16 = vmul.f32 %v4795_v58, %v1003_v50  ;;  %v1180_v59 = vmul.f32 %v4802_v5, %v1003_v50  ;;  %v5173_v15 = vmul.f32 %v4807_v6, %v1248_v62  ;;  %v1356_v36 = vmul.f32 %v4812_v9, %v1248_v62 }
 0x118   : > { %v1765_v27 = vmax.f32 %v1733_v23, 0.0  ;;  %v1561_v54 = vadd.f32 %v4989_v3, %v1456_v2  ;;  %v5176_v26 = vadd.f32 %v1114_v45, %v1044_v22  ;;  %v1628_v31 = vadd.f32 %v4997_v51, %v1559_v0 }
 0x119   : > { %v1144_v53 = vadd.f32 %v1112_v16, %v4964_v41  ;;  %v1212_v21 = vadd.f32 %v1180_v59, %v5088_v7  ;;  %v1423_v50 = vmul.f32 %v4825_v17, %v1248_v62  ;;  %v5184_v49 = vmul.f32 %v4818_v11, %v1490_v44  ;;  %v1253_v7 = vld [vmem:[#allocation2 + $0xc1] sm:$0xff] }
 0x11a   : > { %v1797_v33 = vmin.f32 %v1765_v27, 6.0  ;;  %v5187_v23 = vmul.f32 %v4818_v11, %v1491_v60  ;;  %v1598_v3 = vmul.f32 %v4861_v37, %v1490_v44  ;;  %v1599_v51 = vmul.f32 %v4861_v37, %v1491_v60  ;;  %v1006_v59 = vld [vmem:[#allocation2 + $0xa8] sm:$0xff] }
 0x11b   : > { %v1214_v45 = vadd.f32 %v1182_v1, %v1144_v53  ;;  %v1317_v2 = vadd.f32 %v5074_v8, %v1212_v21  ;;  %v1665_v41 = vmul.f32 %v4880_v52, %v1490_v44  ;;  %v1666_v0 = vmul.f32 %v4880_v52, %v1491_v60  ;;  %v1251_v53 = vld [vmem:[#allocation2 + $0xa9] sm:$0xff] }
 0x11c   : > { %v4080_v22 = vpack.c.bf16 %v1797_v33, %v1797_v33  ;;  %v1630_v62 = vadd.f32 %v1598_v3, %v1561_v54  ;;  %v5195_v16 = vmul.f32 %v4790_v57, %v1008_v40  ;;  %v1117_v8 = vmul.f32 %v4795_v58, %v1008_v40 }
 0x11d   : > { %v1319_v27 = vadd.f32 %v4973_v43, %v1214_v45  ;;  %v1386_v32 = vadd.f32 %v4980_v19, %v1317_v2  ;;  %v5199_v1 = vadd.f32 %v1665_v41, %v1628_v31  ;;  %v1185_v33 = vmul.f32 %v4802_v5, %v1008_v40  ;;  %v5212_v43 = vpop.f32.mrf.mxu0  ;;  %v1009_v45 = vld [vmem:[#allocation2 + $0xc8] sm:$0xff] }
 0x11e   : > { %1958 = vst.msk [vmem:[#allocation3 + $0xc] sm:$0xf] %vm1954_vm4, %v4080_v22  ;;  %v5203_v44 = vadd.f32 %v1667_v14, %v1630_v62  ;;  %v5207_v60 = vmul.f32 %v4807_v6, %v1253_v7  ;;  %v5210_v54 = vmul.f32 %v4812_v9, %v1253_v7  ;;  %v1428_v21 = vmul.f32 %v4825_v17, %v1253_v7  ;;  %v1254_v22 = vld [vmem:[#allocation2 + $0xc9] sm:$0xff] }
 0x11f   : > { %7481 = vst [vmem:[#allocation6_spill] sm:$0xff] %v5199_v1  ;;  %v1388_v19 = vadd.f32 %v1356_v36, %v1319_v27  ;;  %v1455_v31 = vadd.f32 %v1423_v50, %v1386_v32  ;;  %v1047_v3 = vmul.f32 %v4790_v57, %v1006_v59  ;;  %v1115_v14 = vmul.f32 %v4795_v58, %v1006_v59  ;;  %v1496_v1 = vld [vmem:[#allocation2 + $0xc2] sm:$0xff] }
 0x120   : > { %7482 = vst [vmem:[#allocation8_spill] sm:$0xff] %v5203_v44  ;;  %7483 = vst [vmem:[#allocation9_spill] sm:$0xff] %v5207_v60  ;;  %v1183_v2 = vmul.f32 %v4802_v5, %v1006_v59  ;;  %v5219_v40 = vmul.f32 %v4807_v6, %v1251_v53  ;;  %v1359_v41 = vmul.f32 %v4812_v9, %v1251_v53  ;;  %v5233_v60 = vpop.f32.mrf.mxu0 }
 0x121   : > { %7484 = vst [vmem:[#allocation17_spill] sm:$0xff] %v5210_v54  ;;  %v1457_v62 = vadd.f32 %v5146_v13, %v1388_v19  ;;  %v1560_v36 = vadd.f32 %v5082_v34, %v1455_v31  ;;  %v5224_v32 = vadd.f32 %v1117_v8, %v1047_v3  ;;  %v1426_v50 = vmul.f32 %v4825_v17, %v1251_v53  ;;  %v1497_v54 = vld [vmem:[#allocation2 + $0xca] sm:$0xff] }
 0x122   : > { %v1147_v7 = vadd.f32 %v1115_v14, %v5098_v35  ;;  %v1215_v27 = vadd.f32 %v1183_v2, %v5123_v55  ;;  %v5230_v59 = vmul.f32 %v4790_v57, %v1009_v45  ;;  %v1118_v44 = vmul.f32 %v4795_v58, %v1009_v45 }
 0x123   : > { %v1562_v13 = vadd.f32 %v4992_v4, %v1457_v62  ;;  %v1629_v34 = vadd.f32 %v5000_v12, %v1560_v36  ;;  %v1186_v8 = vmul.f32 %v4802_v5, %v1009_v45  ;;  %v5239_v53 = vmul.f32 %v4807_v6, %v1254_v22  ;;  %v1007_v12 = vld [vmem:[#allocation2 + $0xb0] sm:$0xff] }
 0x124   : > { %v1217_v35 = vadd.f32 %v1185_v33, %v1147_v7  ;;  %v1320_v55 = vadd.f32 %v5119_v20, %v1215_v27  ;;  %v5243_v19 = vmul.f32 %v4812_v9, %v1254_v22  ;;  %v1429_v31 = vmul.f32 %v4825_v17, %v1254_v22  ;;  %v1252_v22 = vld [vmem:[#allocation2 + $0xb1] sm:$0xff] }
 0x125   : > { %v1631_v3 = vadd.f32 %v1599_v51, %v1562_v13  ;;  %v1698_v14 = vadd.f32 %v1666_v0, %v1629_v34  ;;  %v5247_v2 = vmul.f32 %v4818_v11, %v1496_v1  ;;  %v5250_v4 = vmul.f32 %v4818_v11, %v1497_v54  ;;  %v672_v51 = vpop.f32.mrf.mxu0 }
 0x126   : > { %v1322_v45 = vadd.f32 %v5106_v56, %v1217_v35  ;;  %v1389_v33 = vadd.f32 %v5109_v42, %v1320_v55  ;;  %v5255_v20 = vmul.f32 %v4861_v37, %v1496_v1  ;;  %v5258_v62 = vmul.f32 %v4861_v37, %v1497_v54  ;;  %v1494_v35 = vld [vmem:[#allocation2 + $0xaa] sm:$0xff]  ;;  %v1495_v55 = vld [vmem:[#allocation2 + $0xb2] sm:$0xff] }
 0x127   : > { %7485 = vst [vmem:[#allocation18_spill] sm:$0xff] %v5250_v4  ;;  %v5261_v0 = vadd.f32 %v5166_v18, %v1631_v3  ;;  %v5264_v36 = vadd.f32 %v5028_v61, %v1698_v14  ;;  %v1671_v7 = vmul.f32 %v4880_v52, %v1496_v1  ;;  %v5268_v56 = vmul.f32 %v4880_v52, %v1497_v54 }
 0x128   : > { %7486 = vst [vmem:[#allocation19_spill] sm:$0xff] %v5258_v62  ;;  %v1391_v42 = vadd.f32 %v1359_v41, %v1322_v45  ;;  %v1458_v27 = vadd.f32 %v1426_v50, %v1389_v33  ;;  %v1048_v13 = vmul.f32 %v4790_v57, %v1007_v12  ;;  %v1116_v34 = vmul.f32 %v4795_v58, %v1007_v12  ;;  %v1012_v45 = vld [vmem:[#allocation2 + $0xf0] sm:$0xff]  ;;  %v4241_v33 = vpop.f32.mrf.mxu0 }
 0x129   : > { %7487 = vst [vmem:[#allocation20_spill] sm:$0xff] %v5261_v0  ;;  %7488 = vst [vmem:[#allocation21_spill] sm:$0xff] %v5264_v36  ;;  %v1184_v62 = vmul.f32 %v4802_v5, %v1007_v12  ;;  %v5274_v18 = vmul.f32 %v4807_v6, %v1252_v22  ;;  %v1360_v3 = vmul.f32 %v4812_v9, %v1252_v22 }
 0x12a   : > { %v1427_v1 = vmul.f32 %v4825_v17, %v1252_v22  ;;  %v1460_v14 = vadd.f32 %v1428_v21, %v1391_v42  ;;  %v1563_v54 = vadd.f32 %v5184_v49, %v1458_v27  ;;  %v1148_v41 = vadd.f32 %v1116_v34, %v5128_v47 }
 0x12b   : > { %v5280_v50 = vadd.f32 %v1118_v44, %v1048_v13  ;;  %v1216_v0 = vadd.f32 %v1184_v62, %v5176_v26  ;;  %v5284_v12 = vmul.f32 %v4818_v11, %v1494_v35  ;;  %v5287_v36 = vmul.f32 %v4818_v11, %v1495_v55  ;;  %v1257_v44 = vld [vmem:[#allocation2 + $0xf1] sm:$0xff] }
 0x12c   : > { %v1602_v4 = vmul.f32 %v4861_v37, %v1494_v35  ;;  %v1565_v21 = vadd.f32 %v5149_v63, %v1460_v14  ;;  %v1632_v49 = vadd.f32 %v5158_v28, %v1563_v54  ;;  %v1218_v22 = vadd.f32 %v1186_v8, %v1148_v41  ;;  %v675_v8 = vpop.f32.mrf.mxu0 }
 0x12d   : > { %v1603_v47 = vmul.f32 %v4861_v37, %v1495_v55  ;;  %v1321_v42 = vadd.f32 %v5173_v15, %v1216_v0  ;;  %v1669_v26 = vmul.f32 %v4880_v52, %v1494_v35  ;;  %v1670_v62 = vmul.f32 %v4880_v52, %v1495_v55 }
 0x12e   : > { %v5297_v27 = vmul.f32 %v4790_v57, %v1012_v45  ;;  %v1323_v13 = vadd.f32 %v5136_v24, %v1218_v22  ;;  %v1634_v34 = vadd.f32 %v1602_v4, %v1565_v21  ;;  %v5301_v63 = vmul.f32 %v4795_v58, %v1012_v45 }
 0x12f   : > { %v5304_v28 = vmul.f32 %v4802_v5, %v1012_v45  ;;  %v1390_v14 = vadd.f32 %v5142_v30, %v1321_v42  ;;  %v5307_v15 = vadd.f32 %v1669_v26, %v1632_v49  ;;  %v5310_v0 = vmul.f32 %v4807_v6, %v1257_v44 }
 0x130   : > { %v5313_v35 = vmul.f32 %v4812_v9, %v1257_v44  ;;  %v1392_v55 = vadd.f32 %v1360_v3, %v1323_v13  ;;  %v5315_v24 = vadd.f32 %v1671_v7, %v1634_v34  ;;  %v5318_v4 = vmul.f32 %v4825_v17, %v1257_v44  ;;  %v4244_v44 = vpop.f32.mrf.mxu0 }
 0x131   : > { %7489 = vst [vmem:[#allocation22_spill] sm:$0xff] %v5307_v15  ;;  %v7491_v54 = vmax.f32 %v5047_v39, 0.0  ;;  %v1459_v45 = vadd.f32 %v1427_v1, %v1390_v14  ;;  %v7492_v30 = vmax.f32 %v5050_v25, 0.0  ;;  %v7493_v49 = vmax.f32 %v5053_v48, 0.0  ;;  %v7495_v14 = vld [vmem:[#allocation5_spill] sm:$0xff] }
 0x132   : > { %7490 = vst [vmem:[#allocation23_spill] sm:$0xff] %v5315_v24  ;;  %v853_v42 = vmax.f32 %v5060_v46, 0.0  ;;  %v1461_v26 = vadd.f32 %v1429_v31, %v1392_v55  ;;  %v851_v7 = vmax.f32 %v5065_v29, 0.0  ;;  %v854_v3 = vmax.f32 %v5068_v10, 0.0  ;;  %v7494_v31 = vld [vmem:[#allocation10_spill] sm:$0xff] }
 0x133   : > { %v911_v41 = vmin.f32 %v7491_v54, 6.0  ;;  %v914_v21 = vmin.f32 %v7492_v30, 6.0  ;;  %v912_v22 = vmin.f32 %v7493_v49, 6.0  ;;  %v660_v39 = vadd.f32 %v4775_v38, %v5212_v43  ;;  %v688_v30 = vpop.f32.mrf.mxu0 }
 0x134   : > { %v1564_v1 = vadd.f32 %v5187_v23, %v1459_v45  ;;  %v917_v25 = vmin.f32 %v853_v42, 6.0  ;;  %v681_v48 = vadd.f32 %v5233_v60, %v4775_v38  ;;  %v673_v46 = vadd.f32 %v4775_v38, %v672_v51 }
 0x135   : > { %976 = vst.msk [vmem:[#allocation2 + $0xd9] sm:$0xff] %vm288_vm0, %v911_v41  ;;  %979 = vst.msk [vmem:[#allocation2 + $0xf9] sm:$0xff] %vm288_vm0, %v914_v21  ;;  %v1566_v29 = vadd.f32 %v7494_v31, %v1461_v26  ;;  %v915_v13 = vmin.f32 %v851_v7, 6.0  ;;  %v918_v10 = vmin.f32 %v854_v3, 6.0  ;;  %v852_v34 = vmax.f32 %v660_v39, 0.0  ;;  %v7497_v7 = vld [vmem:[#allocation11_spill] sm:$0xff] }
 0x136   : > { %977 = vst.msk [vmem:[#allocation2 + $0xe1] sm:$0xff] %vm288_vm0, %v912_v22  ;;  %v1633_v43 = vadd.f32 %v7495_v14, %v1564_v1  ;;  %982 = vst.msk [vmem:[#allocation2 + $0x121] sm:$0xff] %vm288_vm0, %v917_v25  ;;  %v857_v23 = vmax.f32 %v681_v48, 0.0  ;;  %v855_v55 = vmax.f32 %v673_v46, 0.0  ;;  %v684_v54 = vadd.f32 %v4241_v33, %v4775_v38 }
 0x137   : > { %v1635_v41 = vadd.f32 %v1603_v47, %v1566_v29  ;;  %980 = vst.msk [vmem:[#allocation2 + $0x109] sm:$0xff] %vm288_vm0, %v915_v13  ;;  %983 = vst.msk [vmem:[#allocation2 + $0x129] sm:$0xff] %vm288_vm0, %v918_v10  ;;  %v916_v60 = vmin.f32 %v852_v34, 6.0  ;;  %v5345_v51 = vadd.f32 %v4775_v38, %v675_v8  ;;  %v5348_v45 = vadd.f32 %v4244_v44, %v4775_v38  ;;  %v7499_v44 = vld [vmem:[#allocation15_spill] sm:$0xff] }
 0x138   : > { %v1702_v21 = vadd.f32 %v1670_v62, %v1633_v43  ;;  %v921_v49 = vmin.f32 %v857_v23, 6.0  ;;  %v919_v22 = vmin.f32 %v855_v55, 6.0  ;;  %v858_v42 = vmax.f32 %v684_v54, 0.0 }
 0x139   : > { %v5351_v26 = vadd.f32 %v5268_v56, %v1635_v41  ;;  %981 = vst.msk [vmem:[#allocation2 + $0x111] sm:$0xff] %vm288_vm0, %v916_v60  ;;  %v5358_v8 = vadd.f32 %v5028_v61, %v7497_v7  ;;  %v5367_v25 = vadd.f32 %v4775_v38, %v688_v30 }
 0x13a   : > { %v5361_v3 = vadd.f32 %v5028_v61, %v1702_v21  ;;  %986 = vst.msk [vmem:[#allocation2 + $0x151] sm:$0xff] %vm288_vm0, %v921_v49  ;;  %984 = vst.msk [vmem:[#allocation2 + $0x139] sm:$0xff] %vm288_vm0, %v919_v22  ;;  %v922_v56 = vmin.f32 %v858_v42, 6.0 }
 0x13b   : > { %7496 = vst [vmem:[#allocation10_spill] sm:$0xff] %v5351_v26 }
 0x13c   : > { %7498 = vst [vmem:[#allocation5_spill] sm:$0xff] %v5361_v3  ;;  %v1010_v62 = vld [vmem:[#allocation2 + $0xd8] sm:$0xff]  ;;  %987 = vst.msk [vmem:[#allocation2 + $0x159] sm:$0xff] %vm288_vm0, %v922_v56 }
 0x13d   : > { %v1255_v39 = vld [vmem:[#allocation2 + $0xd9] sm:$0xff]  ;;  %v1051_v48 = vmul.f32 %v4790_v57, %v1010_v62  ;;  %v1119_v46 = vmul.f32 %v4795_v58, %v1010_v62  ;;  %v1187_v31 = vmul.f32 %v4802_v5, %v1010_v62  ;;  %v1499_v47 = vld [vmem:[#allocation2 + $0xe2] sm:$0xff] }
 0x13e   : > { %v5373_v29 = vmul.f32 %v4807_v6, %v1255_v39  ;;  %v1013_v13 = vld [vmem:[#allocation2 + $0xf8] sm:$0xff]  ;;  %v1363_v14 = vmul.f32 %v4812_v9, %v1255_v39  ;;  %v1430_v43 = vmul.f32 %v4825_v17, %v1255_v39  ;;  %v1011_v21 = vld [vmem:[#allocation2 + $0xe0] sm:$0xff]  ;;  %v1017_v24 = vld [vmem:[#allocation2 + $0x128] sm:$0xff] }
 0x13f   : > { %v1258_v10 = vld [vmem:[#allocation2 + $0xf9] sm:$0xff]  ;;  %v5378_v23 = vmul.f32 %v4790_v57, %v1013_v13  ;;  %v1122_v38 = vmul.f32 %v4795_v58, %v1013_v13  ;;  %v1151_v54 = vadd.f32 %v1119_v46, %v5195_v16  ;;  %v5384_v41 = vadd.f32 %v5301_v63, %v1051_v48  ;;  %v1256_v39 = vld [vmem:[#allocation2 + $0xe1] sm:$0xff] }
 0x140   : > { %v1500_v34 = vld [vmem:[#allocation2 + $0xf2] sm:$0xff]  ;;  %v1501_v55 = vld [vmem:[#allocation2 + $0xfa] sm:$0xff]  ;;  %v1219_v60 = vadd.f32 %v1187_v31, %v5224_v32  ;;  %v1190_v30 = vmul.f32 %v4802_v5, %v1013_v13  ;;  %v5389_v49 = vmul.f32 %v4807_v6, %v1258_v10  ;;  %v5392_v22 = vmul.f32 %v4812_v9, %v1258_v10 }
 0x141   : > { %v5395_v42 = vmul.f32 %v4825_v17, %v1258_v10  ;;  %v5398_v7 = vmul.f32 %v4818_v11, %v1500_v34  ;;  %v1221_v16 = vadd.f32 %v5304_v28, %v1151_v54  ;;  %v5403_v32 = vmul.f32 %v4818_v11, %v1501_v55  ;;  %v7500_v28 = vld [vmem:[#allocation9_spill] sm:$0xff] }
 0x142   : > { %v1324_v63 = vadd.f32 %v5219_v40, %v1219_v60  ;;  %v5406_v62 = vmul.f32 %v4861_v37, %v1500_v34  ;;  %v5409_v56 = vmul.f32 %v4861_v37, %v1501_v55  ;;  %v1675_v48 = vmul.f32 %v4880_v52, %v1500_v34  ;;  %v7501_v40 = vld [vmem:[#allocation17_spill] sm:$0xff] }
 0x143   : > { %v5413_v46 = vmul.f32 %v4880_v52, %v1501_v55  ;;  %v1052_v31 = vmul.f32 %v4790_v57, %v1011_v21  ;;  %v1326_v13 = vadd.f32 %v7500_v28, %v1221_v16  ;;  %v1120_v54 = vmul.f32 %v4795_v58, %v1011_v21  ;;  %v1498_v1 = vld [vmem:[#allocation2 + $0xda] sm:$0xff]  ;;  %v5427_v57 = vpop.f32.mrf.mxu0 }
 0x144   : > { %v1393_v10 = vadd.f32 %v7501_v40, %v1324_v63  ;;  %v1188_v60 = vmul.f32 %v4802_v5, %v1011_v21  ;;  %v5423_v26 = vmul.f32 %v4807_v6, %v1256_v39  ;;  %v1364_v34 = vmul.f32 %v4812_v9, %v1256_v39  ;;  %v1016_v5 = vld [vmem:[#allocation2 + $0x120] sm:$0xff]  ;;  %v1259_v40 = vld [vmem:[#allocation2 + $0x109] sm:$0xff] }
 0x145   : > { %v5420_v33 = vadd.f32 %v1122_v38, %v1052_v31  ;;  %v1431_v55 = vmul.f32 %v4825_v17, %v1256_v39  ;;  %v1395_v16 = vadd.f32 %v1363_v14, %v1326_v13  ;;  %v1152_v63 = vadd.f32 %v1120_v54, %v5230_v59  ;;  %v1261_v39 = vld [vmem:[#allocation2 + $0x121] sm:$0xff] }
 0x146   : > { %v1462_v28 = vadd.f32 %v1430_v43, %v1393_v10  ;;  %v1220_v58 = vadd.f32 %v1188_v60, %v5280_v50  ;;  %v5432_v21 = vmul.f32 %v4818_v11, %v1498_v1  ;;  %v5435_v38 = vmul.f32 %v4818_v11, %v1499_v47  ;;  %v5447_v11 = vld [vmem:[%s7441_s3] ss:$0 sm:$0xff]  ;;  %v5467_v10 = vld [vmem:[%s7441_s3 + $0x8] ss:$0 sm:$0xff]  ;;  %v5473_v60 = vld [vmem:[%s7441_s3 + $0x1] ss:$0 sm:$0xff] }
 0x147   : > { %v1606_v6 = vmul.f32 %v4861_v37, %v1498_v1  ;;  %v1607_v9 = vmul.f32 %v4861_v37, %v1499_v47  ;;  %v1464_v17 = vadd.f32 %v5318_v4, %v1395_v16  ;;  %v1222_v43 = vadd.f32 %v1190_v30, %v1152_v63  ;;  %v5455_v37 = vld [vmem:[%s7441_s3 + $0x4] ss:$0 sm:$0xff]  ;;  %v1014_v30 = vld [vmem:[#allocation2 + $0x108] sm:$0xff] }
 0x148   : > { %v1567_v14 = vadd.f32 %v5284_v12, %v1462_v28  ;;  %v1325_v59 = vadd.f32 %v5274_v18, %v1220_v58  ;;  %v1673_v50 = vmul.f32 %v4880_v52, %v1498_v1  ;;  %v1674_v31 = vmul.f32 %v4880_v52, %v1499_v47  ;;  %v5458_v12 = vpop.f32.mrf.mxu0 }
 0x149   : > { %v5450_v13 = vmul.f32 %v5447_v11, %v1016_v5  ;;  %v1125_v18 = vmul.f32 %v5455_v37, %v1016_v5  ;;  %v1569_v4 = vadd.f32 %v5247_v2, %v1464_v17  ;;  %v1327_v47 = vadd.f32 %v5239_v53, %v1222_v43  ;;  %v5481_v53 = vld [vmem:[%s7441_s3 + $0x5] ss:$0 sm:$0xff] }
 0x14a   : > { %v1636_v52 = vadd.f32 %v5255_v20, %v1567_v14  ;;  %v1394_v1 = vadd.f32 %v5243_v19, %v1325_v59  ;;  %v1193_v54 = vmul.f32 %v5467_v10, %v1016_v5  ;;  %v5476_v2 = vmul.f32 %v5473_v60, %v1261_v39  ;;  %v5489_v20 = vld [vmem:[%s7441_s3 + $0x9] ss:$0 sm:$0xff]  ;;  %v5500_v3 = vpop.f32.mrf.mxu0 }
 0x14b   : > { %v5484_v19 = vmul.f32 %v5481_v53, %v1261_v39  ;;  %v1436_v16 = vmul.f32 %v5489_v20, %v1261_v39  ;;  %v1396_v28 = vadd.f32 %v1364_v34, %v1327_v47  ;;  %v1638_v58 = vadd.f32 %v1606_v6, %v1569_v4  ;;  %7503 = vst [vmem:[#allocation15_spill] sm:$0xff] %v5500_v3  ;;  %v1262_v39 = vld [vmem:[#allocation2 + $0x129] sm:$0xff] }
 0x14c   : > { %v1463_v63 = vadd.f32 %v1431_v55, %v1394_v1  ;;  %v5492_v5 = vadd.f32 %v1673_v50, %v1636_v52  ;;  %v1055_v17 = vmul.f32 %v5447_v11, %v1014_v30  ;;  %v1123_v14 = vmul.f32 %v5455_v37, %v1014_v30  ;;  %v7505_v1 = vld [vmem:[#allocation18_spill] sm:$0xff] }
 0x14d   : > { %v1191_v43 = vmul.f32 %v5467_v10, %v1014_v30  ;;  %v5498_v59 = vmul.f32 %v5473_v60, %v1259_v40  ;;  %v1465_v15 = vadd.f32 %v5395_v42, %v1396_v28  ;;  %v5504_v55 = vadd.f32 %v1675_v48, %v1638_v58  ;;  %v1504_v48 = vld [vmem:[#allocation2 + $0x122] sm:$0xff]  ;;  %v1505_v28 = vld [vmem:[#allocation2 + $0x12a] sm:$0xff] }
 0x14e   : > { %7502 = vst [vmem:[#allocation11_spill] sm:$0xff] %v5492_v5  ;;  %v1568_v34 = vadd.f32 %v5287_v36, %v1463_v63  ;;  %v1367_v6 = vmul.f32 %v5481_v53, %v1259_v40  ;;  %v1155_v50 = vadd.f32 %v1123_v14, %v5297_v27  ;;  %v5508_v4 = vadd.f32 %v1125_v18, %v1055_v17  ;;  %v7506_v5 = vld [vmem:[#allocation19_spill] sm:$0xff] }
 0x14f   : > { %7504 = vst [vmem:[#allocation9_spill] sm:$0xff] %v5504_v55  ;;  %v1223_v52 = vadd.f32 %v1191_v43, %v5384_v41  ;;  %v1434_v47 = vmul.f32 %v5489_v20, %v1259_v40  ;;  %v1570_v30 = vadd.f32 %v7505_v1, %v1465_v15  ;;  %v5515_v42 = vmul.f32 %v5447_v11, %v1017_v24  ;;  %v5523_v40 = vpop.f32.mrf.mxu0 }
 0x150   : > { %v1637_v3 = vadd.f32 %v7506_v5, %v1568_v34  ;;  %v1126_v36 = vmul.f32 %v5455_v37, %v1017_v24  ;;  %v1225_v63 = vadd.f32 %v1193_v54, %v1155_v50  ;;  %v1194_v18 = vmul.f32 %v5467_v10, %v1017_v24  ;;  %v5536_v24 = vld [vmem:[%s7441_s3 + $0x2] ss:$0 sm:$0xff] }
 0x151   : > { %v1328_v27 = vadd.f32 %v5373_v29, %v1223_v52  ;;  %v5521_v41 = vmul.f32 %v5473_v60, %v1262_v39  ;;  %v1639_v15 = vadd.f32 %v1607_v9, %v1570_v30  ;;  %v5526_v5 = vmul.f32 %v5481_v53, %v1262_v39  ;;  %v1015_v9 = vld [vmem:[#allocation2 + $0x110] sm:$0xff] }
 0x152   : > { %v1706_v58 = vadd.f32 %v1674_v31, %v1637_v3  ;;  %v5529_v17 = vmul.f32 %v5489_v20, %v1262_v39  ;;  %v1330_v14 = vadd.f32 %v5310_v0, %v1225_v63  ;;  %v5539_v29 = vmul.f32 %v5536_v24, %v1504_v48  ;;  %v1260_v31 = vld [vmem:[#allocation2 + $0x111] sm:$0xff] }
 0x153   : > { %7507 = vst [vmem:[#allocation17_spill] sm:$0xff] %v5526_v5  ;;  %v1397_v54 = vadd.f32 %v5313_v35, %v1328_v27  ;;  %v5542_v3 = vmul.f32 %v5536_v24, %v1505_v28  ;;  %v5545_v43 = vadd.f32 %v5413_v46, %v1639_v15  ;;  %v5553_v35 = vld [vmem:[%s7441_s3 + $0x6] ss:$0 sm:$0xff]  ;;  %v5564_v46 = vld [vmem:[%s7441_s3 + $0xa] ss:$0 sm:$0xff]  ;;  %v5570_v27 = vpop.f32.mrf.mxu0  ;;  %v1056_v15 = vmul.f32 %v5447_v11, %v1015_v9 }
 0x154   : > { %v5548_v0 = vadd.f32 %v5028_v61, %v1706_v58  ;;  %v5556_v34 = vmul.f32 %v5553_v35, %v1504_v48  ;;  %v5559_v39 = vmul.f32 %v5553_v35, %v1505_v28  ;;  %v1399_v50 = vadd.f32 %v1367_v6, %v1330_v14  ;;  %v1502_v63 = vld [vmem:[#allocation2 + $0x10a] sm:$0xff]  ;;  %v1503_v14 = vld [vmem:[#allocation2 + $0x112] sm:$0xff] }
 0x155   : > { %7508 = vst [vmem:[#allocation18_spill] sm:$0xff] %v5542_v3  ;;  %7509 = vst [vmem:[#allocation19_spill] sm:$0xff] %v5545_v43  ;;  %v1466_v52 = vadd.f32 %v1434_v47, %v1397_v54  ;;  %v1679_v1 = vmul.f32 %v5564_v46, %v1504_v48  ;;  %v5568_v30 = vmul.f32 %v5564_v46, %v1505_v28 }
 0x156   : > { %7510 = vst [vmem:[#allocation24_spill] sm:$0xff] %v5548_v0  ;;  %7511 = vst [vmem:[#allocation25_spill] sm:$0xff] %v5559_v39  ;;  %v1124_v58 = vmul.f32 %v5455_v37, %v1015_v9  ;;  %v1192_v6 = vmul.f32 %v5467_v10, %v1015_v9  ;;  %v5576_v47 = vmul.f32 %v5473_v60, %v1260_v31  ;;  %v1020_v9 = vld [vmem:[#allocation2 + $0x150] sm:$0xff] }
 0x157   : > { %v1468_v54 = vadd.f32 %v1436_v16, %v1399_v50  ;;  %v1571_v43 = vadd.f32 %v5432_v21, %v1466_v52  ;;  %v1368_v48 = vmul.f32 %v5481_v53, %v1260_v31  ;;  %v1435_v28 = vmul.f32 %v5489_v20, %v1260_v31  ;;  %v5594_v31 = vpop.f32.mrf.mxu0 }
 0x158   : > { %v1156_v55 = vadd.f32 %v1124_v58, %v5378_v23  ;;  %v5582_v0 = vadd.f32 %v1126_v36, %v1056_v15  ;;  %v1224_v39 = vadd.f32 %v1192_v6, %v5420_v33  ;;  %v5586_v3 = vmul.f32 %v5536_v24, %v1502_v63  ;;  %v1265_v15 = vld [vmem:[#allocation2 + $0x151] sm:$0xff] }
 0x159   : > { %v1573_v5 = vadd.f32 %v5398_v7, %v1468_v54  ;;  %v1640_v16 = vadd.f32 %v5406_v62, %v1571_v43  ;;  %v5591_v21 = vmul.f32 %v5536_v24, %v1503_v14  ;;  %v1610_v50 = vmul.f32 %v5553_v35, %v1502_v63  ;;  %v1018_v6 = vld [vmem:[#allocation2 + $0x138] sm:$0xff] }
 0x15a   : > { %v1226_v23 = vadd.f32 %v1194_v18, %v1156_v55  ;;  %v1329_v36 = vadd.f32 %v5423_v26, %v1224_v39  ;;  %v1611_v33 = vmul.f32 %v5553_v35, %v1503_v14  ;;  %v1677_v52 = vmul.f32 %v5564_v46, %v1502_v63  ;;  %v1263_v39 = vld [vmem:[#allocation2 + $0x139] sm:$0xff] }
 0x15b   : > { %7512 = vst [vmem:[#allocation26_spill] sm:$0xff] %v5591_v21  ;;  %v1642_v58 = vadd.f32 %v1610_v50, %v1573_v5  ;;  %v1678_v7 = vmul.f32 %v5564_v46, %v1503_v14  ;;  %v5601_v62 = vmul.f32 %v5447_v11, %v1020_v9  ;;  %v1129_v43 = vmul.f32 %v5455_v37, %v1020_v9  ;;  %v5618_v21 = vpop.f32.mrf.mxu0 }
 0x15c   : > { %v1331_v54 = vadd.f32 %v5389_v49, %v1226_v23  ;;  %v1398_v55 = vadd.f32 %v5392_v22, %v1329_v36  ;;  %v5606_v18 = vadd.f32 %v1677_v52, %v1640_v16  ;;  %v1197_v26 = vmul.f32 %v5467_v10, %v1020_v9  ;;  %v1021_v9 = vld [vmem:[#allocation2 + $0x158] sm:$0xff] }
 0x15d   : > { %v5609_v63 = vadd.f32 %v1679_v1, %v1642_v58  ;;  %v5612_v5 = vmul.f32 %v5473_v60, %v1265_v15  ;;  %v5615_v14 = vmul.f32 %v5481_v53, %v1265_v15  ;;  %v1440_v50 = vmul.f32 %v5489_v20, %v1265_v15 }
 0x15e   : > { %7513 = vst [vmem:[#allocation27_spill] sm:$0xff] %v5606_v18  ;;  %v1400_v49 = vadd.f32 %v1368_v48, %v1331_v54  ;;  %v1467_v23 = vadd.f32 %v1435_v28, %v1398_v55  ;;  %v1059_v22 = vmul.f32 %v5447_v11, %v1018_v6  ;;  %v1127_v16 = vmul.f32 %v5455_v37, %v1018_v6  ;;  %v1508_v55 = vld [vmem:[#allocation2 + $0x152] sm:$0xff] }
 0x15f   : > { %7514 = vst [vmem:[#allocation28_spill] sm:$0xff] %v5609_v63  ;;  %7515 = vst [vmem:[#allocation29_spill] sm:$0xff] %v5612_v5  ;;  %v1195_v1 = vmul.f32 %v5467_v10, %v1018_v6  ;;  %v5624_v36 = vmul.f32 %v5473_v60, %v1263_v39  ;;  %v1371_v52 = vmul.f32 %v5481_v53, %v1263_v39  ;;  %v1266_v63 = vld [vmem:[#allocation2 + $0x159] sm:$0xff] }
 0x160   : > { %7516 = vst [vmem:[#allocation30_spill] sm:$0xff] %v5615_v14  ;;  %v1438_v58 = vmul.f32 %v5489_v20, %v1263_v39  ;;  %v1469_v15 = vadd.f32 %v5529_v17, %v1400_v49  ;;  %v1572_v48 = vadd.f32 %v5435_v38, %v1467_v23  ;;  %v1159_v28 = vadd.f32 %v1127_v16, %v5450_v13  ;;  %v1509_v5 = vld [vmem:[#allocation2 + $0x15a] sm:$0xff]  ;;  %v5643_v17 = vpop.f32.mrf.mxu0 }
 0x161   : > { %v5631_v54 = vadd.f32 %v1129_v43, %v1059_v22  ;;  %v1227_v18 = vadd.f32 %v1195_v1, %v5508_v4  ;;  %v5635_v6 = vmul.f32 %v5447_v11, %v1021_v9  ;;  %v5638_v14 = vmul.f32 %v5455_v37, %v1021_v9  ;;  %7517 = vst [vmem:[#allocation31_spill] sm:$0xff] %v5643_v17 }
 0x162   : > { %v5641_v39 = vmul.f32 %v5467_v10, %v1021_v9  ;;  %v1574_v38 = vadd.f32 %v5403_v32, %v1469_v15  ;;  %v1641_v13 = vadd.f32 %v5409_v56, %v1572_v48  ;;  %v1229_v43 = vadd.f32 %v1197_v26, %v1159_v28  ;;  %v1026_v15 = vld [vmem:[#allocation2 + $0x198] sm:$0xff]  ;;  %v5674_v48 = vpop.f32.mrf.mxu0 }
 0x163   : > { %v5648_v49 = vmul.f32 %v5473_v60, %v1266_v63  ;;  %v1332_v4 = vadd.f32 %v5498_v59, %v1227_v18  ;;  %v5652_v23 = vmul.f32 %v5481_v53, %v1266_v63  ;;  %v5655_v22 = vmul.f32 %v5489_v20, %v1266_v63  ;;  %7519 = vst [vmem:[#allocation33_spill] sm:$0xff] %v5674_v48  ;;  %v1271_v28 = vld [vmem:[#allocation2 + $0x199] sm:$0xff] }
 0x164   : > { %v5658_v16 = vmul.f32 %v5536_v24, %v1508_v55  ;;  %v1643_v9 = vadd.f32 %v1611_v33, %v1574_v38  ;;  %v1710_v1 = vadd.f32 %v1678_v7, %v1641_v13  ;;  %v1334_v32 = vadd.f32 %v5476_v2, %v1229_v43 }
 0x165   : > { %v5662_v56 = vmul.f32 %v5536_v24, %v1509_v5  ;;  %v1401_v26 = vadd.f32 %v5484_v19, %v1332_v4  ;;  %v5666_v59 = vmul.f32 %v5553_v35, %v1508_v55  ;;  %v5669_v18 = vmul.f32 %v5553_v35, %v1509_v5 }
 0x166   : > { %v5672_v63 = vmul.f32 %v5564_v46, %v1508_v55  ;;  %v5677_v33 = vadd.f32 %v5568_v30, %v1643_v9  ;;  %v5680_v2 = vadd.f32 %v5028_v61, %v1710_v1  ;;  %v1403_v7 = vadd.f32 %v1371_v52, %v1334_v32  ;;  %v5709_v1 = vpop.f32.mrf.mxu0 }
 0x167   : > { %7518 = vst [vmem:[#allocation32_spill] sm:$0xff] %v5669_v18  ;;  %v5683_v19 = vmul.f32 %v5564_v46, %v1509_v5  ;;  %v1470_v38 = vadd.f32 %v1438_v58, %v1401_v26  ;;  %v7522_v13 = vmax.f32 %v5345_v51, 0.0  ;;  %v7523_v55 = vmax.f32 %v5348_v45, 0.0  ;;  %v1027_v5 = vld [vmem:[#allocation2 + $0x1a0] sm:$0xff]  ;;  %7526 = vst [vmem:[#allocation37_spill] sm:$0xff] %v5709_v1  ;;  %v7547_v18 = vld [vmem:[#allocation29_spill] sm:$0xff] }
 0x168   : > { %7520 = vst [vmem:[#allocation34_spill] sm:$0xff] %v5677_v33  ;;  %7521 = vst [vmem:[#allocation35_spill] sm:$0xff] %v5680_v2  ;;  %v1762_v48 = vmax.f32 %v5358_v8, 0.0  ;;  %v1472_v17 = vadd.f32 %v1440_v50, %v1403_v7  ;;  %v7524_v30 = vmax.f32 %v7499_v44, 0.0  ;;  %v859_v61 = vmax.f32 %v5367_v25, 0.0  ;;  %v1272_v25 = vld [vmem:[#allocation2 + $0x1a1] sm:$0xff] }
 0x169   : > { %v920_v43 = vmin.f32 %v7522_v13, 6.0  ;;  %v925_v4 = vmin.f32 %v7523_v55, 6.0  ;;  %v5694_v52 = vmul.f32 %v5467_v10, %v1026_v15  ;;  %v1575_v58 = vadd.f32 %v5586_v3, %v1470_v38  ;;  %v5705_v8 = vld [vmem:[%s7440_s2] ss:$0 sm:$0xff]  ;;  %v1515_v50 = vld [vmem:[#allocation2 + $0x1a2] sm:$0xff]  ;;  %v7530_v55 = vld [vmem:[#allocation4_spill] sm:$0xff] }
 0x16a   : > { %v1795_v9 = vmin.f32 %v7524_v30, 6.0  ;;  %v1794_v51 = vmin.f32 %v1762_v48, 6.0  ;;  %v5700_v45 = vmul.f32 %v5489_v20, %v1271_v28  ;;  %7525 = vst [vmem:[#allocation36_spill] sm:$0xff] %v5705_v8  ;;  %v700_v44 = vadd.f32 %v5705_v8, %v5427_v57  ;;  %v7531_v30 = vld [vmem:[#allocation7_spill] sm:$0xff] }
 0x16b   : > { %985 = vst.msk [vmem:[#allocation2 + $0x141] sm:$0xff] %vm288_vm0, %v920_v43  ;;  %990 = vst.msk [vmem:[#allocation2 + $0x181] sm:$0xff] %vm288_vm0, %v925_v4  ;;  %v5712_v3 = vadd.f32 %v5539_v29, %v1472_v17  ;;  %v923_v26 = vmin.f32 %v859_v61, 6.0  ;;  %v692_v15 = vadd.f32 %v5705_v8, %v5458_v12  ;;  %v5717_v48 = vadd.f32 %v5556_v34, %v1575_v58  ;;  %v7528_v12 = vld [vmem:[#allocation15_spill] sm:$0xff]  ;;  %v7529_v43 = vld [vmem:[#allocation14_spill] sm:$0xff]  ;;  %v5741_v58 = vpop.f32.mrf.mxu0 }
 0x16c   : > { %v4078_v32 = vpack.c.bf16 %v1795_v9, %v1795_v9  ;;  %v4077_v7 = vpack.c.bf16 %v1794_v51, %v1794_v51  ;;  %v862_v28 = vmax.f32 %v700_v44, 0.0  ;;  %v5720_v38 = vmul.f32 %v5467_v10, %v1027_v5  ;;  %v7532_v9 = vld [vmem:[#allocation13_spill] sm:$0xff]  ;;  %7533 = vst [vmem:[#allocation15_spill] sm:$0xff] %v5741_v58 }
 0x16d   : > { %988 = vst.msk [vmem:[#allocation2 + $0x169] sm:$0xff] %vm288_vm0, %v923_v26  ;;  %v860_v57 = vmax.f32 %v692_v15, 0.0  ;;  %v5725_v29 = vmul.f32 %v5489_v20, %v1272_v25  ;;  %v5728_v17 = vmul.f32 %v5564_v46, %v1515_v50  ;;  %v713_v34 = vadd.f32 %v5705_v8, %v7528_v12 }
 0x16e   : > { %1956 = vst.msk [vmem:[#allocation3 + $0x4] sm:$0xf] %vm1954_vm4, %v4078_v32  ;;  %1955 = vst.msk [vmem:[#allocation3] sm:$0xf] %vm1954_vm4, %v4077_v7  ;;  %v926_v13 = vmin.f32 %v862_v28, 6.0  ;;  %v1557_v4 = vadd.f32 %v7530_v55, %v7529_v43  ;;  %v1696_v61 = vadd.f32 %v7532_v9, %v7531_v30  ;;  %v5739_v5 = vadd.f32 %v5705_v8, %v5523_v40  ;;  %v7534_v32 = vld [vmem:[#allocation16_spill] sm:$0xff] }
 0x16f   : > { %7527 = vst [vmem:[#allocation38_spill] sm:$0xff] %v5728_v17  ;;  %v924_v51 = vmin.f32 %v860_v57, 6.0  ;;  %v865_v44 = vmax.f32 %v713_v34, 0.0  ;;  %v5745_v25 = vadd.f32 %v5705_v8, %v5570_v27  ;;  %v5749_v50 = vadd.f32 %v5705_v8, %v5594_v31  ;;  %v5758_v40 = vld [vmem:[%s7442_s4] ss:$0 sm:$0xff]  ;;  %v4383_v27 = vld [vmem:[#allocation3 + $0x8] sm:$0xff]  }
 0x170   : > { %991 = vst.msk [vmem:[#allocation2 + $0x189] sm:$0xff] %vm288_vm0, %v926_v13  ;;  %v5753_v26 = vadd.f32 %v7534_v32, %v1557_v4  ;;  %v5761_v15 = vadd.f32 %v5758_v40, %v1696_v61  ;;  %v7535_v7 = vld [vmem:[#allocation6_spill] sm:$0xff]  ;;  %v5773_v55 = vadd.f32 %v5705_v8, %v5618_v21 }
 0x171   : > { %v5766_v28 = vadd.f32 %v5758_v40, %v7535_v7  ;;  %989 = vst.msk [vmem:[#allocation2 + $0x171] sm:$0xff] %vm288_vm0, %v924_v51  ;;  %v929_v34 = vmin.f32 %v865_v44, 6.0  ;;  %v5781_v44 = vpop.f32.mrf.mxu0 }
 0x172   : > { %v1019_v31 = vld [vmem:[#allocation2 + $0x140] sm:$0xff]  ;;  %7537 = vst [vmem:[#allocation4_spill] sm:$0xff] %v5773_v55  ;;  %7538 = vst [vmem:[#allocation7_spill] sm:$0xff] %v5781_v44 }
 0x173   : > { %7536 = vst [vmem:[#allocation14_spill] sm:$0xff] %v5766_v28  ;;  %v1264_v57 = vld [vmem:[#allocation2 + $0x141] sm:$0xff]  ;;  %v1060_v4 = vmul.f32 %v5447_v11, %v1019_v31  ;;  %v1128_v30 = vmul.f32 %v5455_v37, %v1019_v31  ;;  %v1196_v9 = vmul.f32 %v5467_v10, %v1019_v31  ;;  %1989 = vst.msk [vmem:[#allocation2 + $0x31] sm:$0xff] %vm288_vm0, %v929_v34 }
 0x174   : > { %v1506_v12 = vld [vmem:[#allocation2 + $0x13a] sm:$0xff]  ;;  %v5779_v61 = vmul.f32 %v5473_v60, %v1264_v57  ;;  %v1507_v32 = vld [vmem:[#allocation2 + $0x142] sm:$0xff]  ;;  %v1372_v7 = vmul.f32 %v5481_v53, %v1264_v57  ;;  %v1439_v43 = vmul.f32 %v5489_v20, %v1264_v57 }
 0x175   : > { %v1024_v51 = vld [vmem:[#allocation2 + $0x180] sm:$0xff]  ;;  %v5786_v21 = vmul.f32 %v5536_v24, %v1506_v12  ;;  %v5789_v13 = vmul.f32 %v5536_v24, %v1507_v32  ;;  %v1160_v31 = vadd.f32 %v1128_v30, %v5515_v42  ;;  %v5794_v33 = vadd.f32 %v5638_v14, %v1060_v4  ;;  %v1022_v57 = vld [vmem:[#allocation2 + $0x168] sm:$0xff]  ;;  %v4381_v34 = vld [vmem:[#allocation3] sm:$0xff]  }
 0x176   : > { %v1228_v2 = vadd.f32 %v1196_v9, %v5582_v0  ;;  %v1614_v44 = vmul.f32 %v5553_v35, %v1506_v12  ;;  %v1269_v58 = vld [vmem:[#allocation2 + $0x181] sm:$0xff]  ;;  %v1615_v1 = vmul.f32 %v5553_v35, %v1507_v32  ;;  %v1681_v8 = vmul.f32 %v5564_v46, %v1506_v12  ;;  %v1267_v30 = vld [vmem:[#allocation2 + $0x169] sm:$0xff]  ;;  %v5806_v9 = vpop.f32.mrf.mxu0  ;;  %4290 = vmatprep.mubr.msk.bf16.mxu0 %vm288_vm0, %v4381_v34 }
 0x177   : > { %v1682_v17 = vmul.f32 %v5564_v46, %v1507_v32  ;;  %v1133_v55 = vmul.f32 %v5455_v37, %v1024_v51  ;;  %v1230_v42 = vadd.f32 %v5641_v39, %v1160_v31  ;;  %v1201_v0 = vmul.f32 %v5467_v10, %v1024_v51  ;;  %7539 = vst [vmem:[#allocation13_spill] sm:$0xff] %v5806_v9  ;;  %v1025_v31 = vld [vmem:[#allocation2 + $0x188] sm:$0xff] }
 0x178   : > { %v1333_v14 = vadd.f32 %v5576_v47, %v1228_v2  ;;  %v1646_v4 = vadd.f32 %v1614_v44, %v5712_v3  ;;  %v5809_v28 = vadd.f32 %v1681_v8, %v5717_v48  ;;  %v1377_v12 = vmul.f32 %v5481_v53, %v1269_v58  ;;  %v7541_v2 = vld [vmem:[#allocation17_spill] sm:$0xff]  ;;  %4291 = vmatmul.mubr.msk.bf16.vlgmr.msra.gmra.mxu0 %vm288_vm0, %v4383_v27 }
 0x179   : > { %v1444_v32 = vmul.f32 %v5489_v20, %v1269_v58  ;;  %v1063_v39 = vmul.f32 %v5447_v11, %v1022_v57  ;;  %v1335_v47 = vadd.f32 %v5521_v41, %v1230_v42  ;;  %v1131_v44 = vmul.f32 %v5455_v37, %v1022_v57 }
 0x17a   : > { %7540 = vst [vmem:[#allocation16_spill] sm:$0xff] %v5809_v28  ;;  %v1402_v3 = vadd.f32 %v7541_v2, %v1333_v14  ;;  %v5818_v51 = vadd.f32 %v5672_v63, %v1646_v4  ;;  %v1199_v48 = vmul.f32 %v5467_v10, %v1022_v57  ;;  %v1308_v58 = vmul.f32 %v5473_v60, %v1267_v30  ;;  %v1270_v28 = vld [vmem:[#allocation2 + $0x189] sm:$0xff]  ;;  %v5827_v4 = vpop.f32.mrf.mxu0 }
 0x17b   : > { %v1165_v8 = vadd.f32 %v1133_v55, %v1063_v39  ;;  %v1375_v34 = vmul.f32 %v5481_v53, %v1267_v30  ;;  %v1404_v9 = vadd.f32 %v1372_v7, %v1335_v47  ;;  %v1163_v42 = vadd.f32 %v1131_v44, %v5601_v62  ;;  %v1512_v14 = vld [vmem:[#allocation2 + $0x182] sm:$0xff]  ;;  %7543 = vst [vmem:[#allocation17_spill] sm:$0xff] %v5827_v4  ;;  %v1513_v39 = vld [vmem:[#allocation2 + $0x18a] sm:$0xff] }
 0x17c   : > { %7542 = vst [vmem:[#allocation6_spill] sm:$0xff] %v5818_v51  ;;  %v1471_v41 = vadd.f32 %v1439_v43, %v1402_v3  ;;  %v1442_v63 = vmul.f32 %v5489_v20, %v1267_v30  ;;  %v1231_v2 = vadd.f32 %v1199_v48, %v5631_v54  ;;  %v1134_v55 = vmul.f32 %v5455_v37, %v1025_v31  ;;  %v7544_v7 = vld [vmem:[#allocation26_spill] sm:$0xff] }
 0x17d   : > { %v1235_v27 = vadd.f32 %v5694_v52, %v1165_v8  ;;  %v1202_v57 = vmul.f32 %v5467_v10, %v1025_v31  ;;  %v1473_v51 = vadd.f32 %v5655_v22, %v1404_v9  ;;  %v1233_v47 = vadd.f32 %v1201_v0, %v1163_v42  ;;  %v1023_v52 = vld [vmem:[#allocation2 + $0x170] sm:$0xff]  ;;  %v7545_v8 = vld [vmem:[#allocation18_spill] sm:$0xff]  ;;  %v7546_v31 = vld [vmem:[#allocation25_spill] sm:$0xff]  ;;  %v5847_v0 = vpop.f32.mrf.mxu0 }
 0x17e   : > { %v1576_v43 = vadd.f32 %v7544_v7, %v1471_v41  ;;  %v1378_v62 = vmul.f32 %v5481_v53, %v1270_v28  ;;  %v1336_v30 = vadd.f32 %v5624_v36, %v1231_v2  ;;  %v5838_v44 = vmul.f32 %v5489_v20, %v1270_v28  ;;  %v7548_v41 = vld [vmem:[#allocation30_spill] sm:$0xff] }
 0x17f   : > { %v1340_v3 = vadd.f32 %v1308_v58, %v1235_v27  ;;  %v1620_v54 = vmul.f32 %v5553_v35, %v1512_v14  ;;  %v1578_v48 = vadd.f32 %v7545_v8, %v1473_v51  ;;  %v1338_v22 = vadd.f32 %v7547_v18, %v1233_v47 }
 0x180   : > { %v1645_v4 = vadd.f32 %v7546_v31, %v1576_v43  ;;  %v5845_v9 = vmul.f32 %v5553_v35, %v1513_v39  ;;  %v1405_v36 = vadd.f32 %v7548_v41, %v1336_v30  ;;  %v1687_v28 = vmul.f32 %v5564_v46, %v1512_v14  ;;  %v1268_v43 = vld [vmem:[#allocation2 + $0x171] sm:$0xff] }
 0x181   : > { %v1409_v58 = vadd.f32 %v1377_v12, %v1340_v3  ;;  %v5852_v42 = vmul.f32 %v5564_v46, %v1513_v39  ;;  %v1647_v2 = vadd.f32 %v1615_v1, %v1578_v48  ;;  %v1407_v51 = vadd.f32 %v1375_v34, %v1338_v22  ;;  %v5864_v34 = vpop.f32.mrf.mxu0  ;;  %v5895_v22 = vld [vmem:[%s7441_s3 + $0x4] ss:$0 sm:$0xff] }
 0x182   : > { %v1714_v27 = vadd.f32 %v1682_v17, %v1645_v4  ;;  %v1064_v7 = vmul.f32 %v5447_v11, %v1023_v52  ;;  %v1474_v18 = vadd.f32 %v1442_v63, %v1405_v36  ;;  %v1132_v8 = vmul.f32 %v5455_v37, %v1023_v52  ;;  %v1510_v17 = vld [vmem:[#allocation2 + $0x16a] sm:$0xff] }
 0x183   : > { %v1478_v47 = vadd.f32 %v5700_v45, %v1409_v58  ;;  %v1200_v31 = vmul.f32 %v5467_v10, %v1023_v52  ;;  %v5859_v12 = vadd.f32 %v5683_v19, %v1647_v2  ;;  %v1476_v39 = vadd.f32 %v1444_v32, %v1407_v51  ;;  %v1511_v10 = vld [vmem:[#allocation2 + $0x172] sm:$0xff] }
 0x184   : > { %v5862_v14 = vadd.f32 %v5758_v40, %v1714_v27  ;;  %v1166_v1 = vadd.f32 %v1134_v55, %v1064_v7  ;;  %v1579_v11 = vadd.f32 %v5786_v21, %v1474_v18  ;;  %v1164_v63 = vadd.f32 %v1132_v8, %v5635_v6  ;;  %v5877_v52 = vld [vmem:[#allocation2 + $0x30] sm:$0xff] }
 0x185   : > { %v1232_v45 = vadd.f32 %v1200_v31, %v5794_v33  ;;  %v1309_v37 = vmul.f32 %v5473_v60, %v1268_v43  ;;  %v1581_v19 = vadd.f32 %v5658_v16, %v1476_v39  ;;  %v1376_v30 = vmul.f32 %v5481_v53, %v1268_v43  ;;  %v5882_v60 = vld [vmem:[%s7441_s3] ss:$0 sm:$0xff] }
 0x186   : > { %v1236_v4 = vadd.f32 %v5720_v38, %v1166_v1  ;;  %v1443_v32 = vmul.f32 %v5489_v20, %v1268_v43  ;;  %v1648_v55 = vadd.f32 %v5666_v59, %v1579_v11  ;;  %v1234_v3 = vadd.f32 %v1202_v57, %v1164_v63  ;;  %v5887_v59 = vpop.f32.mrf.mxu0  ;;  %v7553_v63 = vld [vmem:[#allocation32_spill] sm:$0xff] }
 0x187   : > { %v1337_v21 = vadd.f32 %v5779_v61, %v1232_v45  ;;  %v1551_v6 = vmul.f32 %v5536_v24, %v1510_v17  ;;  %v1552_v33 = vmul.f32 %v5536_v24, %v1511_v10  ;;  %v1618_v53 = vmul.f32 %v5553_v35, %v1510_v17 }
 0x188   : > { %v1341_v16 = vadd.f32 %v1309_v37, %v1236_v4  ;;  %v1619_v20 = vmul.f32 %v5553_v35, %v1511_v10  ;;  %v1339_v38 = vadd.f32 %v5648_v49, %v1234_v3  ;;  %v1685_v48 = vmul.f32 %v5564_v46, %v1510_v17  ;;  %v5915_v43 = vpop.f32.mrf.mxu0  ;;  %v7557_v3 = vld [vmem:[#allocation38_spill] sm:$0xff] }
 0x189   : > { %v1406_v61 = vadd.f32 %v5652_v23, %v1337_v21  ;;  %v1583_v57 = vadd.f32 %v1551_v6, %v1478_v47  ;;  %v1650_v24 = vadd.f32 %v1618_v53, %v1581_v19  ;;  %v1686_v36 = vmul.f32 %v5564_v46, %v1511_v10  ;;  %v7549_v46 = vld [vmem:[#allocation12_spill] sm:$0xff] }
 0x18a   : > { %v1410_v41 = vadd.f32 %v1378_v62, %v1341_v16  ;;  %v5900_v35 = vmul.f32 %v5882_v60, %v5877_v52  ;;  %v1408_v58 = vadd.f32 %v1376_v30, %v1339_v38  ;;  %v5904_v23 = vadd.f32 %v1685_v48, %v1648_v55  ;;  %v5936_v4 = vpop.f32.mrf.mxu0 }
 0x18b   : > { %v1475_v49 = vadd.f32 %v1443_v32, %v1406_v61  ;;  %v5902_v2 = vadd.f32 %v1620_v54, %v1583_v57  ;;  %v5907_v51 = vadd.f32 %v1687_v28, %v1650_v24  ;;  %v5911_v62 = vmul.f32 %v5895_v22, %v5877_v52  ;;  %v7558_v61 = vld [vmem:[#allocation8_spill] sm:$0xff] }
 0x18c   : > { %v1479_v27 = vadd.f32 %v5725_v29, %v1410_v41  ;;  %v1695_v7 = vadd.f32 %v7549_v46, %v5753_v26  ;;  %v1477_v18 = vadd.f32 %v5838_v44, %v1408_v58  ;;  %v1767_v47 = vmax.f32 %v5761_v15, 0.0  ;;  %v7554_v15 = vld [vmem:[#allocation14_spill] sm:$0xff]  ;;  %v7559_v41 = vld [vmem:[#allocation20_spill] sm:$0xff]  ;;  %v7562_v46 = vld [vmem:[#allocation33_spill] sm:$0xff] }
 0x18d   : > { %v1580_v54 = vadd.f32 %v5789_v13, %v1475_v49  ;;  %v7550_v8 = vmax.f32 %v5739_v5, 0.0  ;;  %v7551_v39 = vmax.f32 %v5745_v25, 0.0  ;;  %v7552_v17 = vmax.f32 %v5749_v50, 0.0  ;;  %v7555_v25 = vld [vmem:[#allocation21_spill] sm:$0xff]  ;;  %v7556_v50 = vld [vmem:[#allocation4_spill] sm:$0xff]  ;;  %v5955_v49 = vpop.f32.mrf.mxu0 }
 0x18e   : > { %v1584_v28 = vadd.f32 %v1552_v33, %v1479_v27  ;;  %v1734_v31 = vadd.f32 %v5758_v40, %v1695_v7  ;;  %v1582_v11 = vadd.f32 %v5662_v56, %v1477_v18  ;;  %v1799_v45 = vmin.f32 %v1767_v47, 6.0  ;;  %v7561_v58 = vld [vmem:[#allocation36_spill] sm:$0xff]  ;;  %v7563_v18 = vld [vmem:[#allocation37_spill] sm:$0xff]  ;;  %v7564_v47 = vld [vmem:[#allocation22_spill] sm:$0xff] }
 0x18f   : > { %v927_v29 = vmin.f32 %v7550_v8, 6.0  ;;  %v930_v1 = vmin.f32 %v7551_v39, 6.0  ;;  %v928_v26 = vmin.f32 %v7552_v17, 6.0  ;;  %v1649_v44 = vadd.f32 %v7553_v63, %v1580_v54  ;;  %v7565_v39 = vld [vmem:[#allocation5_spill] sm:$0xff]  ;;  %v7566_v17 = vld [vmem:[#allocation15_spill] sm:$0xff] }
 0x190   : > { %v1768_v13 = vmax.f32 %v7554_v15, 0.0  ;;  %v1653_v5 = vadd.f32 %v5845_v9, %v1584_v28  ;;  %v1766_v37 = vmax.f32 %v1734_v31, 0.0  ;;  %v1769_v10 = vmax.f32 %v7555_v25, 0.0 }
 0x191   : > { %1987 = vst.msk [vmem:[#allocation2 + $0x19] sm:$0xff] %vm288_vm0, %v927_v29  ;;  %1990 = vst.msk [vmem:[#allocation2 + $0x39] sm:$0xff] %vm288_vm0, %v930_v1  ;;  %v869_v19 = vmax.f32 %v7556_v50, 0.0  ;;  %v1651_v56 = vadd.f32 %v1619_v20, %v1582_v11  ;;  %v1718_v30 = vadd.f32 %v1686_v36, %v1649_v44  ;;  %v4082_v32 = vpack.c.bf16 %v1799_v45, %v1799_v45  ;;  %v7560_v36 = vld [vmem:[#allocation31_spill] sm:$0xff]  ;;  %v5991_v50 = vpop.f32.mrf.mxu0 }
 0x192   : > { %1988 = vst.msk [vmem:[#allocation2 + $0x21] sm:$0xff] %vm288_vm0, %v928_v26  ;;  %v1800_v55 = vmin.f32 %v1768_v13, 6.0  ;;  %v5939_v21 = vadd.f32 %v7557_v3, %v1653_v5  ;;  %v1798_v6 = vmin.f32 %v1766_v37, 6.0  ;;  %v1801_v9 = vmin.f32 %v1769_v10, 6.0 }
 0x193   : > { %v933_v16 = vmin.f32 %v869_v19, 6.0  ;;  %v5942_v33 = vadd.f32 %v5852_v42, %v1651_v56  ;;  %v5945_v53 = vadd.f32 %v5758_v40, %v1718_v30  ;;  %1960 = vst.msk [vmem:[#allocation3 + $0x14] sm:$0xf] %vm1954_vm4, %v4082_v32  ;;  %v1738_v20 = vadd.f32 %v5758_v40, %v7558_v61  ;;  %v7567_v61 = vld [vmem:[#allocation23_spill] sm:$0xff] }
 0x194   : > { %v4083_v38 = vpack.c.bf16 %v1800_v55, %v1800_v55  ;;  %v4081_v57 = vpack.c.bf16 %v1798_v6, %v1798_v6  ;;  %v4084_v48 = vpack.c.bf16 %v1801_v9, %v1801_v9  ;;  %v1739_v24 = vadd.f32 %v5758_v40, %v7559_v41  ;;  %v7569_v41 = vld [vmem:[#allocation7_spill] sm:$0xff] }
 0x195   : > { %1993 = vst.msk [vmem:[#allocation2 + $0x61] sm:$0xff] %vm288_vm0, %v933_v16  ;;  %v721_v42 = vadd.f32 %v7561_v58, %v7560_v36  ;;  %v1770_v27 = vmax.f32 %v1738_v20, 0.0  ;;  %v732_v7 = vadd.f32 %v7561_v58, %v7562_v46  ;;  %v724_v54 = vadd.f32 %v7561_v58, %v7563_v18 }
 0x196   : > { %1961 = vst.msk [vmem:[#allocation3 + $0x18] sm:$0xf] %vm1954_vm4, %v4083_v38  ;;  %v1740_v8 = vadd.f32 %v5758_v40, %v7564_v47  ;;  %1959 = vst.msk [vmem:[#allocation3 + $0x10] sm:$0xf] %vm1954_vm4, %v4081_v57  ;;  %v1771_v28 = vmax.f32 %v1739_v24, 0.0  ;;  %v1773_v1 = vmax.f32 %v7565_v39, 0.0  ;;  %v745_v26 = vadd.f32 %v7561_v58, %v7566_v17 }
 0x197   : > { %1962 = vst.msk [vmem:[#allocation3 + $0x1c] sm:$0xf] %vm1954_vm4, %v4084_v48  ;;  %v867_v31 = vmax.f32 %v721_v42, 0.0  ;;  %v1802_v15 = vmin.f32 %v1770_v27, 6.0  ;;  %v870_v13 = vmax.f32 %v732_v7, 0.0  ;;  %v868_v55 = vmax.f32 %v724_v54, 0.0  ;;  %v6012_v7 = vpop.f32.mrf.mxu0 }
 0x198   : > { %v2021_v29 = vld [vmem:[#allocation2 + $0x18] sm:$0xff]  ;;  %v1803_v19 = vmin.f32 %v1771_v28, 6.0  ;;  %v1772_v3 = vmax.f32 %v1740_v8, 0.0  ;;  %v1805_v6 = vmin.f32 %v1773_v1, 6.0  ;;  %v873_v9 = vmax.f32 %v745_v26, 0.0  ;;  %v7568_v57 = vld [vmem:[#allocation10_spill] sm:$0xff] }
 0x199   : > { %v5970_v11 = vmul.f32 %v5882_v60, %v2021_v29  ;;  %v5973_v63 = vmul.f32 %v5895_v22, %v2021_v29  ;;  %v5975_v44 = vld [vmem:[#allocation2 + $0x38] sm:$0xff]  ;;  %v2022_v45 = vld [vmem:[#allocation2 + $0x20] sm:$0xff]  ;;  %v4085_v56 = vpack.c.bf16 %v1802_v15, %v1802_v15  ;;  %v931_v30 = vmin.f32 %v867_v31, 6.0 }
 0x19a   : > { %v5979_v5 = vmul.f32 %v5882_v60, %v5975_v44  ;;  %v5983_v37 = vmul.f32 %v5895_v22, %v5975_v44  ;;  %v5986_v25 = vmul.f32 %v5882_v60, %v2022_v45  ;;  %v5989_v10 = vmul.f32 %v5895_v22, %v2022_v45  ;;  %v7570_v8 = vld [vmem:[#allocation13_spill] sm:$0xff] }
 0x19b   : > { %v934_v32 = vmin.f32 %v870_v13, 6.0  ;;  %v4086_v38 = vpack.c.bf16 %v1803_v19, %v1803_v19  ;;  %1963 = vst.msk [vmem:[#allocation3 + $0x20] sm:$0xf] %vm1954_vm4, %v4085_v56  ;;  %v1742_v20 = vadd.f32 %v5758_v40, %v7567_v61  ;;  %v1743_v48 = vadd.f32 %v5758_v40, %v7568_v57  ;;  %v7571_v28 = vld [vmem:[#allocation17_spill] sm:$0xff]  ;;  %v7572_v19 = vld [vmem:[#allocation11_spill] sm:$0xff] }
 0x19c   : > { %v5993_v16 = vld [vmem:[#allocation2 + $0x60] sm:$0xff]  ;;  %1991 = vst.msk [vmem:[#allocation2 + $0x49] sm:$0xff] %vm288_vm0, %v931_v30  ;;  %v737_v24 = vadd.f32 %v7561_v58, %v7569_v41  ;;  %v932_v27 = vmin.f32 %v868_v55, 6.0  ;;  %v1804_v46 = vmin.f32 %v1772_v3, 6.0  ;;  %v4088_v54 = vpack.c.bf16 %v1805_v6, %v1805_v6  ;;  %v7573_v30 = vld [vmem:[#allocation24_spill] sm:$0xff] }
 0x19d   : > { %1994 = vst.msk [vmem:[#allocation2 + $0x69] sm:$0xff] %vm288_vm0, %v934_v32  ;;  %v6006_v36 = vmul.f32 %v5882_v60, %v5993_v16  ;;  %v6010_v42 = vmul.f32 %v5895_v22, %v5993_v16  ;;  %v4384_v18 = vld [vmem:[#allocation3 + $0x10] sm:$0xff]   ;;  %v937_v47 = vmin.f32 %v873_v9, 6.0  ;;  %v748_v29 = vadd.f32 %v7561_v58, %v7570_v8 }
 0x19e   : > { %1964 = vst.msk [vmem:[#allocation3 + $0x24] sm:$0xf] %vm1954_vm4, %v4086_v38  ;;  %v740_v31 = vadd.f32 %v7561_v58, %v7571_v28  ;;  %v4385_v39 = vld [vmem:[#allocation3 + $0x18] sm:$0xff]   ;;  %v4087_v1 = vpack.c.bf16 %v1804_v46, %v1804_v46  ;;  %v1774_v17 = vmax.f32 %v1742_v20, 0.0  ;;  %v1775_v26 = vmax.f32 %v1743_v48, 0.0  ;;  %4294 = vmatprep.mubr.msk.bf16.mxu1 %vm288_vm0, %v4384_v18  ;;  %v6030_v38 = vpop.f32.mrf.mxu0 }
 0x19f   : > { %1992 = vst.msk [vmem:[#allocation2 + $0x51] sm:$0xff] %vm288_vm0, %v932_v27  ;;  %v871_v45 = vmax.f32 %v737_v24, 0.0  ;;  %1997 = vst.msk [vmem:[#allocation2 + $0x91] sm:$0xff] %vm288_vm0, %v937_v47  ;;  %v874_v15 = vmax.f32 %v748_v29, 0.0  ;;  %v1744_v56 = vadd.f32 %v5758_v40, %v7572_v19  ;;  %v1777_v32 = vmax.f32 %v7573_v30, 0.0  ;;  %4295 = vmatmul.mubr.msk.bf16.vlgmr.msra.gmra.mxu1 %vm288_vm0, %v4385_v39 }
 0x1a0   : > { %1966 = vst.msk [vmem:[#allocation3 + $0x2c] sm:$0xf] %vm1954_vm4, %v4088_v54  ;;  %v872_v13 = vmax.f32 %v740_v31, 0.0  ;;  %1965 = vst.msk [vmem:[#allocation3 + $0x28] sm:$0xf] %vm1954_vm4, %v4087_v1  ;;  %v1806_v55 = vmin.f32 %v1774_v17, 6.0  ;;  %v761_v9 = vadd.f32 %v7561_v58, %v5847_v0  ;;  %v764_v30 = vadd.f32 %v7561_v58, %v5887_v59 }
 0x1a1   : > { %v1807_v3 = vmin.f32 %v1775_v26, 6.0  ;;  %v935_v6 = vmin.f32 %v871_v45, 6.0  ;;  %v938_v61 = vmin.f32 %v874_v15, 6.0  ;;  %v1776_v57 = vmax.f32 %v1744_v56, 0.0  ;;  %v7574_v54 = vld [vmem:[#allocation9_spill] sm:$0xff]  ;;  %v7575_v26 = vld [vmem:[#allocation19_spill] sm:$0xff]  ;;  %v6061_v15 = vpop.f32.mrf.mxu0 }
 0x1a2   : > { %v936_v20 = vmin.f32 %v872_v13, 6.0  ;;  %v1809_v48 = vmin.f32 %v1777_v32, 6.0  ;;  %v4089_v27 = vpack.c.bf16 %v1806_v55, %v1806_v55  ;;  %v877_v18 = vmax.f32 %v761_v9, 0.0 }
 0x1a3   : > { %v6032_v41 = vld [vmem:[#allocation2 + $0x48] sm:$0xff]  ;;  %v4090_v46 = vpack.c.bf16 %v1807_v3, %v1807_v3  ;;  %1995 = vst.msk [vmem:[#allocation2 + $0x79] sm:$0xff] %vm288_vm0, %v935_v6  ;;  %v1746_v47 = vadd.f32 %v5758_v40, %v7574_v54  ;;  %1998 = vst.msk [vmem:[#allocation2 + $0x99] sm:$0xff] %vm288_vm0, %v938_v61  ;;  %v1808_v39 = vmin.f32 %v1776_v57, 6.0  ;;  %v1747_v45 = vadd.f32 %v5758_v40, %v7575_v26 }
 0x1a4   : > { %v6034_v24 = vld [vmem:[#allocation2 + $0x68] sm:$0xff]  ;;  %v6041_v0 = vmul.f32 %v5882_v60, %v6032_v41  ;;  %v6045_v8 = vmul.f32 %v5895_v22, %v6032_v41  ;;  %1996 = vst.msk [vmem:[#allocation2 + $0x81] sm:$0xff] %vm288_vm0, %v936_v20  ;;  %v4092_v1 = vpack.c.bf16 %v1809_v48, %v1809_v48  ;;  %v941_v17 = vmin.f32 %v877_v18, 6.0 }
 0x1a5   : > { %v6049_v29 = vmul.f32 %v5882_v60, %v6034_v24  ;;  %v6053_v28 = vmul.f32 %v5895_v22, %v6034_v24  ;;  %v4386_v31 = vld [vmem:[#allocation3 + $0x20] sm:$0xff]   ;;  %1967 = vst.msk [vmem:[#allocation3 + $0x30] sm:$0xf] %vm1954_vm4, %v4089_v27  ;;  %1968 = vst.msk [vmem:[#allocation3 + $0x34] sm:$0xf] %vm1954_vm4, %v4090_v46  ;;  %v1778_v19 = vmax.f32 %v1746_v47, 0.0  ;;  %v753_v56 = vadd.f32 %v7561_v58, %v5864_v34  ;;  %v6095_v47 = vpop.f32.mrf.mxu0 }
 0x1a6   : > { %v6063_v13 = vld [vmem:[#allocation2 + $0x50] sm:$0xff]  ;;  %v756_v32 = vadd.f32 %v7561_v58, %v5915_v43  ;;  %4298 = vmatprep.mubr.msk.bf16.mxu1 %vm288_vm0, %v4386_v31  ;;  %v4091_v9 = vpack.c.bf16 %v1808_v39, %v1808_v39  ;;  %1970 = vst.msk [vmem:[#allocation3 + $0x3c] sm:$0xf] %vm1954_vm4, %v4092_v1  ;;  %v1779_v34 = vmax.f32 %v1747_v45, 0.0  ;;  %v878_v27 = vmax.f32 %v764_v30, 0.0  ;;  %v7579_v18 = vld [vmem:[#allocation27_spill] sm:$0xff] }
 0x1a7   : > { %v6074_v55 = vmul.f32 %v5882_v60, %v6063_v13  ;;  %v6078_v3 = vmul.f32 %v5895_v22, %v6063_v13  ;;  %v6080_v6 = vld [vmem:[#allocation2 + $0x90] sm:$0xff]  ;;  %2001 = vst.msk [vmem:[#allocation2 + $0xc1] sm:$0xff] %vm288_vm0, %v941_v17  ;;  %v4387_v59 = vld [vmem:[#allocation3 + $0x28] sm:$0xff]   ;;  %v1810_v20 = vmin.f32 %v1778_v19, 6.0  ;;  %v875_v57 = vmax.f32 %v753_v56, 0.0  ;;  %v7580_v17 = vld [vmem:[#allocation35_spill] sm:$0xff] }
 0x1a8   : > { %7576 = vst [vmem:[#allocation26_spill] sm:$0xff] %v6080_v6  ;;  %v6086_v43 = vmul.f32 %v5882_v60, %v6080_v6  ;;  %v6090_v61 = vmul.f32 %v5895_v22, %v6080_v6  ;;  %1969 = vst.msk [vmem:[#allocation3 + $0x38] sm:$0xf] %vm1954_vm4, %v4091_v9  ;;  %v1811_v48 = vmin.f32 %v1779_v34, 6.0  ;;  %v876_v46 = vmax.f32 %v756_v32, 0.0  ;;  %4299 = vmatmul.mubr.msk.bf16.gmra.mxu1 %vm288_vm0, %v4387_v59  ;;  %v7591_v6 = vld [vmem:[#allocation16_spill] sm:$0xff] }
 0x1a9   : > { %v1748_v54 = vadd.f32 %v5758_v40, %v7579_v18  ;;  %v4093_v39 = vpack.c.bf16 %v1810_v20, %v1810_v20  ;;  %v939_v1 = vmin.f32 %v875_v57, 6.0  ;;  %v1781_v26 = vmax.f32 %v7580_v17, 0.0 }
 0x1aa   : > { %7577 = vst [vmem:[#allocation18_spill] sm:$0xff] %v6086_v43  ;;  %7578 = vst [vmem:[#allocation25_spill] sm:$0xff] %v6090_v61  ;;  %v6098_v31 = vld [vmem:[#allocation2 + $0x78] sm:$0xff]  ;;  %v777_v45 = vadd.f32 %v7561_v58, %v5936_v4  ;;  %v4094_v9 = vpack.c.bf16 %v1811_v48, %v1811_v48  ;;  %v942_v34 = vmin.f32 %v878_v27, 6.0  ;;  %v940_v48 = vmin.f32 %v876_v46, 6.0  ;;  %v6135_v43 = vpop.f32.mrf.mxu0 }
 0x1ab   : > { %v6105_v19 = vmul.f32 %v5882_v60, %v6098_v31  ;;  %v6109_v56 = vmul.f32 %v5895_v22, %v6098_v31  ;;  %v6111_v30 = vld [vmem:[#allocation2 + $0x98] sm:$0xff]  ;;  %v6113_v32 = vld [vmem:[#allocation2 + $0x80] sm:$0xff]  ;;  %1971 = vst.msk [vmem:[#allocation3 + $0x40] sm:$0xf] %vm1954_vm4, %v4093_v39  ;;  %v1780_v27 = vmax.f32 %v1748_v54, 0.0  ;;  %v1813_v17 = vmin.f32 %v1781_v26, 6.0 }
 0x1ac   : > { %7582 = vst [vmem:[#allocation30_spill] sm:$0xff] %v6111_v30  ;;  %v4388_v59 = vld [vmem:[#allocation3 + $0x30] sm:$0xff]   ;;  %v6117_v20 = vmul.f32 %v5882_v60, %v6111_v30  ;;  %v6121_v4 = vmul.f32 %v5895_v22, %v6111_v30  ;;  %v6125_v57 = vmul.f32 %v5882_v60, %v6113_v32  ;;  %v6129_v18 = vmul.f32 %v5895_v22, %v6113_v32 }
 0x1ad   : > { %7581 = vst [vmem:[#allocation29_spill] sm:$0xff] %v6105_v19  ;;  %1999 = vst.msk [vmem:[#allocation2 + $0xa9] sm:$0xff] %vm288_vm0, %v939_v1  ;;  %4302 = vmatprep.mubr.msk.bf16.mxu1 %vm288_vm0, %v4388_v59  ;;  %v7588_v39 = vld [vmem:[#allocation34_spill] sm:$0xff]  ;;  %v780_v46 = vadd.f32 %v7561_v58, %v5991_v50 }
 0x1ae   : > { %7583 = vst [vmem:[#allocation12_spill] sm:$0xff] %v6117_v20  ;;  %7584 = vst [vmem:[#allocation32_spill] sm:$0xff] %v6121_v4  ;;  %v881_v20 = vmax.f32 %v777_v45, 0.0  ;;  %v6138_v4 = vld [vmem:[#allocation2 + $0xc0] sm:$0xff]  ;;  %v1751_v1 = vadd.f32 %v5758_v40, %v7588_v39  ;;  %v1812_v45 = vmin.f32 %v1780_v27, 6.0  ;;  %v1785_v27 = vmax.f32 %v5862_v14, 0.0 }
 0x1af   : > { %7585 = vst [vmem:[#allocation14_spill] sm:$0xff] %v6125_v57  ;;  %1972 = vst.msk [vmem:[#allocation3 + $0x44] sm:$0xf] %vm1954_vm4, %v4094_v9  ;;  %v7587_v57 = vld [vmem:[#allocation28_spill] sm:$0xff]  ;;  %v769_v9 = vadd.f32 %v7561_v58, %v5955_v49  ;;  %v6150_v54 = vmul.f32 %v5882_v60, %v6138_v4  ;;  %v6154_v26 = vmul.f32 %v5895_v22, %v6138_v4  ;;  %v4389_v59 = vld [vmem:[#allocation3 + $0x38] sm:$0xff]  }
 0x1b0   : > { %2002 = vst.msk [vmem:[#allocation2 + $0xc9] sm:$0xff] %vm288_vm0, %v942_v34  ;;  %7586 = vst [vmem:[#allocation21_spill] sm:$0xff] %v6138_v4  ;;  %v1750_v61 = vadd.f32 %v5758_v40, %v7587_v57  ;;  %v4096_v34 = vpack.c.bf16 %v1813_v17, %v1813_v17  ;;  %v945_v57 = vmin.f32 %v881_v20, 6.0  ;;  %v1783_v19 = vmax.f32 %v1751_v1, 0.0  ;;  %4303 = vmatmul.mubr.msk.bf16.gmra.mxu1 %vm288_vm0, %v4389_v59 }
 0x1b1   : > { %7589 = vst [vmem:[#allocation4_spill] sm:$0xff] %v6150_v54  ;;  %7590 = vst [vmem:[#allocation38_spill] sm:$0xff] %v6154_v26  ;;  %v772_v49 = vadd.f32 %v7561_v58, %v6012_v7  ;;  %v4095_v50 = vpack.c.bf16 %v1812_v45, %v1812_v45  ;;  %v879_v30 = vmax.f32 %v769_v9, 0.0  ;;  %v882_v54 = vmax.f32 %v780_v46, 0.0  ;;  %v6162_v26 = vpop.f32.mrf.mxu0 }
 0x1b2   : > { %2000 = vst.msk [vmem:[#allocation2 + $0xb1] sm:$0xff] %vm288_vm0, %v940_v48  ;;  %v1782_v39 = vmax.f32 %v1750_v61, 0.0  ;;  %v1752_v4 = vadd.f32 %v5758_v40, %v7591_v6  ;;  %2005 = vst.msk [vmem:[#allocation2 + $0xf1] sm:$0xff] %vm288_vm0, %v945_v57  ;;  %v1815_v61 = vmin.f32 %v1783_v19, 6.0  ;;  %v793_v6 = vadd.f32 %v7561_v58, %v6030_v38 }
 0x1b3   : > { %1974 = vst.msk [vmem:[#allocation3 + $0x4c] sm:$0xf] %vm1954_vm4, %v4096_v34  ;;  %v880_v48 = vmax.f32 %v772_v49, 0.0  ;;  %1973 = vst.msk [vmem:[#allocation3 + $0x48] sm:$0xf] %vm1954_vm4, %v4095_v50  ;;  %v943_v17 = vmin.f32 %v879_v30, 6.0  ;;  %v6192_v57 = vpop.f32.mrf.mxu0 }
 0x1b4   : > { %v1814_v20 = vmin.f32 %v1782_v39, 6.0  ;;  %v6167_v7 = vld [vmem:[#allocation2 + $0xa8] sm:$0xff]  ;;  %v946_v1 = vmin.f32 %v882_v54, 6.0  ;;  %v1784_v9 = vmax.f32 %v1752_v4, 0.0  ;;  %v4098_v59 = vpack.c.bf16 %v1815_v61, %v1815_v61 }
 0x1b5   : > { %7592 = vst [vmem:[#allocation8_spill] sm:$0xff] %v6167_v7  ;;  %v6174_v45 = vmul.f32 %v5882_v60, %v6167_v7  ;;  %v6178_v19 = vmul.f32 %v5895_v22, %v6167_v7  ;;  %2003 = vst.msk [vmem:[#allocation2 + $0xd9] sm:$0xff] %vm288_vm0, %v943_v17  ;;  %v944_v4 = vmin.f32 %v880_v48, 6.0  ;;  %v1817_v49 = vmin.f32 %v1785_v27, 6.0 }
 0x1b6   : > { %v4390_v46 = vld [vmem:[#allocation3 + $0x40] sm:$0xff]   ;;  %v4097_v34 = vpack.c.bf16 %v1814_v20, %v1814_v20  ;;  %2006 = vst.msk [vmem:[#allocation2 + $0xf9] sm:$0xff] %vm288_vm0, %v946_v1  ;;  %v1816_v54 = vmin.f32 %v1784_v9, 6.0  ;;  %v885_v50 = vmax.f32 %v793_v6, 0.0  ;;  %v7599_v20 = vld [vmem:[#allocation6_spill] sm:$0xff]  ;;  %v1755_v17 = vadd.f32 %v5758_v40, %v5859_v12 }
 0x1b7   : > { %7593 = vst [vmem:[#allocation20_spill] sm:$0xff] %v6174_v45  ;;  %7594 = vst [vmem:[#allocation31_spill] sm:$0xff] %v6178_v19  ;;  %v6180_v14 = vld [vmem:[#allocation2 + $0xc8] sm:$0xff]  ;;  %4306 = vmatprep.mubr.msk.bf16.mxu1 %vm288_vm0, %v4390_v46  ;;  %v1754_v61 = vadd.f32 %v5758_v40, %v7599_v20  ;;  %v785_v27 = vadd.f32 %v7561_v58, %v6061_v15  ;;  %v4100_v6 = vpack.c.bf16 %v1817_v49, %v1817_v49 }
 0x1b8   : > { %7595 = vst [vmem:[#allocation36_spill] sm:$0xff] %v6180_v14  ;;  %v6184_v30 = vmul.f32 %v5882_v60, %v6180_v14  ;;  %v6188_v38 = vmul.f32 %v5895_v22, %v6180_v14  ;;  %1975 = vst.msk [vmem:[#allocation3 + $0x50] sm:$0xf] %vm1954_vm4, %v4097_v34  ;;  %v4099_v9 = vpack.c.bf16 %v1816_v54, %v1816_v54  ;;  %v949_v46 = vmin.f32 %v885_v50, 6.0  ;;  %v4273_v54 = vpop.f32.mrf.mxu0 }
 0x1b9   : > { %v6195_v39 = vld [vmem:[#allocation2 + $0xb0] sm:$0xff]  ;;  %1976 = vst.msk [vmem:[#allocation3 + $0x54] sm:$0xf] %vm1954_vm4, %v4098_v59  ;;  %v1786_v34 = vmax.f32 %v1754_v61, 0.0  ;;  %v1787_v59 = vmax.f32 %v1755_v17, 0.0  ;;  %v883_v12 = vmax.f32 %v785_v27, 0.0 }
 0x1ba   : > { %7596 = vst [vmem:[#allocation33_spill] sm:$0xff] %v6184_v30  ;;  %7597 = vst [vmem:[#allocation37_spill] sm:$0xff] %v6188_v38  ;;  %v6205_v48 = vmul.f32 %v5882_v60, %v6195_v39  ;;  %v6209_v1 = vmul.f32 %v5895_v22, %v6195_v39  ;;  %v2039_v20 = vld [vmem:[#allocation2 + $0xf0] sm:$0xff]  ;;  %v796_v30 = vadd.f32 %v7561_v58, %v6095_v47 }
 0x1bb   : > { %7598 = vst [vmem:[#allocation22_spill] sm:$0xff] %v6195_v39  ;;  %2004 = vst.msk [vmem:[#allocation2 + $0xe1] sm:$0xff] %vm288_vm0, %v944_v4  ;;  %v788_v38 = vadd.f32 %v7561_v58, %v6135_v43  ;;  %v1756_v4 = vadd.f32 %v5758_v40, %v5904_v23  ;;  %v6222_v15 = vmul.f32 %v5882_v60, %v2039_v20  ;;  %v1818_v50 = vmin.f32 %v1786_v34, 6.0 }
 0x1bc   : > { %7600 = vst [vmem:[#allocation5_spill] sm:$0xff] %v6205_v48  ;;  %7601 = vst [vmem:[#allocation15_spill] sm:$0xff] %v6209_v1  ;;  %v4391_v48 = vld [vmem:[#allocation3 + $0x48] sm:$0xff]   ;;  %v6225_v49 = vmul.f32 %v5895_v22, %v2039_v20  ;;  %v1819_v47 = vmin.f32 %v1787_v59, 6.0  ;;  %v947_v61 = vmin.f32 %v883_v12, 6.0  ;;  %v886_v17 = vmax.f32 %v796_v30, 0.0 }
 0x1bd   : > { %1977 = vst.msk [vmem:[#allocation3 + $0x58] sm:$0xf] %vm1954_vm4, %v4099_v9  ;;  %7602 = vst [vmem:[#allocation23_spill] sm:$0xff] %v6222_v15  ;;  %v884_v43 = vmax.f32 %v788_v38, 0.0  ;;  %v1788_v9 = vmax.f32 %v1756_v4, 0.0  ;;  %4307 = vmatmul.mubr.msk.bf16.gmra.mxu1 %vm288_vm0, %v4391_v48  ;;  %v6230_v23 = vld [vmem:[#allocation2 + $0xd8] sm:$0xff]  ;;  %v4101_v45 = vpack.c.bf16 %v1818_v50, %v1818_v50 }
 0x1be   : > { %7603 = vst [vmem:[#allocation10_spill] sm:$0xff] %v6225_v49  ;;  %1978 = vst.msk [vmem:[#allocation3 + $0x5c] sm:$0xf] %vm1954_vm4, %v4100_v6  ;;  %v2040_v27 = vld [vmem:[#allocation2 + $0xf8] sm:$0xff]  ;;  %v4102_v15 = vpack.c.bf16 %v1819_v47, %v1819_v47  ;;  %v1789_v20 = vmax.f32 %v5945_v53, 0.0  ;;  %v809_v6 = vadd.f32 %v7561_v58, %v6162_v26  ;;  %v6241_v30 = vmul.f32 %v5895_v22, %v6230_v23  ;;  %v803_v53 = vpop.f32.mrf.mxu0 }
 0x1bf   : > { %2009 = vst.msk [vmem:[#allocation2 + $0x121] sm:$0xff] %vm288_vm0, %v949_v46  ;;  %7604 = vst [vmem:[#allocation7_spill] sm:$0xff] %v6230_v23  ;;  %v6237_v46 = vmul.f32 %v5882_v60, %v6230_v23  ;;  %v6244_v38 = vmul.f32 %v5882_v60, %v2040_v27  ;;  %v6247_v48 = vmul.f32 %v5895_v22, %v2040_v27  ;;  %v950_v26 = vmin.f32 %v886_v17, 6.0  ;;  %v6410_v23 = vld [vmem:[#allocation2 + $0x3a] sm:$0xff] }
 0x1c0   : > { %v4392_v49 = vld [vmem:[#allocation3 + $0x50] sm:$0xff]   ;;  %7606 = vst [vmem:[#allocation17_spill] sm:$0xff] %v6241_v30  ;;  %2007 = vst.msk [vmem:[#allocation2 + $0x109] sm:$0xff] %vm288_vm0, %v947_v61  ;;  %v948_v59 = vmin.f32 %v884_v43, 6.0  ;;  %v1820_v12 = vmin.f32 %v1788_v9, 6.0  ;;  %v1821_v4 = vmin.f32 %v1789_v20, 6.0  ;;  %v801_v43 = vadd.f32 %v7561_v58, %v6192_v57 }
 0x1c1   : > { %7605 = vst [vmem:[#allocation13_spill] sm:$0xff] %v6237_v46  ;;  %7607 = vst [vmem:[#allocation11_spill] sm:$0xff] %v6244_v38  ;;  %4310 = vmatprep.mubr.msk.bf16.mxu1 %vm288_vm0, %v4392_v49  ;;  %v889_v61 = vmax.f32 %v809_v6, 0.0  ;;  %v1759_v49 = vadd.f32 %v5758_v40, %v5942_v33  ;;  %v1514_v9 = vld [vmem:[#allocation2 + $0x19a] sm:$0xff] }
 0x1c2   : > { %7608 = vst [vmem:[#allocation24_spill] sm:$0xff] %v6247_v48  ;;  %v6250_v34 = vld [vmem:[#allocation2 + $0xe0] sm:$0xff]  ;;  %1979 = vst.msk [vmem:[#allocation3 + $0x60] sm:$0xf] %vm1954_vm4, %v4101_v45  ;;  %v1758_v45 = vadd.f32 %v5758_v40, %v5907_v51  ;;  %v4104_v17 = vpack.c.bf16 %v1821_v4, %v1821_v4  ;;  %v812_v48 = vadd.f32 %v7561_v58, %v4273_v54  ;;  %v887_v57 = vmax.f32 %v801_v43, 0.0 }
 0x1c3   : > { %7609 = vst [vmem:[#allocation9_spill] sm:$0xff] %v6250_v34  ;;  %1980 = vst.msk [vmem:[#allocation3 + $0x64] sm:$0xf] %vm1954_vm4, %v4102_v15  ;;  %v6257_v50 = vmul.f32 %v5882_v60, %v6250_v34  ;;  %v6261_v47 = vmul.f32 %v5895_v22, %v6250_v34  ;;  %v4103_v15 = vpack.c.bf16 %v1820_v12, %v1820_v12  ;;  %v953_v38 = vmin.f32 %v889_v61, 6.0 }
 0x1c4   : > { %2010 = vst.msk [vmem:[#allocation2 + $0x129] sm:$0xff] %vm288_vm0, %v950_v26  ;;  %2008 = vst.msk [vmem:[#allocation2 + $0x111] sm:$0xff] %vm288_vm0, %v948_v59  ;;  %v1790_v6 = vmax.f32 %v1758_v45, 0.0  ;;  %v804_v51 = vadd.f32 %v7561_v58, %v803_v53  ;;  %v4276_v26 = vpop.f32.mrf.mxu0  ;;  %v1791_v33 = vmax.f32 %v1759_v49, 0.0  ;;  %v890_v61 = vmax.f32 %v812_v48, 0.0 }
 0x1c5   : > { %7610 = vst [vmem:[#allocation19_spill] sm:$0xff] %v6257_v50  ;;  %7611 = vst [vmem:[#allocation27_spill] sm:$0xff] %v6261_v47  ;;  %v4393_v27 = vld [vmem:[#allocation3 + $0x58] sm:$0xff]   ;;  %v951_v49 = vmin.f32 %v887_v57, 6.0  ;;  %v6298_v48 = vld [vmem:[%s7440_s2] ss:$0 sm:$0xff] }
 0x1c6   : > { %v2043_v20 = vld [vmem:[#allocation2 + $0x120] sm:$0xff]  ;;  %1981 = vst.msk [vmem:[#allocation3 + $0x68] sm:$0xf] %vm1954_vm4, %v4103_v15  ;;  %1982 = vst.msk [vmem:[#allocation3 + $0x6c] sm:$0xf] %vm1954_vm4, %v4104_v17  ;;  %v1822_v4 = vmin.f32 %v1790_v6, 6.0  ;;  %4311 = vmatmul.mubr.msk.bf16.gmra.mxu1 %vm288_vm0, %v4393_v27  ;;  %v825_v43 = vadd.f32 %v6298_v48, %v4276_v26 }
 0x1c7   : > { %v6274_v59 = vmul.f32 %v5882_v60, %v2043_v20  ;;  %v6277_v12 = vmul.f32 %v5895_v22, %v2043_v20  ;;  %2013 = vst.msk [vmem:[#allocation2 + $0x151] sm:$0xff] %vm288_vm0, %v953_v38  ;;  %v888_v54 = vmax.f32 %v804_v51, 0.0  ;;  %v4425_v58 = vld [vmem:[%s7441_s3 + $0xa] ss:$0 sm:$0xff]  ;;  %v6288_v45 = vld [vmem:[%s7441_s3 + $0x8] ss:$0 sm:$0xff]  ;;  %v1761_v38 = vadd.f32 %v5758_v40, %v5939_v21 }
 0x1c8   : > { %v1689_v53 = vmul.f32 %v4425_v58, %v1514_v9  ;;  %v6291_v15 = vld [vmem:[#allocation2 + $0x108] sm:$0xff]  ;;  %v1823_v17 = vmin.f32 %v1791_v33, 6.0  ;;  %v2019_v9 = vld [vmem:[#allocation2] sm:$0xff]  ;;  %v4105_v33 = vpack.c.bf16 %v1822_v4, %v1822_v4  ;;  %v954_v40 = vmin.f32 %v890_v61, 6.0  ;;  %2011 = vst.msk [vmem:[#allocation2 + $0x139] sm:$0xff] %vm288_vm0, %v951_v49 }
 0x1c9   : > { %7612 = vst [vmem:[#allocation35_spill] sm:$0xff] %v6274_v59  ;;  %7613 = vst [vmem:[#allocation28_spill] sm:$0xff] %v6277_v12  ;;  %v2020_v20 = vld [vmem:[#allocation2 + $0x8] sm:$0xff]  ;;  %v6303_v27 = vmul.f32 %v5882_v60, %v6291_v15  ;;  %v6307_v51 = vmul.f32 %v5895_v22, %v6291_v15  ;;  %v952_v57 = vmin.f32 %v888_v54, 6.0  ;;  %v1793_v26 = vmax.f32 %v1761_v38, 0.0 }
 0x1ca   : > { %7614 = vst [vmem:[#allocation34_spill] sm:$0xff] %v6291_v15  ;;  %v4394_v6 = vld [vmem:[#allocation3 + $0x60] sm:$0xff]   ;;  %v4106_v21 = vpack.c.bf16 %v1823_v17, %v1823_v17  ;;  %v1721_v58 = vadd.f32 %v1689_v53, %v5902_v2  ;;  %v2262_v59 = vld [vmem:[#allocation2 + $0x1] sm:$0xff]  ;;  %1983 = vst.msk [vmem:[#allocation3 + $0x70] sm:$0xf] %vm1954_vm4, %v4105_v33  ;;  %v2060_v4 = vmul.f32 %v5882_v60, %v2019_v9 }
 0x1cb   : > { %7615 = vst [vmem:[#allocation16_spill] sm:$0xff] %v6303_v27  ;;  %7616 = vst [vmem:[#allocation6_spill] sm:$0xff] %v6307_v51  ;;  %4314 = vmatprep.mubr.msk.bf16.mxu1 %vm288_vm0, %v4394_v6  ;;  %v2044_v12 = vld [vmem:[#allocation2 + $0x128] sm:$0xff]  ;;  %v6312_v50 = vld [vmem:[#allocation2 + $0x110] sm:$0xff]  ;;  %v893_v27 = vmax.f32 %v825_v43, 0.0  ;;  %v2061_v61 = vmul.f32 %v5882_v60, %v2020_v20  ;;  %v2198_v54 = vmul.f32 %v6288_v45, %v5877_v52  ;;  %v6350_v6 = vpop.f32.mrf.mxu0 }
 0x1cc   : > { %7617 = vst [vmem:[#allocation39_spill] sm:$0xff] %v6312_v50  ;;  %2014 = vst.msk [vmem:[#allocation2 + $0x159] sm:$0xff] %vm288_vm0, %v954_v40  ;;  %v2263_v2 = vld [vmem:[#allocation2 + $0x9] sm:$0xff]  ;;  %v6323_v53 = vld [vmem:[%s7441_s3 + $0x1] ss:$0 sm:$0xff]  ;;  %v6326_v17 = vmul.f32 %v5882_v60, %v2044_v12  ;;  %v6329_v49 = vmul.f32 %v5895_v22, %v2044_v12  ;;  %v6333_v38 = vmul.f32 %v5882_v60, %v6312_v50 }
 0x1cd   : > { %v6337_v43 = vmul.f32 %v5895_v22, %v6312_v50  ;;  %1984 = vst.msk [vmem:[#allocation3 + $0x74] sm:$0xf] %vm1954_vm4, %v4106_v21  ;;  %v6341_v52 = vld [vmem:[#allocation2 + $0x19] sm:$0xff]  ;;  %v6343_v9 = vld [vmem:[#allocation2 + $0x21] sm:$0xff]  ;;  %v6348_v12 = vld [vmem:[%s7441_s3 + $0x9] ss:$0 sm:$0xff]  ;;  %v2199_v51 = vmul.f32 %v6288_v45, %v5975_v44  ;;  %v2303_v46 = vmul.f32 %v6323_v53, %v2262_v59  ;;  %v2304_v47 = vmul.f32 %v6323_v53, %v2263_v2 }
 0x1ce   : > { %7618 = vst [vmem:[#allocation40_spill] sm:$0xff] %v6326_v17  ;;  %7619 = vst [vmem:[#allocation41_spill] sm:$0xff] %v6329_v49  ;;  %v2505_v20 = vld [vmem:[#allocation2 + $0x2] sm:$0xff]  ;;  %v4395_v33 = vld [vmem:[#allocation3 + $0x68] sm:$0xff]   ;;  %v1825_v17 = vmin.f32 %v1793_v26, 6.0  ;;  %v2162_v49 = vadd.f32 %v5989_v10, %v2061_v61 }
 0x1cf   : > { %7620 = vst [vmem:[#allocation42_spill] sm:$0xff] %v6333_v38  ;;  %7621 = vst [vmem:[#allocation43_spill] sm:$0xff] %v6337_v43  ;;  %v4427_v40 = vld [vmem:[%s7442_s4] ss:$0 sm:$0xff]  ;;  %v2047_v38 = vld [vmem:[#allocation2 + $0x150] sm:$0xff]  ;;  %v957_v43 = vmin.f32 %v893_v27, 6.0  ;;  %4315 = vmatmul.mubr.msk.bf16.gmra.mxu1 %vm288_vm0, %v4395_v33 }
 0x1d0   : > { %2012 = vst.msk [vmem:[#allocation2 + $0x141] sm:$0xff] %vm288_vm0, %v952_v57  ;;  %v1760_v21 = vadd.f32 %v4427_v40, %v1721_v58  ;;  %v2161_v57 = vadd.f32 %v5973_v63, %v2060_v4  ;;  %v6359_v50 = vld [vmem:[#allocation2 + $0x31] sm:$0xff]  ;;  %v6361_v15 = vld [vmem:[#allocation2 + $0x39] sm:$0xff]  ;;  %v6366_v58 = vmul.f32 %v5882_v60, %v2047_v38  ;;  %v6369_v63 = vmul.f32 %v5895_v22, %v2047_v38  ;;  %v6374_v44 = vld [vmem:[%s7441_s3 + $0x5] ss:$0 sm:$0xff] }
 0x1d1   : > { %v4108_v26 = vpack.c.bf16 %v1825_v17, %v1825_v17  ;;  %v6379_v27 = vld [vmem:[%s7441_s3 + $0x2] ss:$0 sm:$0xff]  ;;  %2017 = vst.msk [vmem:[#allocation2 + $0x181] sm:$0xff] %vm288_vm0, %v957_v43  ;;  %v2231_v4 = vadd.f32 %v2199_v51, %v2162_v49  ;;  %v2372_v61 = vmul.f32 %v6374_v44, %v6341_v52  ;;  %v2373_v2 = vmul.f32 %v6374_v44, %v6343_v9  ;;  %v2506_v17 = vld [vmem:[#allocation2 + $0xa] sm:$0xff]  ;;  %v6387_v38 = vld [vmem:[#allocation2 + $0x1a] sm:$0xff] }
 0x1d2   : > { %7622 = vst [vmem:[#allocation44_spill] sm:$0xff] %v6366_v58  ;;  %7623 = vst [vmem:[#allocation45_spill] sm:$0xff] %v6369_v63  ;;  %v1792_v10 = vmax.f32 %v1760_v21, 0.0  ;;  %v2230_v59 = vadd.f32 %v2198_v54, %v2161_v57  ;;  %v6392_v40 = vld [vmem:[%s7441_s3 + $0xa] ss:$0 sm:$0xff]  ;;  %v4277_v21 = vpop.f32.mrf.mxu0  ;;  %v2045_v33 = vld [vmem:[#allocation2 + $0x138] sm:$0xff]  ;;  %v2441_v51 = vmul.f32 %v6348_v12, %v6359_v50  ;;  %v2442_v54 = vmul.f32 %v6348_v12, %v6361_v15 }
 0x1d3   : > { %1986 = vst.msk [vmem:[#allocation3 + $0x7c] sm:$0xf] %vm1954_vm4, %v4108_v26  ;;  %v6399_v49 = vld [vmem:[#allocation2 + $0x22] sm:$0xff]  ;;  %v6401_v43 = vld [vmem:[#allocation2 + $0x32] sm:$0xff]  ;;  %v2546_v57 = vmul.f32 %v6379_v27, %v2505_v20  ;;  %v6405_v63 = vmul.f32 %v5882_v60, %v2045_v33  ;;  %v6408_v30 = vmul.f32 %v5895_v22, %v2045_v33  ;;  %v2336_v34 = vadd.f32 %v2304_v47, %v2231_v4 }
 0x1d4   : > { %v1824_v58 = vmin.f32 %v1792_v10, 6.0  ;;  %v2048_v10 = vld [vmem:[#allocation2 + $0x158] sm:$0xff]  ;;  %v2335_v26 = vadd.f32 %v2303_v46, %v2230_v59  ;;  %v4396_v14 = vld [vmem:[#allocation3 + $0x70] sm:$0xff]   ;;  %v2547_v7 = vmul.f32 %v6379_v27, %v2506_v17  ;;  %v819_v4 = vpop.f32.mrf.mxu0  ;;  %v817_v17 = vadd.f32 %v6298_v48, %v6350_v6 }
 0x1d5   : > { %7624 = vst [vmem:[#allocation46_spill] sm:$0xff] %v6405_v63  ;;  %v6413_v1 = vmul.f32 %v5882_v60, %v2048_v10  ;;  %v6416_v19 = vmul.f32 %v5895_v22, %v2048_v10  ;;  %v2405_v47 = vadd.f32 %v2373_v2, %v2336_v34  ;;  %v6428_v59 = vld [vmem:[%s7441_s3 + $0x6] ss:$0 sm:$0xff]  ;;  %4318 = vmatprep.mubr.msk.bf16.mxu1 %vm288_vm0, %v4396_v14 }
 0x1d6   : > { %v4107_v20 = vpack.c.bf16 %v1824_v58, %v1824_v58  ;;  %v2404_v46 = vadd.f32 %v2372_v61, %v2335_v26  ;;  %v2615_v58 = vmul.f32 %v6428_v59, %v6387_v38  ;;  %v2685_v34 = vmul.f32 %v6392_v40, %v6410_v23 }
 0x1d7   : > { %7625 = vst [vmem:[#allocation47_spill] sm:$0xff] %v6413_v1  ;;  %7626 = vst [vmem:[#allocation48_spill] sm:$0xff] %v6416_v19  ;;  %v2046_v39 = vld [vmem:[#allocation2 + $0x140] sm:$0xff]  ;;  %v2474_v2 = vadd.f32 %v2442_v54, %v2405_v47  ;;  %v828_v14 = vadd.f32 %v6298_v48, %v4277_v21  ;;  %v820_v26 = vadd.f32 %v6298_v48, %v819_v4 }
 0x1d8   : > { %v6420_v63 = vmul.f32 %v5882_v60, %v2046_v39  ;;  %v6423_v33 = vmul.f32 %v5895_v22, %v2046_v39  ;;  %1985 = vst.msk [vmem:[#allocation3 + $0x78] sm:$0xf] %vm1954_vm4, %v4107_v20  ;;  %v2616_v60 = vmul.f32 %v6428_v59, %v6399_v49  ;;  %v2684_v39 = vmul.f32 %v6392_v40, %v6401_v43  ;;  %v2051_v10 = vld [vmem:[#allocation2 + $0x180] sm:$0xff] }
 0x1d9   : > { %v2473_v61 = vadd.f32 %v2441_v51, %v2404_v46  ;;  %v2163_v20 = vadd.f32 %v5911_v62, %v5970_v11  ;;  %v2164_v1 = vadd.f32 %v5983_v37, %v5986_v25  ;;  %v2200_v19 = vmul.f32 %v6288_v45, %v6032_v41  ;;  %v6458_v25 = vld [vmem:[#allocation2 + $0x49] sm:$0xff]  ;;  %v6460_v41 = vld [vmem:[#allocation2 + $0x51] sm:$0xff] }
 0x1da   : > { %v6451_v51 = vmul.f32 %v5895_v22, %v2051_v10  ;;  %v6454_v54 = vmul.f32 %v6288_v45, %v2051_v10  ;;  %v2579_v21 = vadd.f32 %v2547_v7, %v2474_v2  ;;  %v891_v46 = vmax.f32 %v817_v17, 0.0  ;;  %v6467_v7 = vld [vmem:[%s7442_s4] ss:$0 sm:$0xff] }
 0x1db   : > { %v2578_v6 = vadd.f32 %v2546_v57, %v2473_v61  ;;  %v894_v47 = vmax.f32 %v828_v14, 0.0  ;;  %v892_v48 = vmax.f32 %v820_v26, 0.0  ;;  %v2201_v62 = vmul.f32 %v6288_v45, %v6063_v13 }
 0x1dc   : > { %v2648_v4 = vadd.f32 %v2616_v60, %v2579_v21  ;;  %v2232_v37 = vadd.f32 %v2200_v19, %v2163_v20  ;;  %v2305_v22 = vmul.f32 %v6323_v53, %v6341_v52  ;;  %v955_v57 = vmin.f32 %v891_v46, 6.0 }
 0x1dd   : > { %v2647_v11 = vadd.f32 %v2615_v58, %v2578_v6  ;;  %v958_v61 = vmin.f32 %v894_v47, 6.0  ;;  %v956_v2 = vmin.f32 %v892_v48, 6.0  ;;  %v2233_v17 = vadd.f32 %v2201_v62, %v2164_v1  ;;  %v6487_v6 = vld [vmem:[#allocation2 + $0x52] sm:$0xff] }
 0x1de   : > { %v2717_v60 = vadd.f32 %v2685_v34, %v2648_v4  ;;  %v2306_v19 = vmul.f32 %v6323_v53, %v6343_v9  ;;  %v2337_v14 = vadd.f32 %v2305_v22, %v2232_v37  ;;  %2015 = vst.msk [vmem:[#allocation2 + $0x169] sm:$0xff] %vm288_vm0, %v955_v57  ;;  %v2374_v52 = vmul.f32 %v6374_v44, %v6359_v50  ;;  %v6482_v9 = vld [vmem:[#allocation2 + $0x4a] sm:$0xff] }
 0x1df   : > { %v4397_v13 = vld [vmem:[#allocation3 + $0x78] sm:$0xff]   ;;  %v2716_v58 = vadd.f32 %v2684_v39, %v2647_v11  ;;  %2018 = vst.msk [vmem:[#allocation2 + $0x189] sm:$0xff] %vm288_vm0, %v958_v61  ;;  %2016 = vst.msk [vmem:[#allocation2 + $0x171] sm:$0xff] %vm288_vm0, %v956_v2  ;;  %v2375_v10 = vmul.f32 %v6374_v44, %v6361_v15  ;;  %v2443_v1 = vmul.f32 %v6348_v12, %v6458_v25 }
 0x1e0   : > { %v2444_v39 = vmul.f32 %v6348_v12, %v6460_v41  ;;  %4319 = vmatmul.mubr.msk.bf16.gmra.mxu1 %vm288_vm0, %v4397_v13  ;;  %v2756_v26 = vadd.f32 %v6467_v7, %v2717_v60  ;;  %v2338_v20 = vadd.f32 %v2306_v19, %v2233_v17  ;;  %v2548_v21 = vmul.f32 %v6379_v27, %v6387_v38 }
 0x1e1   : > { %v2755_v34 = vadd.f32 %v6467_v7, %v2716_v58  ;;  %v2406_v46 = vadd.f32 %v2374_v52, %v2337_v14  ;;  %v2549_v47 = vmul.f32 %v6379_v27, %v6399_v49  ;;  %v2617_v48 = vmul.f32 %v6428_v59, %v6401_v43 }
 0x1e2   : > { %v2618_v62 = vmul.f32 %v6428_v59, %v6410_v23  ;;  %v2788_v4 = vmax.f32 %v2756_v26, 0.0  ;;  %v2407_v37 = vadd.f32 %v2375_v10, %v2338_v20  ;;  %v2686_v22 = vmul.f32 %v6392_v40, %v6482_v9  ;;  %v6528_v20 = vld [vmem:[#allocation2 + $0x61] sm:$0xff] }
 0x1e3   : > { %v2787_v11 = vmax.f32 %v2755_v34, 0.0  ;;  %v2475_v57 = vadd.f32 %v2443_v1, %v2406_v46  ;;  %v2687_v38 = vmul.f32 %v6392_v40, %v6487_v6  ;;  %v2165_v61 = vadd.f32 %v6045_v8, %v5900_v35 }
 0x1e4   : > { %v2166_v49 = vadd.f32 %v6078_v3, %v5979_v5  ;;  %v2820_v17 = vmin.f32 %v2788_v4, 6.0  ;;  %v2476_v13 = vadd.f32 %v2444_v39, %v2407_v37  ;;  %v2202_v58 = vmul.f32 %v6288_v45, %v5993_v16  ;;  %v4428_v16 = vld [vmem:[%s7441_s3] ss:$0 sm:$0xff] }
 0x1e5   : > { %v2819_v2 = vmin.f32 %v2787_v11, 6.0  ;;  %v2580_v60 = vadd.f32 %v2548_v21, %v2475_v57  ;;  %v2203_v19 = vmul.f32 %v6288_v45, %v6034_v24  ;;  %v2307_v14 = vmul.f32 %v6323_v53, %v6359_v50  ;;  %v2049_v10 = vld [vmem:[#allocation2 + $0x168] sm:$0xff]  ;;  %v4429_v24 = vld [vmem:[%s7441_s3 + $0x4] ss:$0 sm:$0xff] }
 0x1e6   : > { %v2308_v52 = vmul.f32 %v6323_v53, %v6361_v15  ;;  %v4110_v8 = vpack.c.bf16 %v2820_v17, %v2820_v17  ;;  %v2052_v5 = vld [vmem:[#allocation2 + $0x188] sm:$0xff]  ;;  %v2050_v3 = vld [vmem:[#allocation2 + $0x170] sm:$0xff]  ;;  %v2581_v1 = vadd.f32 %v2549_v47, %v2476_v13  ;;  %v2234_v39 = vadd.f32 %v2202_v58, %v2165_v61 }
 0x1e7   : > { %v4109_v35 = vpack.c.bf16 %v2819_v2, %v2819_v2  ;;  %v6516_v34 = vmul.f32 %v4428_v16, %v2049_v10  ;;  %v6521_v50 = vmul.f32 %v4429_v24, %v2049_v10  ;;  %v6523_v15 = vmul.f32 %v4429_v24, %v2052_v5  ;;  %v6530_v21 = vld [vmem:[#allocation2 + $0x69] sm:$0xff] }
 0x1e8   : > { %v6526_v26 = vmul.f32 %v6288_v45, %v2052_v5  ;;  %2980 = vst.msk [vmem:[#allocation3 + $0x84] sm:$0xf] %vm1954_vm4, %v4110_v8  ;;  %v6534_v46 = vmul.f32 %v4428_v16, %v2050_v3  ;;  %v6536_v47 = vmul.f32 %v4429_v24, %v2050_v3  ;;  %v2649_v11 = vadd.f32 %v2617_v48, %v2580_v60  ;;  %v6546_v8 = vld [vmem:[#allocation2 + $0x62] sm:$0xff]  ;;  %v6548_v48 = vld [vmem:[#allocation2 + $0x6a] sm:$0xff] }
 0x1e9   : > { %2979 = vst.msk [vmem:[#allocation3 + $0x80] sm:$0xf] %vm1954_vm4, %v4109_v35  ;;  %v2650_v4 = vadd.f32 %v2618_v62, %v2581_v1  ;;  %v2235_v37 = vadd.f32 %v2203_v19, %v2166_v49  ;;  %v2339_v57 = vadd.f32 %v2307_v14, %v2234_v39  ;;  %v2376_v61 = vmul.f32 %v6374_v44, %v6458_v25 }
 0x1ea   : > { %v2377_v2 = vmul.f32 %v6374_v44, %v6460_v41  ;;  %v2718_v17 = vadd.f32 %v2686_v22, %v2649_v11  ;;  %v2445_v58 = vmul.f32 %v6348_v12, %v6528_v20  ;;  %v2446_v35 = vmul.f32 %v6348_v12, %v6530_v21 }
 0x1eb   : > { %v2719_v13 = vadd.f32 %v2687_v38, %v2650_v4  ;;  %v2340_v62 = vadd.f32 %v2308_v52, %v2235_v37  ;;  %v2408_v49 = vadd.f32 %v2376_v61, %v2339_v57  ;;  %v2550_v60 = vmul.f32 %v6379_v27, %v6401_v43 }
 0x1ec   : > { %v2551_v19 = vmul.f32 %v6379_v27, %v6410_v23  ;;  %v2757_v22 = vadd.f32 %v6467_v7, %v2718_v17  ;;  %v2619_v14 = vmul.f32 %v6428_v59, %v6482_v9  ;;  %v2620_v10 = vmul.f32 %v6428_v59, %v6487_v6 }
 0x1ed   : > { %v2758_v38 = vadd.f32 %v6467_v7, %v2719_v13  ;;  %v2409_v5 = vadd.f32 %v2377_v2, %v2340_v62  ;;  %v2477_v3 = vadd.f32 %v2445_v58, %v2408_v49  ;;  %v2688_v52 = vmul.f32 %v6392_v40, %v6546_v8  ;;  %v6577_v58 = vld [vmem:[#allocation2 + $0x79] sm:$0xff] }
 0x1ee   : > { %v2689_v43 = vmul.f32 %v6392_v40, %v6548_v48  ;;  %v2789_v1 = vmax.f32 %v2757_v22, 0.0  ;;  %v2167_v39 = vadd.f32 %v6010_v42, %v6041_v0  ;;  %v2168_v16 = vadd.f32 %v6053_v28, %v6074_v55 }
 0x1ef   : > { %v2790_v23 = vmax.f32 %v2758_v38, 0.0  ;;  %v2478_v11 = vadd.f32 %v2446_v35, %v2409_v5  ;;  %v2582_v4 = vadd.f32 %v2550_v60, %v2477_v3  ;;  %v2204_v37 = vmul.f32 %v6288_v45, %v6098_v31  ;;  %v6579_v31 = vld [vmem:[#allocation2 + $0x81] sm:$0xff] }
 0x1f0   : > { %v4398_v24 = vld [vmem:[#allocation3 + $0x80] sm:$0xff]   ;;  %v2205_v57 = vmul.f32 %v6288_v45, %v6113_v32  ;;  %v2821_v61 = vmin.f32 %v2789_v1, 6.0  ;;  %v2309_v17 = vmul.f32 %v6323_v53, %v6458_v25  ;;  %v2310_v42 = vmul.f32 %v6323_v53, %v6460_v41  ;;  %v6587_v38 = vld [vmem:[#allocation2 + $0x82] sm:$0xff] }
 0x1f1   : > { %v2822_v2 = vmin.f32 %v2790_v23, 6.0  ;;  %4322 = vmatprep.mubr.msk.bf16.mxu1 %vm288_vm0, %v4398_v24  ;;  %v2583_v0 = vadd.f32 %v2551_v19, %v2478_v11  ;;  %v2651_v28 = vadd.f32 %v2619_v14, %v2582_v4  ;;  %v2236_v55 = vadd.f32 %v2204_v37, %v2167_v39  ;;  %v6585_v19 = vld [vmem:[#allocation2 + $0x7a] sm:$0xff] }
 0x1f2   : > { %v2237_v13 = vadd.f32 %v2205_v57, %v2168_v16  ;;  %v4111_v35 = vpack.c.bf16 %v2821_v61, %v2821_v61  ;;  %v2378_v62 = vmul.f32 %v6374_v44, %v6528_v20  ;;  %v2379_v25 = vmul.f32 %v6374_v44, %v6530_v21 }
 0x1f3   : > { %v4112_v32 = vpack.c.bf16 %v2822_v2, %v2822_v2  ;;  %v2652_v49 = vadd.f32 %v2620_v10, %v2583_v0  ;;  %v2720_v41 = vadd.f32 %v2688_v52, %v2651_v28  ;;  %v2341_v60 = vadd.f32 %v2309_v17, %v2236_v55  ;;  %v7627_v2 = vld [vmem:[#allocation26_spill] sm:$0xff] }
 0x1f4   : > { %v2342_v22 = vadd.f32 %v2310_v42, %v2237_v13  ;;  %2981 = vst.msk [vmem:[#allocation3 + $0x88] sm:$0xf] %vm1954_vm4, %v4111_v35  ;;  %v2447_v14 = vmul.f32 %v6348_v12, %v6577_v58  ;;  %v2448_v5 = vmul.f32 %v6348_v12, %v6579_v31  ;;  %v2552_v10 = vmul.f32 %v6379_v27, %v6482_v9  ;;  %v7628_v42 = vld [vmem:[#allocation30_spill] sm:$0xff] }
 0x1f5   : > { %2982 = vst.msk [vmem:[#allocation3 + $0x8c] sm:$0xf] %vm1954_vm4, %v4112_v32  ;;  %v2553_v3 = vmul.f32 %v6379_v27, %v6487_v6  ;;  %v2721_v52 = vadd.f32 %v2689_v43, %v2652_v49  ;;  %v2759_v1 = vadd.f32 %v6467_v7, %v2720_v41  ;;  %v2410_v23 = vadd.f32 %v2378_v62, %v2341_v60  ;;  %v6619_v49 = vld [vmem:[#allocation2 + $0x99] sm:$0xff] }
 0x1f6   : > { %v2411_v39 = vadd.f32 %v2379_v25, %v2342_v22  ;;  %v2621_v16 = vmul.f32 %v6428_v59, %v6546_v8  ;;  %v2622_v24 = vmul.f32 %v6428_v59, %v6548_v48  ;;  %v2690_v11 = vmul.f32 %v6392_v40, %v6585_v19  ;;  %v6617_v25 = vld [vmem:[#allocation2 + $0x91] sm:$0xff] }
 0x1f7   : > { %v2691_v9 = vmul.f32 %v6392_v40, %v6587_v38  ;;  %v2760_v4 = vadd.f32 %v6467_v7, %v2721_v52  ;;  %v2791_v6 = vmax.f32 %v2759_v1, 0.0  ;;  %v2479_v43 = vadd.f32 %v2447_v14, %v2410_v23  ;;  %v6633_v23 = vld [vmem:[#allocation2 + $0x92] sm:$0xff] }
 0x1f8   : > { %v2480_v37 = vadd.f32 %v2448_v5, %v2411_v39  ;;  %v2169_v57 = vadd.f32 %v6109_v56, %v6006_v36  ;;  %v2170_v61 = vadd.f32 %v6129_v18, %v6049_v29  ;;  %v2206_v17 = vmul.f32 %v6288_v45, %v7627_v2 }
 0x1f9   : > { %v2207_v0 = vmul.f32 %v6288_v45, %v7628_v42  ;;  %v2792_v28 = vmax.f32 %v2760_v4, 0.0  ;;  %v2823_v55 = vmin.f32 %v2791_v6, 6.0  ;;  %v2584_v13 = vadd.f32 %v2552_v10, %v2479_v43  ;;  %v6637_v4 = vld [vmem:[#allocation2 + $0x9a] sm:$0xff] }
 0x1fa   : > { %v2585_v35 = vadd.f32 %v2553_v3, %v2480_v37  ;;  %v2238_v32 = vadd.f32 %v2206_v17, %v2169_v57  ;;  %v2311_v36 = vmul.f32 %v6323_v53, %v6528_v20  ;;  %v2312_v29 = vmul.f32 %v6323_v53, %v6530_v21 }
 0x1fb   : > { %v2239_v62 = vadd.f32 %v2207_v0, %v2170_v61  ;;  %v2824_v18 = vmin.f32 %v2792_v28, 6.0  ;;  %v4113_v41 = vpack.c.bf16 %v2823_v55, %v2823_v55  ;;  %v2653_v60 = vadd.f32 %v2621_v16, %v2584_v13  ;;  %v7629_v28 = vld [vmem:[#allocation29_spill] sm:$0xff] }
 0x1fc   : > { %v4399_v56 = vld [vmem:[#allocation3 + $0x88] sm:$0xff]   ;;  %v2654_v22 = vadd.f32 %v2622_v24, %v2585_v35  ;;  %v2343_v14 = vadd.f32 %v2311_v36, %v2238_v32  ;;  %v2380_v10 = vmul.f32 %v6374_v44, %v6577_v58  ;;  %v2381_v3 = vmul.f32 %v6374_v44, %v6579_v31  ;;  %v7631_v32 = vld [vmem:[#allocation14_spill] sm:$0xff] }
 0x1fd   : > { %v2344_v5 = vadd.f32 %v2312_v29, %v2239_v62  ;;  %4323 = vmatmul.mubr.msk.bf16.gmra.mxu1 %vm288_vm0, %v4399_v56  ;;  %v4114_v52 = vpack.c.bf16 %v2824_v18, %v2824_v18  ;;  %2983 = vst.msk [vmem:[#allocation3 + $0x90] sm:$0xf] %vm1954_vm4, %v4113_v41  ;;  %v2722_v20 = vadd.f32 %v2690_v11, %v2653_v60  ;;  %v7630_v55 = vld [vmem:[#allocation25_spill] sm:$0xff]  ;;  %v7632_v62 = vld [vmem:[#allocation32_spill] sm:$0xff]  ;;  %v7634_v60 = vld [vmem:[#allocation22_spill] sm:$0xff] }
 0x1fe   : > { %v2723_v21 = vadd.f32 %v2691_v9, %v2654_v22  ;;  %v2449_v1 = vmul.f32 %v6348_v12, %v6617_v25  ;;  %v2412_v39 = vadd.f32 %v2380_v10, %v2343_v14  ;;  %v2450_v24 = vmul.f32 %v6348_v12, %v6619_v49  ;;  %v7633_v29 = vld [vmem:[#allocation8_spill] sm:$0xff] }
 0x1ff   : > { %v2413_v16 = vadd.f32 %v2381_v3, %v2344_v5  ;;  %v2554_v6 = vmul.f32 %v6379_v27, %v6546_v8  ;;  %2984 = vst.msk [vmem:[#allocation3 + $0x94] sm:$0xf] %vm1954_vm4, %v4114_v52  ;;  %v2761_v11 = vadd.f32 %v6467_v7, %v2722_v20  ;;  %v2555_v43 = vmul.f32 %v6379_v27, %v6548_v48  ;;  %v6664_v52 = vld [vmem:[#allocation2 + $0xa9] sm:$0xff]  ;;  %v6666_v20 = vld [vmem:[#allocation2 + $0xb1] sm:$0xff] }
 0x200   : > { %v2762_v9 = vadd.f32 %v6467_v7, %v2723_v21  ;;  %v2623_v37 = vmul.f32 %v6428_v59, %v6585_v19  ;;  %v2481_v57 = vadd.f32 %v2449_v1, %v2412_v39  ;;  %v2624_v2 = vmul.f32 %v6428_v59, %v6587_v38 }
 0x201   : > { %v2482_v61 = vadd.f32 %v2450_v24, %v2413_v16  ;;  %v2692_v8 = vmul.f32 %v6392_v40, %v6633_v23  ;;  %v2793_v17 = vmax.f32 %v2761_v11, 0.0  ;;  %v2693_v0 = vmul.f32 %v6392_v40, %v6637_v4 }
 0x202   : > { %v2794_v42 = vmax.f32 %v2762_v9, 0.0  ;;  %v2171_v13 = vadd.f32 %v7630_v55, %v7629_v28  ;;  %v2586_v48 = vadd.f32 %v2554_v6, %v2481_v57  ;;  %v2172_v36 = vadd.f32 %v7632_v62, %v7631_v32 }
 0x203   : > { %v2587_v35 = vadd.f32 %v2555_v43, %v2482_v61  ;;  %v2208_v56 = vmul.f32 %v6288_v45, %v7633_v29  ;;  %v2825_v18 = vmin.f32 %v2793_v17, 6.0  ;;  %v2209_v22 = vmul.f32 %v6288_v45, %v7634_v60  ;;  %v7638_v60 = vld [vmem:[#allocation15_spill] sm:$0xff] }
 0x204   : > { %v2826_v41 = vmin.f32 %v2794_v42, 6.0  ;;  %v2313_v14 = vmul.f32 %v6323_v53, %v6577_v58  ;;  %v2655_v5 = vadd.f32 %v2623_v37, %v2586_v48  ;;  %v2314_v21 = vmul.f32 %v6323_v53, %v6579_v31  ;;  %v6674_v37 = vld [vmem:[#allocation2 + $0xaa] sm:$0xff] }
 0x205   : > { %v2656_v10 = vadd.f32 %v2624_v2, %v2587_v35  ;;  %v2240_v3 = vadd.f32 %v2208_v56, %v2171_v13  ;;  %v4115_v1 = vpack.c.bf16 %v2825_v18, %v2825_v18  ;;  %v2241_v16 = vadd.f32 %v2209_v22, %v2172_v36  ;;  %v6682_v2 = vld [vmem:[#allocation2 + $0xb2] sm:$0xff]  ;;  %v7635_v56 = vld [vmem:[#allocation18_spill] sm:$0xff]  ;;  %v7636_v18 = vld [vmem:[#allocation31_spill] sm:$0xff] }
 0x206   : > { %v4116_v39 = vpack.c.bf16 %v2826_v41, %v2826_v41  ;;  %v2382_v24 = vmul.f32 %v6374_v44, %v6617_v25  ;;  %v4400_v6 = vld [vmem:[#allocation3 + $0x90] sm:$0xff]   ;;  %v2724_v11 = vadd.f32 %v2692_v8, %v2655_v5  ;;  %v2383_v43 = vmul.f32 %v6374_v44, %v6619_v49  ;;  %v7637_v41 = vld [vmem:[#allocation12_spill] sm:$0xff] }
 0x207   : > { %v2725_v9 = vadd.f32 %v2693_v0, %v2656_v10  ;;  %v2345_v58 = vadd.f32 %v2313_v14, %v2240_v3  ;;  %2985 = vst.msk [vmem:[#allocation3 + $0x98] sm:$0xf] %vm1954_vm4, %v4115_v1  ;;  %v2346_v31 = vadd.f32 %v2314_v21, %v2241_v16  ;;  %v2451_v57 = vmul.f32 %v6348_v12, %v6664_v52  ;;  %v7639_v14 = vld [vmem:[#allocation21_spill] sm:$0xff]  ;;  %v7640_v1 = vld [vmem:[#allocation36_spill] sm:$0xff] }
 0x208   : > { %2986 = vst.msk [vmem:[#allocation3 + $0x9c] sm:$0xf] %vm1954_vm4, %v4116_v39  ;;  %v2452_v61 = vmul.f32 %v6348_v12, %v6666_v20  ;;  %v2556_v8 = vmul.f32 %v6379_v27, %v6585_v19  ;;  %4326 = vmatprep.mubr.msk.bf16.mxu1 %vm288_vm0, %v4400_v6  ;;  %v2763_v17 = vadd.f32 %v6467_v7, %v2724_v11  ;;  %v6707_v6 = vld [vmem:[#allocation2 + $0xc1] sm:$0xff]  ;;  %v6709_v11 = vld [vmem:[#allocation2 + $0xc9] sm:$0xff] }
 0x209   : > { %v2764_v42 = vadd.f32 %v6467_v7, %v2725_v9  ;;  %v2414_v0 = vadd.f32 %v2382_v24, %v2345_v58  ;;  %v2557_v28 = vmul.f32 %v6379_v27, %v6587_v38  ;;  %v2415_v55 = vadd.f32 %v2383_v43, %v2346_v31 }
 0x20a   : > { %v2625_v13 = vmul.f32 %v6428_v59, %v6633_v23  ;;  %v2626_v48 = vmul.f32 %v6428_v59, %v6637_v4  ;;  %v2694_v19 = vmul.f32 %v6392_v40, %v6674_v37  ;;  %v2795_v35 = vmax.f32 %v2763_v17, 0.0 }
 0x20b   : > { %v2796_v32 = vmax.f32 %v2764_v42, 0.0  ;;  %v2483_v62 = vadd.f32 %v2451_v57, %v2414_v0  ;;  %v2695_v36 = vmul.f32 %v6392_v40, %v6682_v2  ;;  %v2484_v29 = vadd.f32 %v2452_v61, %v2415_v55 }
 0x20c   : > { %v2173_v38 = vadd.f32 %v7636_v18, %v7635_v56  ;;  %v2174_v22 = vadd.f32 %v7638_v60, %v7637_v41  ;;  %v2210_v5 = vmul.f32 %v6288_v45, %v7639_v14  ;;  %v2827_v10 = vmin.f32 %v2795_v35, 6.0  ;;  %v6728_v35 = vld [vmem:[#allocation2 + $0xca] sm:$0xff] }
 0x20d   : > { %v2828_v3 = vmin.f32 %v2796_v32, 6.0  ;;  %v2588_v21 = vadd.f32 %v2556_v8, %v2483_v62  ;;  %v2211_v39 = vmul.f32 %v6288_v45, %v7640_v1  ;;  %v2589_v16 = vadd.f32 %v2557_v28, %v2484_v29  ;;  %v7644_v1 = vld [vmem:[#allocation37_spill] sm:$0xff] }
 0x20e   : > { %v2242_v24 = vadd.f32 %v2210_v5, %v2173_v38  ;;  %v2315_v9 = vmul.f32 %v6323_v53, %v6617_v25  ;;  %v2316_v58 = vmul.f32 %v6323_v53, %v6619_v49  ;;  %v4117_v31 = vpack.c.bf16 %v2827_v10, %v2827_v10  ;;  %v7641_v5 = vld [vmem:[#allocation20_spill] sm:$0xff]  ;;  %v7642_v10 = vld [vmem:[#allocation38_spill] sm:$0xff] }
 0x20f   : > { %v4401_v43 = vld [vmem:[#allocation3 + $0x98] sm:$0xff]   ;;  %v4118_v57 = vpack.c.bf16 %v2828_v3, %v2828_v3  ;;  %v2657_v61 = vadd.f32 %v2625_v13, %v2588_v21  ;;  %v2243_v8 = vadd.f32 %v2211_v39, %v2174_v22  ;;  %v2658_v17 = vadd.f32 %v2626_v48, %v2589_v16  ;;  %v7643_v21 = vld [vmem:[#allocation5_spill] sm:$0xff] }
 0x210   : > { %v2347_v42 = vadd.f32 %v2315_v9, %v2242_v24  ;;  %v2384_v0 = vmul.f32 %v6374_v44, %v6664_v52  ;;  %v2385_v28 = vmul.f32 %v6374_v44, %v6666_v20  ;;  %4327 = vmatmul.mubr.msk.bf16.gmra.mxu1 %vm288_vm0, %v4401_v43  ;;  %2987 = vst.msk [vmem:[#allocation3 + $0xa0] sm:$0xf] %vm1954_vm4, %v4117_v31  ;;  %v6726_v48 = vld [vmem:[#allocation2 + $0xc2] sm:$0xff]  ;;  %v7646_v43 = vld [vmem:[#allocation9_spill] sm:$0xff] }
 0x211   : > { %2988 = vst.msk [vmem:[#allocation3 + $0xa4] sm:$0xf] %vm1954_vm4, %v4118_v57  ;;  %v2726_v25 = vadd.f32 %v2694_v19, %v2657_v61  ;;  %v2348_v49 = vadd.f32 %v2316_v58, %v2243_v8  ;;  %v2453_v55 = vmul.f32 %v6348_v12, %v6707_v6  ;;  %v2454_v13 = vmul.f32 %v6348_v12, %v6709_v11  ;;  %v7645_v9 = vld [vmem:[#allocation7_spill] sm:$0xff]  ;;  %v6752_v8 = vld [vmem:[#allocation2 + $0xd9] sm:$0xff] }
 0x212   : > { %v2727_v32 = vadd.f32 %v2695_v36, %v2658_v17  ;;  %v2416_v62 = vadd.f32 %v2384_v0, %v2347_v42  ;;  %v2558_v29 = vmul.f32 %v6379_v27, %v6633_v23  ;;  %v2559_v56 = vmul.f32 %v6379_v27, %v6637_v4  ;;  %v6754_v17 = vld [vmem:[#allocation2 + $0xe1] sm:$0xff] }
 0x213   : > { %v2765_v19 = vadd.f32 %v6467_v7, %v2726_v25  ;;  %v2417_v18 = vadd.f32 %v2385_v28, %v2348_v49  ;;  %v2627_v38 = vmul.f32 %v6428_v59, %v6674_v37  ;;  %v2628_v41 = vmul.f32 %v6428_v59, %v6682_v2 }
 0x214   : > { %v2766_v60 = vadd.f32 %v6467_v7, %v2727_v32  ;;  %v2485_v22 = vadd.f32 %v2453_v55, %v2416_v62  ;;  %v2696_v36 = vmul.f32 %v6392_v40, %v6726_v48  ;;  %v2697_v23 = vmul.f32 %v6392_v40, %v6728_v35 }
 0x215   : > { %v2797_v14 = vmax.f32 %v2765_v19, 0.0  ;;  %v2486_v4 = vadd.f32 %v2454_v13, %v2417_v18  ;;  %v2175_v3 = vadd.f32 %v7642_v10, %v7641_v5  ;;  %v2176_v39 = vadd.f32 %v7644_v1, %v7643_v21 }
 0x216   : > { %v2798_v16 = vmax.f32 %v2766_v60, 0.0  ;;  %v2590_v24 = vadd.f32 %v2558_v29, %v2485_v22  ;;  %v2212_v58 = vmul.f32 %v6288_v45, %v7645_v9  ;;  %v2213_v31 = vmul.f32 %v6288_v45, %v7646_v43  ;;  %v7647_v43 = vld [vmem:[#allocation4_spill] sm:$0xff] }
 0x217   : > { %v2829_v57 = vmin.f32 %v2797_v14, 6.0  ;;  %v2591_v61 = vadd.f32 %v2559_v56, %v2486_v4  ;;  %v2317_v42 = vmul.f32 %v6323_v53, %v6664_v52  ;;  %v2318_v0 = vmul.f32 %v6323_v53, %v6666_v20  ;;  %v6765_v20 = vld [vmem:[#allocation2 + $0xda] sm:$0xff]  ;;  %v6772_v14 = vld [vmem:[#allocation2 + $0xe2] sm:$0xff] }
 0x218   : > { %v4402_v28 = vld [vmem:[#allocation3 + $0xa0] sm:$0xff]   ;;  %v2830_v25 = vmin.f32 %v2798_v16, 6.0  ;;  %v2659_v49 = vadd.f32 %v2627_v38, %v2590_v24  ;;  %v2244_v55 = vadd.f32 %v2212_v58, %v2175_v3  ;;  %v2245_v13 = vadd.f32 %v2213_v31, %v2176_v39 }
 0x219   : > { %v4119_v32 = vpack.c.bf16 %v2829_v57, %v2829_v57  ;;  %v2660_v62 = vadd.f32 %v2628_v41, %v2591_v61  ;;  %v2386_v29 = vmul.f32 %v6374_v44, %v6707_v6  ;;  %v2387_v56 = vmul.f32 %v6374_v44, %v6709_v11  ;;  %4330 = vmatprep.mubr.msk.bf16.mxu1 %vm288_vm0, %v4402_v28  ;;  %v7649_v57 = vld [vmem:[#allocation33_spill] sm:$0xff]  ;;  %v7650_v61 = vld [vmem:[#allocation27_spill] sm:$0xff] }
 0x21a   : > { %v4120_v19 = vpack.c.bf16 %v2830_v25, %v2830_v25  ;;  %v2728_v52 = vadd.f32 %v2696_v36, %v2659_v49  ;;  %v2349_v18 = vadd.f32 %v2317_v42, %v2244_v55  ;;  %v2350_v60 = vadd.f32 %v2318_v0, %v2245_v13  ;;  %v4430_v0 = vld [vmem:[#allocation2 + $0xf0] sm:$0xff]  ;;  %v4431_v13 = vld [vmem:[#allocation2 + $0xf8] sm:$0xff] }
 0x21b   : > { %2989 = vst.msk [vmem:[#allocation3 + $0xa8] sm:$0xf] %vm1954_vm4, %v4119_v32  ;;  %v2729_v38 = vadd.f32 %v2697_v23, %v2660_v62  ;;  %v2455_v41 = vmul.f32 %v6348_v12, %v6752_v8  ;;  %v2456_v22 = vmul.f32 %v6348_v12, %v6754_v17  ;;  %v2560_v4 = vmul.f32 %v6379_v27, %v6674_v37 }
 0x21c   : > { %2990 = vst.msk [vmem:[#allocation3 + $0xac] sm:$0xf] %vm1954_vm4, %v4120_v19  ;;  %v2767_v36 = vadd.f32 %v6467_v7, %v2728_v52  ;;  %v2418_v5 = vadd.f32 %v2386_v29, %v2349_v18  ;;  %v2419_v10 = vadd.f32 %v2387_v56, %v2350_v60  ;;  %v2561_v23 = vmul.f32 %v6379_v27, %v6682_v2  ;;  %v7648_v2 = vld [vmem:[#allocation17_spill] sm:$0xff] }
 0x21d   : > { %v2768_v3 = vadd.f32 %v6467_v7, %v2729_v38  ;;  %v2629_v21 = vmul.f32 %v6428_v59, %v6726_v48  ;;  %v2630_v1 = vmul.f32 %v6428_v59, %v6728_v35  ;;  %v2698_v37 = vmul.f32 %v6392_v40, %v6765_v20  ;;  %v6795_v56 = vld [vmem:[#allocation2 + $0xf1] sm:$0xff] }
 0x21e   : > { %v2799_v39 = vmax.f32 %v2767_v36, 0.0  ;;  %v2487_v16 = vadd.f32 %v2455_v41, %v2418_v5  ;;  %v2488_v24 = vadd.f32 %v2456_v22, %v2419_v10  ;;  %v2699_v9 = vmul.f32 %v6392_v40, %v6772_v14  ;;  %v6801_v22 = vld [vmem:[#allocation2 + $0xf9] sm:$0xff] }
 0x21f   : > { %v2800_v58 = vmax.f32 %v2768_v3, 0.0  ;;  %v2177_v31 = vadd.f32 %v7648_v2, %v7647_v43  ;;  %v2178_v42 = vadd.f32 %v7650_v61, %v7649_v57  ;;  %v2214_v28 = vmul.f32 %v4430_v0, %v6288_v45 }
 0x220   : > { %v2831_v25 = vmin.f32 %v2799_v39, 6.0  ;;  %v2592_v49 = vadd.f32 %v2560_v4, %v2487_v16  ;;  %v2593_v55 = vadd.f32 %v2561_v23, %v2488_v24  ;;  %v2215_v32 = vmul.f32 %v4431_v13, %v6288_v45  ;;  %v7653_v13 = vld [vmem:[#allocation19_spill] sm:$0xff] }
 0x221   : > { %v2832_v62 = vmin.f32 %v2800_v58, 6.0  ;;  %v2246_v29 = vadd.f32 %v2214_v28, %v2177_v31  ;;  %v2319_v19 = vmul.f32 %v6323_v53, %v6707_v6  ;;  %v2320_v52 = vmul.f32 %v6323_v53, %v6709_v11  ;;  %v7651_v28 = vld [vmem:[#allocation13_spill] sm:$0xff] }
 0x222   : > { %v4121_v18 = vpack.c.bf16 %v2831_v25, %v2831_v25  ;;  %v2661_v60 = vadd.f32 %v2629_v21, %v2592_v49  ;;  %v2662_v38 = vadd.f32 %v2630_v1, %v2593_v55  ;;  %v2247_v41 = vadd.f32 %v2215_v32, %v2178_v42  ;;  %v6810_v21 = vld [vmem:[#allocation2 + $0xf2] sm:$0xff]  ;;  %v6812_v1 = vld [vmem:[#allocation2 + $0xfa] sm:$0xff] }
 0x223   : > { %v4403_v4 = vld [vmem:[#allocation3 + $0xa8] sm:$0xff]   ;;  %v4122_v36 = vpack.c.bf16 %v2832_v62, %v2832_v62  ;;  %v2351_v5 = vadd.f32 %v2319_v19, %v2246_v29  ;;  %v2388_v45 = vmul.f32 %v6374_v44, %v6752_v8  ;;  %v2389_v10 = vmul.f32 %v6374_v44, %v6754_v17  ;;  %v7652_v25 = vld [vmem:[#allocation10_spill] sm:$0xff]  ;;  %v7654_v32 = vld [vmem:[#allocation24_spill] sm:$0xff] }
 0x224   : > { %2991 = vst.msk [vmem:[#allocation3 + $0xb0] sm:$0xf] %vm1954_vm4, %v4121_v18  ;;  %v2730_v6 = vadd.f32 %v2698_v37, %v2661_v60  ;;  %v2731_v23 = vadd.f32 %v2699_v9, %v2662_v38  ;;  %v2352_v11 = vadd.f32 %v2320_v52, %v2247_v41  ;;  %v2457_v3 = vmul.f32 %v6348_v12, %v6795_v56  ;;  %v6839_v29 = vld [vmem:[%s7441_s3 + $0x8] ss:$0 sm:$0xff]  ;;  %v7655_v19 = vld [vmem:[#allocation34_spill] sm:$0xff] }
 0x225   : > { %4331 = vmatmul.mubr.msk.bf16.gmra.mxu1 %vm288_vm0, %v4403_v4  ;;  %2992 = vst.msk [vmem:[#allocation3 + $0xb4] sm:$0xf] %vm1954_vm4, %v4122_v36  ;;  %v2420_v39 = vadd.f32 %v2388_v45, %v2351_v5  ;;  %v2458_v16 = vmul.f32 %v6348_v12, %v6801_v22  ;;  %v2562_v37 = vmul.f32 %v6379_v27, %v6726_v48  ;;  %v7656_v18 = vld [vmem:[#allocation39_spill] sm:$0xff] }
 0x226   : > { %v2563_v24 = vmul.f32 %v6379_v27, %v6728_v35  ;;  %v2769_v9 = vadd.f32 %v6467_v7, %v2730_v6  ;;  %v2770_v58 = vadd.f32 %v6467_v7, %v2731_v23  ;;  %v2421_v43 = vadd.f32 %v2389_v10, %v2352_v11  ;;  %v6847_v6 = vld [vmem:[#allocation2 + $0x109] sm:$0xff]  ;;  %v6849_v23 = vld [vmem:[#allocation2 + $0x111] sm:$0xff] }
 0x227   : > { %v2631_v2 = vmul.f32 %v6428_v59, %v6765_v20  ;;  %v2489_v31 = vadd.f32 %v2457_v3, %v2420_v39  ;;  %v2632_v57 = vmul.f32 %v6428_v59, %v6772_v14  ;;  %v2700_v61 = vmul.f32 %v6392_v40, %v6810_v21 }
 0x228   : > { %v2701_v48 = vmul.f32 %v6392_v40, %v6812_v1  ;;  %v2801_v42 = vmax.f32 %v2769_v9, 0.0  ;;  %v2802_v35 = vmax.f32 %v2770_v58, 0.0  ;;  %v2490_v0 = vadd.f32 %v2458_v16, %v2421_v43 }
 0x229   : > { %v2179_v49 = vadd.f32 %v7652_v25, %v7651_v28  ;;  %v2594_v55 = vadd.f32 %v2562_v37, %v2489_v31  ;;  %v2180_v62 = vadd.f32 %v7654_v32, %v7653_v13  ;;  %v2216_v52 = vmul.f32 %v6839_v29, %v7655_v19  ;;  %v7659_v19 = vld [vmem:[#allocation11_spill] sm:$0xff] }
 0x22a   : > { %v2217_v60 = vmul.f32 %v6839_v29, %v7656_v18  ;;  %v2833_v38 = vmin.f32 %v2801_v42, 6.0  ;;  %v2834_v41 = vmin.f32 %v2802_v35, 6.0  ;;  %v2595_v4 = vadd.f32 %v2563_v24, %v2490_v0 }
 0x22b   : > { %v2321_v36 = vmul.f32 %v6323_v53, %v6752_v8  ;;  %v2663_v5 = vadd.f32 %v2631_v2, %v2594_v55  ;;  %v2248_v45 = vadd.f32 %v2216_v52, %v2179_v49  ;;  %v2322_v11 = vmul.f32 %v6323_v53, %v6754_v17  ;;  %v6857_v2 = vld [vmem:[#allocation2 + $0x10a] sm:$0xff] }
 0x22c   : > { %v2249_v10 = vadd.f32 %v2217_v60, %v2180_v62  ;;  %v4404_v3 = vld [vmem:[#allocation3 + $0xb0] sm:$0xff]   ;;  %v4123_v39 = vpack.c.bf16 %v2833_v38, %v2833_v38  ;;  %v4124_v16 = vpack.c.bf16 %v2834_v41, %v2834_v41  ;;  %v2664_v37 = vadd.f32 %v2632_v57, %v2595_v4  ;;  %v6866_v57 = vld [vmem:[#allocation2 + $0x112] sm:$0xff]  ;;  %v7657_v62 = vld [vmem:[#allocation23_spill] sm:$0xff] }
 0x22d   : > { %v2390_v24 = vmul.f32 %v6374_v44, %v6795_v56  ;;  %v2732_v9 = vadd.f32 %v2700_v61, %v2663_v5  ;;  %v2353_v58 = vadd.f32 %v2321_v36, %v2248_v45  ;;  %v2391_v43 = vmul.f32 %v6374_v44, %v6801_v22  ;;  %4334 = vmatprep.mubr.msk.bf16.mxu1 %vm288_vm0, %v4404_v3  ;;  %v7660_v52 = vld [vmem:[#allocation43_spill] sm:$0xff]  ;;  %v4433_v60 = vld [vmem:[#allocation2 + $0x120] sm:$0xff] }
 0x22e   : > { %v2354_v8 = vadd.f32 %v2322_v11, %v2249_v10  ;;  %2993 = vst.msk [vmem:[#allocation3 + $0xb8] sm:$0xf] %vm1954_vm4, %v4123_v39  ;;  %2994 = vst.msk [vmem:[#allocation3 + $0xbc] sm:$0xf] %vm1954_vm4, %v4124_v16  ;;  %v2733_v53 = vadd.f32 %v2701_v48, %v2664_v37  ;;  %v2459_v17 = vmul.f32 %v6348_v12, %v6847_v6  ;;  %v4434_v5 = vld [vmem:[#allocation2 + $0x128] sm:$0xff] }
 0x22f   : > { %v2460_v31 = vmul.f32 %v6348_v12, %v6849_v23  ;;  %v2564_v44 = vmul.f32 %v6379_v27, %v6765_v20  ;;  %v2771_v61 = vadd.f32 %v6467_v7, %v2732_v9  ;;  %v2422_v42 = vadd.f32 %v2390_v24, %v2353_v58  ;;  %v6888_v3 = vld [vmem:[#allocation2 + $0x121] sm:$0xff] }
 0x230   : > { %v2423_v35 = vadd.f32 %v2391_v43, %v2354_v8  ;;  %v2565_v0 = vmul.f32 %v6379_v27, %v6772_v14  ;;  %v2772_v48 = vadd.f32 %v6467_v7, %v2733_v53  ;;  %v2633_v28 = vmul.f32 %v6428_v59, %v6810_v21  ;;  %v7658_v27 = vld [vmem:[#allocation6_spill] sm:$0xff] }
 0x231   : > { %v2634_v12 = vmul.f32 %v6428_v59, %v6812_v1  ;;  %v2702_v25 = vmul.f32 %v6392_v40, %v6857_v2  ;;  %v2803_v49 = vmax.f32 %v2771_v61, 0.0  ;;  %v2491_v20 = vadd.f32 %v2459_v17, %v2422_v42  ;;  %v6895_v39 = vld [vmem:[%s7441_s3 + $0x1] ss:$0 sm:$0xff] }
 0x232   : > { %v2492_v55 = vadd.f32 %v2460_v31, %v2423_v35  ;;  %v2703_v13 = vmul.f32 %v6392_v40, %v6866_v57  ;;  %v2804_v32 = vmax.f32 %v2772_v48, 0.0  ;;  %v2181_v14 = vadd.f32 %v7658_v27, %v7657_v62  ;;  %v6890_v40 = vld [vmem:[#allocation2 + $0x129] sm:$0xff]  ;;  %v6904_v31 = vld [vmem:[%s7441_s3 + $0x5] ss:$0 sm:$0xff] }
 0x233   : > { %v2182_v18 = vadd.f32 %v7660_v52, %v7659_v19  ;;  %v2218_v38 = vmul.f32 %v4433_v60, %v6839_v29  ;;  %v2835_v41 = vmin.f32 %v2803_v49, 6.0  ;;  %v2596_v4 = vadd.f32 %v2564_v44, %v2491_v20  ;;  %v6915_v35 = vld [vmem:[%s7441_s3 + $0x9] ss:$0 sm:$0xff]  ;;  %v6929_v49 = vld [vmem:[%s7441_s3 + $0x2] ss:$0 sm:$0xff] }
 0x234   : > { %v2597_v36 = vadd.f32 %v2565_v0, %v2492_v55  ;;  %v2219_v45 = vmul.f32 %v4434_v5, %v6839_v29  ;;  %v2836_v10 = vmin.f32 %v2804_v32, 6.0  ;;  %v2323_v16 = vmul.f32 %v6895_v39, %v6795_v56  ;;  %v6919_v48 = vld [vmem:[#allocation2 + $0x122] sm:$0xff]  ;;  %v6944_v52 = vld [vmem:[%s7441_s3 + $0xa] ss:$0 sm:$0xff] }
 0x235   : > { %v2250_v11 = vadd.f32 %v2218_v38, %v2181_v14  ;;  %v2324_v37 = vmul.f32 %v6895_v39, %v6801_v22  ;;  %v4405_v24 = vld [vmem:[#allocation3 + $0xb8] sm:$0xff]   ;;  %v4125_v9 = vpack.c.bf16 %v2835_v41, %v2835_v41  ;;  %v2665_v58 = vadd.f32 %v2633_v28, %v2596_v4  ;;  %v7661_v41 = vld [vmem:[#allocation16_spill] sm:$0xff] }
 0x236   : > { %v2666_v8 = vadd.f32 %v2634_v12, %v2597_v36  ;;  %v2251_v43 = vadd.f32 %v2219_v45, %v2182_v18  ;;  %v4126_v53 = vpack.c.bf16 %v2836_v10, %v2836_v10  ;;  %v2392_v44 = vmul.f32 %v6904_v31, %v6847_v6  ;;  %4335 = vmatmul.mubr.msk.bf16.gmra.mxu1 %vm288_vm0, %v4405_v24  ;;  %v6921_v28 = vld [vmem:[#allocation2 + $0x12a] sm:$0xff]  ;;  %v7663_v45 = vld [vmem:[#allocation42_spill] sm:$0xff] }
 0x237   : > { %v2355_v17 = vadd.f32 %v2323_v16, %v2250_v11  ;;  %v2393_v56 = vmul.f32 %v6904_v31, %v6849_v23  ;;  %2995 = vst.msk [vmem:[#allocation3 + $0xc0] sm:$0xf] %vm1954_vm4, %v4125_v9  ;;  %v2734_v22 = vadd.f32 %v2702_v25, %v2665_v58  ;;  %v2461_v0 = vmul.f32 %v6915_v35, %v6888_v3  ;;  %v7662_v4 = vld [vmem:[#allocation28_spill] sm:$0xff]  ;;  %v4440_v11 = vld [vmem:[#allocation2 + $0x138] sm:$0xff] }
 0x238   : > { %v2735_v61 = vadd.f32 %v2703_v13, %v2666_v8  ;;  %v2356_v42 = vadd.f32 %v2324_v37, %v2251_v43  ;;  %2996 = vst.msk [vmem:[#allocation3 + $0xc4] sm:$0xf] %vm1954_vm4, %v4126_v53  ;;  %v2462_v25 = vmul.f32 %v6915_v35, %v6890_v40  ;;  %v2566_v20 = vmul.f32 %v6929_v49, %v6810_v21  ;;  %v4441_v37 = vld [vmem:[#allocation2 + $0x140] sm:$0xff] }
 0x239   : > { %v2424_v12 = vadd.f32 %v2392_v44, %v2355_v17  ;;  %v2567_v55 = vmul.f32 %v6929_v49, %v6812_v1  ;;  %v2773_v13 = vadd.f32 %v6467_v7, %v2734_v22  ;;  %v2635_v27 = vmul.f32 %v6428_v59, %v6857_v2  ;;  %v6960_v22 = vld [vmem:[#allocation2 + $0x141] sm:$0xff] }
 0x23a   : > { %v2774_v32 = vadd.f32 %v6467_v7, %v2735_v61  ;;  %v2425_v62 = vadd.f32 %v2393_v56, %v2356_v42  ;;  %v2636_v19 = vmul.f32 %v6428_v59, %v6866_v57  ;;  %v2704_v21 = vmul.f32 %v6944_v52, %v6919_v48  ;;  %v7664_v59 = vld [vmem:[#allocation41_spill] sm:$0xff] }
 0x23b   : > { %v2493_v14 = vadd.f32 %v2461_v0, %v2424_v12  ;;  %v2705_v1 = vmul.f32 %v6944_v52, %v6921_v28  ;;  %v2805_v18 = vmax.f32 %v2773_v13, 0.0  ;;  %v2183_v36 = vadd.f32 %v7662_v4, %v7661_v41  ;;  %v6958_v56 = vld [vmem:[#allocation2 + $0x139] sm:$0xff] }
 0x23c   : > { %v2806_v60 = vmax.f32 %v2774_v32, 0.0  ;;  %v2494_v38 = vadd.f32 %v2462_v25, %v2425_v62  ;;  %v2184_v10 = vadd.f32 %v7664_v59, %v7663_v45  ;;  %v2220_v16 = vmul.f32 %v4440_v11, %v6839_v29  ;;  %v6968_v62 = vld [vmem:[#allocation2 + $0x13a] sm:$0xff] }
 0x23d   : > { %v2598_v5 = vadd.f32 %v2566_v20, %v2493_v14  ;;  %v2221_v24 = vmul.f32 %v4441_v37, %v6839_v29  ;;  %v2837_v9 = vmin.f32 %v2805_v18, 6.0  ;;  %v2325_v43 = vmul.f32 %v6895_v39, %v6847_v6 }
 0x23e   : > { %v2838_v58 = vmin.f32 %v2806_v60, 6.0  ;;  %v2599_v8 = vadd.f32 %v2567_v55, %v2494_v38  ;;  %v2252_v17 = vadd.f32 %v2220_v16, %v2183_v36  ;;  %v2326_v61 = vmul.f32 %v6895_v39, %v6849_v23  ;;  %v6993_v36 = vld [vmem:[%s7441_s3 + $0x6] ss:$0 sm:$0xff]  ;;  %v7665_v16 = vld [vmem:[#allocation35_spill] sm:$0xff] }
 0x23f   : > { %v2667_v53 = vadd.f32 %v2635_v27, %v2598_v5  ;;  %v2253_v44 = vadd.f32 %v2221_v24, %v2184_v10  ;;  %v4406_v42 = vld [vmem:[#allocation3 + $0xc0] sm:$0xff]   ;;  %v4127_v0 = vpack.c.bf16 %v2837_v9, %v2837_v9  ;;  %v2394_v20 = vmul.f32 %v6904_v31, %v6888_v3 }
 0x240   : > { %v4128_v12 = vpack.c.bf16 %v2838_v58, %v2838_v58  ;;  %v2668_v25 = vadd.f32 %v2636_v19, %v2599_v8  ;;  %v2357_v13 = vadd.f32 %v2325_v43, %v2252_v17  ;;  %v2395_v32 = vmul.f32 %v6904_v31, %v6890_v40  ;;  %4338 = vmatprep.mubr.msk.bf16.mxu1 %vm288_vm0, %v4406_v42  ;;  %v6977_v19 = vld [vmem:[#allocation2 + $0x142] sm:$0xff]  ;;  %v7666_v24 = vld [vmem:[#allocation40_spill] sm:$0xff] }
 0x241   : > { %v2736_v55 = vadd.f32 %v2704_v21, %v2667_v53  ;;  %v2358_v6 = vadd.f32 %v2326_v61, %v2253_v44  ;;  %2997 = vst.msk [vmem:[#allocation3 + $0xc8] sm:$0xf] %vm1954_vm4, %v4127_v0  ;;  %v2463_v27 = vmul.f32 %v6915_v35, %v6958_v56  ;;  %v2464_v14 = vmul.f32 %v6915_v35, %v6960_v22  ;;  %v4444_v58 = vld [vmem:[#allocation2 + $0x150] sm:$0xff]  ;;  %v4445_v44 = vld [vmem:[#allocation2 + $0x158] sm:$0xff] }
 0x242   : > { %2998 = vst.msk [vmem:[#allocation3 + $0xcc] sm:$0xf] %vm1954_vm4, %v4128_v12  ;;  %v2737_v23 = vadd.f32 %v2705_v1, %v2668_v25  ;;  %v2568_v21 = vmul.f32 %v6929_v49, %v6857_v2  ;;  %v2426_v60 = vadd.f32 %v2394_v20, %v2357_v13  ;;  %v2569_v41 = vmul.f32 %v6929_v49, %v6866_v57  ;;  %v6987_v1 = vld [vmem:[%s7442_s4] ss:$0 sm:$0xff]  ;;  %v7009_v12 = vld [vmem:[#allocation2 + $0x151] sm:$0xff] }
 0x243   : > { %v2775_v18 = vadd.f32 %v6467_v7, %v2736_v55  ;;  %v2427_v38 = vadd.f32 %v2395_v32, %v2358_v6  ;;  %v2637_v7 = vmul.f32 %v6993_v36, %v6919_v48  ;;  %v2638_v2 = vmul.f32 %v6993_v36, %v6921_v28  ;;  %v7011_v25 = vld [vmem:[#allocation2 + $0x159] sm:$0xff] }
 0x244   : > { %v2776_v4 = vadd.f32 %v6987_v1, %v2737_v23  ;;  %v2706_v57 = vmul.f32 %v6944_v52, %v6968_v62  ;;  %v2495_v45 = vadd.f32 %v2463_v27, %v2426_v60  ;;  %v2707_v10 = vmul.f32 %v6944_v52, %v6977_v19 }
 0x245   : > { %v2807_v5 = vmax.f32 %v2775_v18, 0.0  ;;  %v2496_v59 = vadd.f32 %v2464_v14, %v2427_v38  ;;  %v2185_v37 = vadd.f32 %v6408_v30, %v7665_v16  ;;  %v2186_v9 = vadd.f32 %v6423_v33, %v7666_v24  ;;  %v7025_v38 = vld [vmem:[#allocation2 + $0x152] sm:$0xff] }
 0x246   : > { %v2808_v11 = vmax.f32 %v2776_v4, 0.0  ;;  %v2222_v8 = vmul.f32 %v4444_v58, %v6839_v29  ;;  %v2600_v53 = vadd.f32 %v2568_v21, %v2495_v45  ;;  %v2223_v61 = vmul.f32 %v4445_v44, %v6839_v29  ;;  %v7667_v58 = vld [vmem:[#allocation46_spill] sm:$0xff] }
 0x247   : > { %v2839_v43 = vmin.f32 %v2807_v5, 6.0  ;;  %v2601_v17 = vadd.f32 %v2569_v41, %v2496_v59  ;;  %v2327_v30 = vmul.f32 %v6895_v39, %v6888_v3  ;;  %v2328_v33 = vmul.f32 %v6895_v39, %v6890_v40  ;;  %v7027_v41 = vld [vmem:[#allocation2 + $0x15a] sm:$0xff] }
 0x248   : > { %v2840_v42 = vmin.f32 %v2808_v11, 6.0  ;;  %v2254_v0 = vadd.f32 %v2222_v8, %v2185_v37  ;;  %v2669_v13 = vadd.f32 %v2637_v7, %v2600_v53  ;;  %v2255_v32 = vadd.f32 %v2223_v61, %v2186_v9  ;;  %v7668_v8 = vld [vmem:[#allocation45_spill] sm:$0xff]  ;;  %v4446_v61 = vld [vmem:[#allocation2 + $0x168] sm:$0xff] }
 0x249   : > { %v4407_v20 = vld [vmem:[#allocation3 + $0xc8] sm:$0xff]   ;;  %v4129_v55 = vpack.c.bf16 %v2839_v43, %v2839_v43  ;;  %v2670_v6 = vadd.f32 %v2638_v2, %v2601_v17  ;;  %v2396_v14 = vmul.f32 %v6904_v31, %v6958_v56  ;;  %v2397_v21 = vmul.f32 %v6904_v31, %v6960_v22  ;;  %v7669_v17 = vld [vmem:[#allocation48_spill] sm:$0xff] }
 0x24a   : > { %v4130_v23 = vpack.c.bf16 %v2840_v42, %v2840_v42  ;;  %v2359_v27 = vadd.f32 %v2327_v30, %v2254_v0  ;;  %4339 = vmatmul.mubr.msk.bf16.gmra.mxu1 %vm288_vm0, %v4407_v20  ;;  %v2738_v3 = vadd.f32 %v2706_v57, %v2669_v13  ;;  %v2360_v40 = vadd.f32 %v2328_v33, %v2255_v32  ;;  %v4447_v0 = vld [vmem:[#allocation2 + $0x170] sm:$0xff] }
 0x24b   : > { %2999 = vst.msk [vmem:[#allocation3 + $0xd0] sm:$0xf] %vm1954_vm4, %v4129_v55  ;;  %v2739_v18 = vadd.f32 %v2707_v10, %v2670_v6  ;;  %v2465_v60 = vmul.f32 %v6915_v35, %v7009_v12  ;;  %v2466_v7 = vmul.f32 %v6915_v35, %v7011_v25  ;;  %v2570_v2 = vmul.f32 %v6929_v49, %v6919_v48 }
 0x24c   : > { %3000 = vst.msk [vmem:[#allocation3 + $0xd4] sm:$0xf] %vm1954_vm4, %v4130_v23  ;;  %v2428_v4 = vadd.f32 %v2396_v14, %v2359_v27  ;;  %v2571_v57 = vmul.f32 %v6929_v49, %v6921_v28  ;;  %v2777_v5 = vadd.f32 %v6987_v1, %v2738_v3  ;;  %v2429_v59 = vadd.f32 %v2397_v21, %v2360_v40  ;;  %v7054_v27 = vld [vmem:[#allocation2 + $0x169] sm:$0xff]  ;;  %v7056_v14 = vld [vmem:[#allocation2 + $0x171] sm:$0xff] }
 0x24d   : > { %v2778_v45 = vadd.f32 %v6987_v1, %v2739_v18  ;;  %v2639_v10 = vmul.f32 %v6993_v36, %v6968_v62  ;;  %v2640_v16 = vmul.f32 %v6993_v36, %v6977_v19  ;;  %v2708_v37 = vmul.f32 %v6944_v52, %v7025_v38 }
 0x24e   : > { %v2497_v11 = vadd.f32 %v2465_v60, %v2428_v4  ;;  %v2709_v48 = vmul.f32 %v6944_v52, %v7027_v41  ;;  %v2809_v24 = vmax.f32 %v2777_v5, 0.0  ;;  %v2498_v9 = vadd.f32 %v2466_v7, %v2429_v59  ;;  %v7073_v59 = vld [vmem:[#allocation2 + $0x172] sm:$0xff] }
 0x24f   : > { %v2810_v28 = vmax.f32 %v2778_v45, 0.0  ;;  %v2187_v43 = vadd.f32 %v7668_v8, %v7667_v58  ;;  %v2188_v44 = vadd.f32 %v7669_v17, %v6420_v63  ;;  %v2224_v42 = vmul.f32 %v4446_v61, %v6839_v29  ;;  %v7671_v61 = vld [vmem:[#allocation47_spill] sm:$0xff] }
 0x250   : > { %v2602_v53 = vadd.f32 %v2570_v2, %v2497_v11  ;;  %v2225_v30 = vmul.f32 %v4447_v0, %v6839_v29  ;;  %v2841_v33 = vmin.f32 %v2809_v24, 6.0  ;;  %v2603_v55 = vadd.f32 %v2571_v57, %v2498_v9  ;;  %v7064_v57 = vld [vmem:[#allocation2 + $0x16a] sm:$0xff] }
 0x251   : > { %v2842_v20 = vmin.f32 %v2810_v28, 6.0  ;;  %v2329_v13 = vmul.f32 %v6895_v39, %v6958_v56  ;;  %v2256_v32 = vadd.f32 %v2224_v42, %v2187_v43  ;;  %v2330_v63 = vmul.f32 %v6895_v39, %v6960_v22 }
 0x252   : > { %v2671_v6 = vadd.f32 %v2639_v10, %v2602_v53  ;;  %v2257_v23 = vadd.f32 %v2225_v30, %v2188_v44  ;;  %v4131_v3 = vpack.c.bf16 %v2841_v33, %v2841_v33  ;;  %v2672_v40 = vadd.f32 %v2640_v16, %v2603_v55  ;;  %v7670_v44 = vld [vmem:[#allocation44_spill] sm:$0xff]  ;;  %v2294_v55 = vld [vmem:[#allocation2 + $0x181] sm:$0xff] }
 0x253   : > { %v4408_v21 = vld [vmem:[#allocation3 + $0xd0] sm:$0xff]   ;;  %v4132_v18 = vpack.c.bf16 %v2842_v20, %v2842_v20  ;;  %v2398_v60 = vmul.f32 %v6904_v31, %v7009_v12  ;;  %v2361_v7 = vadd.f32 %v2329_v13, %v2256_v32  ;;  %v2399_v2 = vmul.f32 %v6904_v31, %v7011_v25 }
 0x254   : > { %v2740_v4 = vadd.f32 %v2708_v37, %v2671_v6  ;;  %v2362_v56 = vadd.f32 %v2330_v63, %v2257_v23  ;;  %4342 = vmatprep.mubr.msk.bf16.mxu1 %vm288_vm0, %v4408_v21  ;;  %3001 = vst.msk [vmem:[#allocation3 + $0xd8] sm:$0xf] %vm1954_vm4, %v4131_v3  ;;  %v2741_v22 = vadd.f32 %v2709_v48, %v2672_v40  ;;  %v2295_v63 = vld [vmem:[#allocation2 + $0x189] sm:$0xff] }
 0x255   : > { %3002 = vst.msk [vmem:[#allocation3 + $0xdc] sm:$0xf] %vm1954_vm4, %v4132_v18  ;;  %v2467_v5 = vmul.f32 %v6915_v35, %v7054_v27  ;;  %v2468_v45 = vmul.f32 %v6915_v35, %v7056_v14  ;;  %v2572_v10 = vmul.f32 %v6929_v49, %v6968_v62  ;;  %v2430_v16 = vadd.f32 %v2398_v60, %v2361_v7  ;;  %v7104_v7 = vld [vmem:[#allocation2 + $0x182] sm:$0xff] }
 0x256   : > { %v2779_v11 = vadd.f32 %v6987_v1, %v2740_v4  ;;  %v2431_v37 = vadd.f32 %v2399_v2, %v2362_v56  ;;  %v2573_v24 = vmul.f32 %v6929_v49, %v6977_v19  ;;  %v2780_v48 = vadd.f32 %v6987_v1, %v2741_v22  ;;  %v7111_v22 = vld [vmem:[#allocation2 + $0x18a] sm:$0xff] }
 0x257   : > { %v2641_v28 = vmul.f32 %v6993_v36, %v7025_v38  ;;  %v2642_v9 = vmul.f32 %v6993_v36, %v7027_v41  ;;  %v2710_v58 = vmul.f32 %v6944_v52, %v7064_v57  ;;  %v2499_v62 = vadd.f32 %v2467_v5, %v2430_v16 }
 0x258   : > { %v2811_v8 = vmax.f32 %v2779_v11, 0.0  ;;  %v2500_v43 = vadd.f32 %v2468_v45, %v2431_v37  ;;  %v2711_v53 = vmul.f32 %v6944_v52, %v7073_v59  ;;  %v2812_v17 = vmax.f32 %v2780_v48, 0.0  ;;  %v2053_v37 = vld [vmem:[#allocation2 + $0x198] sm:$0xff] }
 0x259   : > { %v2189_v19 = vadd.f32 %v6521_v50, %v7670_v44  ;;  %v2190_v42 = vadd.f32 %v6536_v47, %v7671_v61  ;;  %v2331_v0 = vmul.f32 %v6895_v39, %v7009_v12  ;;  %v2604_v33 = vadd.f32 %v2572_v10, %v2499_v62 }
 0x25a   : > { %v2843_v30 = vmin.f32 %v2811_v8, 6.0  ;;  %v2605_v20 = vadd.f32 %v2573_v24, %v2500_v43  ;;  %v2332_v13 = vmul.f32 %v6895_v39, %v7011_v25  ;;  %v2844_v6 = vmin.f32 %v2812_v17, 6.0 }
 0x25b   : > { %v2258_v32 = vadd.f32 %v6454_v54, %v2189_v19  ;;  %v2259_v23 = vadd.f32 %v6526_v26, %v2190_v42  ;;  %v2400_v50 = vmul.f32 %v6904_v31, %v7054_v27  ;;  %v2673_v3 = vadd.f32 %v2641_v28, %v2604_v33  ;;  %v7106_v54 = vpop.f32.mrf.mxu0 }
 0x25c   : > { %v4409_v47 = vld [vmem:[#allocation3 + $0xd8] sm:$0xff]   ;;  %v4133_v21 = vpack.c.bf16 %v2843_v30, %v2843_v30  ;;  %v2674_v12 = vadd.f32 %v2642_v9, %v2605_v20  ;;  %v2401_v18 = vmul.f32 %v6904_v31, %v7056_v14  ;;  %v4134_v40 = vpack.c.bf16 %v2844_v6, %v2844_v6  ;;  %v2054_v9 = vld [vmem:[#allocation2 + $0x1a0] sm:$0xff] }
 0x25d   : > { %v2363_v60 = vadd.f32 %v2331_v0, %v2258_v32  ;;  %v2364_v4 = vadd.f32 %v2332_v13, %v2259_v23  ;;  %v2469_v25 = vmul.f32 %v6915_v35, %v2294_v55  ;;  %4343 = vmatmul.mubr.msk.bf16.gmra.mxu1 %vm288_vm0, %v4409_v47  ;;  %v2742_v26 = vadd.f32 %v2710_v58, %v2673_v3  ;;  %v3420_v43 = vpop.f32.mrf.mxu0  ;;  %v2296_v6 = vld [vmem:[#allocation2 + $0x199] sm:$0xff] }
 0x25e   : > { %3003 = vst.msk [vmem:[#allocation3 + $0xe0] sm:$0xf] %vm1954_vm4, %v4133_v21  ;;  %v2743_v56 = vadd.f32 %v2711_v53, %v2674_v12  ;;  %v2470_v2 = vmul.f32 %v6915_v35, %v2295_v63  ;;  %v2574_v5 = vmul.f32 %v6929_v49, %v7025_v38  ;;  %3004 = vst.msk [vmem:[#allocation3 + $0xe4] sm:$0xf] %vm1954_vm4, %v4134_v40 }
 0x25f   : > { %v2432_v45 = vadd.f32 %v2400_v50, %v2363_v60  ;;  %v2433_v10 = vadd.f32 %v2401_v18, %v2364_v4  ;;  %v2575_v11 = vmul.f32 %v6929_v49, %v7027_v41  ;;  %v2643_v16 = vmul.f32 %v6993_v36, %v7064_v57  ;;  %v4293_v50 = vpop.f32.mrf.mxu0  ;;  %v2539_v4 = vld [vmem:[#allocation2 + $0x19a] sm:$0xff] }
 0x260   : > { %v2781_v24 = vadd.f32 %v6987_v1, %v2742_v26  ;;  %v2782_v48 = vadd.f32 %v6987_v1, %v2743_v56  ;;  %v2644_v28 = vmul.f32 %v6993_v36, %v7073_v59  ;;  %v2712_v38 = vmul.f32 %v6944_v52, %v7104_v7 }
 0x261   : > { %v2501_v58 = vadd.f32 %v2469_v25, %v2432_v45  ;;  %v2502_v8 = vadd.f32 %v2470_v2, %v2433_v10  ;;  %v2713_v41 = vmul.f32 %v6944_v52, %v7111_v22  ;;  %v2191_v62 = vadd.f32 %v6451_v51, %v6516_v34  ;;  %v4296_v45 = vpop.f32.mrf.mxu1 }
 0x262   : > { %v2813_v53 = vmax.f32 %v2781_v24, 0.0  ;;  %v2814_v17 = vmax.f32 %v2782_v48, 0.0  ;;  %v2192_v44 = vadd.f32 %v6523_v15, %v6534_v46  ;;  %v2228_v19 = vmul.f32 %v6839_v29, %v2053_v37  ;;  %v2297_v15 = vld [vmem:[#allocation2 + $0x1a1] sm:$0xff] }
 0x263   : > { %v2606_v61 = vadd.f32 %v2574_v5, %v2501_v58  ;;  %v2607_v42 = vadd.f32 %v2575_v11, %v2502_v8  ;;  %v2229_v0 = vmul.f32 %v6839_v29, %v2054_v9  ;;  %v2333_v30 = vmul.f32 %v6895_v39, %v7054_v27  ;;  %v3423_v5 = vpop.f32.mrf.mxu0  ;;  %v4448_v9 = vld [vmem:[%s4656_s9 + $0x10] sm:$0xff] }
 0x264   : > { %v2845_v33 = vmin.f32 %v2813_v53, 6.0  ;;  %v2846_v20 = vmin.f32 %v2814_v17, 6.0  ;;  %v2260_v13 = vadd.f32 %v2228_v19, %v2191_v62  ;;  %v2334_v51 = vmul.f32 %v6895_v39, %v7056_v14  ;;  %v2540_v39 = vld [vmem:[#allocation2 + $0x1a2] sm:$0xff]  ;;  %v4450_v17 = vld [vmem:[%s4656_s9 + $0x18] sm:$0xff] }
 0x265   : > { %v2675_v34 = vadd.f32 %v2643_v16, %v2606_v61  ;;  %v2676_v32 = vadd.f32 %v2644_v28, %v2607_v42  ;;  %v2261_v23 = vadd.f32 %v2229_v0, %v2192_v44  ;;  %v2402_v46 = vmul.f32 %v6904_v31, %v2294_v55  ;;  %v4410_v47 = vld [vmem:[#allocation3 + $0xe0] sm:$0xff]   ;;  %v4449_v62 = vld [vmem:[%s4656_s9] sm:$0xff] }
 0x266   : > { %v4135_v21 = vpack.c.bf16 %v2845_v33, %v2845_v33  ;;  %v4136_v29 = vpack.c.bf16 %v2846_v20, %v2846_v20  ;;  %v2365_v3 = vadd.f32 %v2333_v30, %v2260_v13  ;;  %v2403_v27 = vmul.f32 %v6904_v31, %v2295_v63  ;;  %4346 = vmatprep.mubr.msk.bf16.mxu1 %vm288_vm0, %v4410_v47  ;;  %v7152_v63 = vld [vmem:[%s7444_s6] ss:$0 sm:$0xff] }
 0x267   : > { %v2744_v12 = vadd.f32 %v2712_v38, %v2675_v34  ;;  %v2745_v18 = vadd.f32 %v2713_v41, %v2676_v32  ;;  %v2366_v40 = vadd.f32 %v2334_v51, %v2261_v23  ;;  %v2471_v60 = vmul.f32 %v6915_v35, %v2296_v6  ;;  %v4452_v23 = vld [vmem:[%s4656_s9 + $0x30] sm:$0xff] }
 0x268   : > { %3005 = vst.msk [vmem:[#allocation3 + $0xe8] sm:$0xf] %vm1954_vm4, %v4135_v21  ;;  %3006 = vst.msk [vmem:[#allocation3 + $0xec] sm:$0xf] %vm1954_vm4, %v4136_v29  ;;  %v2434_v14 = vadd.f32 %v2402_v46, %v2365_v3  ;;  %v2472_v55 = vmul.f32 %v6915_v35, %v2297_v15  ;;  %v2576_v25 = vmul.f32 %v6929_v49, %v7064_v57  ;;  %v4454_v21 = vld [vmem:[%s4656_s9 + $0x38] sm:$0xff]  ;;  %v4455_v3 = vld [vmem:[%s4656_s9 + $0x28] sm:$0xff] }
 0x269   : > { %v2577_v31 = vmul.f32 %v6929_v49, %v7073_v59  ;;  %v2783_v26 = vadd.f32 %v6987_v1, %v2744_v12  ;;  %v2784_v56 = vadd.f32 %v6987_v1, %v2745_v18  ;;  %v2435_v2 = vadd.f32 %v2403_v27, %v2366_v40 }
 0x26a   : > { %v2645_v35 = vmul.f32 %v6993_v36, %v7104_v7  ;;  %v2503_v57 = vadd.f32 %v2471_v60, %v2434_v14  ;;  %v2646_v49 = vmul.f32 %v6993_v36, %v7111_v22  ;;  %v2714_v59 = vmul.f32 %v6944_v52, %v2539_v4  ;;  %v3436_v7 = vpop.f32.mrf.mxu1  ;;  %v4456_v14 = vld [vmem:[%s4656_s9 + $0x50] sm:$0xff] }
 0x26b   : > { %v2715_v10 = vmul.f32 %v6944_v52, %v2540_v39  ;;  %v2815_v11 = vmax.f32 %v2783_v26, 0.0  ;;  %v2816_v16 = vmax.f32 %v2784_v56, 0.0  ;;  %v2504_v37 = vadd.f32 %v2472_v55, %v2435_v2  ;;  %v4457_v56 = vld [vmem:[%s4656_s9 + $0x40] sm:$0xff] }
 0x26c   : > { %v3429_v24 = vadd.f32 %v7106_v54, %v7152_v63  ;;  %v2608_v36 = vadd.f32 %v2576_v25, %v2503_v57  ;;  %v3421_v22 = vadd.f32 %v7152_v63, %v3420_v43  ;;  %v3432_v52 = vadd.f32 %v4293_v50, %v7152_v63  ;;  %v4297_v8 = vpop.f32.mrf.mxu1  ;;  %v4451_v43 = vld [vmem:[%s4656_s9 + $0x8] sm:$0xff]  ;;  %v4453_v50 = vld [vmem:[%s4656_s9 + $0x20] sm:$0xff] }
 0x26d   : > { %v3424_v48 = vadd.f32 %v7152_v63, %v3423_v5  ;;  %v2847_v28 = vmin.f32 %v2815_v11, 6.0  ;;  %v2848_v38 = vmin.f32 %v2816_v16, 6.0  ;;  %v2609_v54 = vadd.f32 %v2577_v31, %v2504_v37  ;;  %v4459_v37 = vld [vmem:[%s4656_s9 + $0x48] sm:$0xff] }
 0x26e   : > { %v3677_v58 = vadd.f32 %v4448_v9, %v3429_v24  ;;  %v2677_v41 = vadd.f32 %v2645_v35, %v2608_v36  ;;  %v3675_v53 = vadd.f32 %v4449_v62, %v3421_v22  ;;  %v3678_v44 = vadd.f32 %v4450_v17, %v3432_v52  ;;  %v3439_v20 = vpop.f32.mrf.mxu1  ;;  %v4460_v22 = vld [vmem:[%s4656_s9 + $0x70] sm:$0xff]  ;;  %v4463_v17 = vld [vmem:[%s4656_s9 + $0x68] sm:$0xff] }
 0x26f   : > { %v3676_v19 = vadd.f32 %v4451_v43, %v3424_v48  ;;  %v4411_v61 = vld [vmem:[#allocation3 + $0xe8] sm:$0xff]   ;;  %v4137_v42 = vpack.c.bf16 %v2847_v28, %v2847_v28  ;;  %v4138_v0 = vpack.c.bf16 %v2848_v38, %v2848_v38  ;;  %v2678_v30 = vadd.f32 %v2646_v49, %v2609_v54  ;;  %v4461_v38 = vld [vmem:[%s4656_s9 + $0x60] sm:$0xff] }
 0x270   : > { %3741 = vst.msk [vmem:[%s7169_s21 + $0x10] sm:$0xff] %vm445_vm2, %v3677_v58  ;;  %v3445_v33 = vadd.f32 %v4296_v45, %v7152_v63  ;;  %v2746_v13 = vadd.f32 %v2714_v59, %v2677_v41  ;;  %3739 = vst.msk [vmem:[%s7169_s21] sm:$0xff] %vm445_vm2, %v3675_v53  ;;  %v3437_v6 = vadd.f32 %v7152_v63, %v3436_v7  ;;  %4347 = vmatmul.mubr.msk.bf16.gmra.mxu1 %vm288_vm0, %v4411_v61  ;;  %v4300_v12 = vpop.f32.mrf.mxu1  ;;  %v4458_v59 = vld [vmem:[%s4656_s9 + $0x58] sm:$0xff] }
 0x271   : > { %3742 = vst.msk [vmem:[%s7169_s21 + $0x18] sm:$0xff] %vm445_vm2, %v3678_v44  ;;  %3740 = vst.msk [vmem:[%s7169_s21 + $0x8] sm:$0xff] %vm445_vm2, %v3676_v19  ;;  %v3448_v51 = vadd.f32 %v4297_v8, %v7152_v63  ;;  %v3440_v34 = vadd.f32 %v7152_v63, %v3439_v20  ;;  %v2747_v32 = vadd.f32 %v2715_v10, %v2678_v30  ;;  %v4462_v8 = vld [vmem:[%s4656_s9 + $0x78] sm:$0xff]  ;;  %v4465_v20 = vld [vmem:[%s4656_s9 + $0x80] sm:$0xff] }
 0x272   : > { %3007 = vst.msk [vmem:[#allocation3 + $0xf0] sm:$0xf] %vm1954_vm4, %v4137_v42  ;;  %3008 = vst.msk [vmem:[#allocation3 + $0xf4] sm:$0xf] %vm1954_vm4, %v4138_v0  ;;  %v3681_v15 = vadd.f32 %v4452_v23, %v3445_v33  ;;  %v2785_v46 = vadd.f32 %v6987_v1, %v2746_v13  ;;  %v3679_v47 = vadd.f32 %v4453_v50, %v3437_v6  ;;  %v3452_v4 = vpop.f32.mrf.mxu1  ;;  %v4464_v42 = vld [vmem:[%s4656_s9 + $0x90] sm:$0xff] }
 0x273   : > { %v3682_v29 = vadd.f32 %v4454_v21, %v3448_v51  ;;  %v3680_v27 = vadd.f32 %v4455_v3, %v3440_v34  ;;  %v2786_v18 = vadd.f32 %v6987_v1, %v2747_v32  ;;  %v3461_v40 = vadd.f32 %v4300_v12, %v7152_v63  ;;  %v4466_v34 = vld [vmem:[%s4656_s9 + $0x98] sm:$0xff] }
 0x274   : > { %3745 = vst.msk [vmem:[%s7169_s21 + $0x30] sm:$0xff] %vm445_vm2, %v3681_v15  ;;  %v2817_v60 = vmax.f32 %v2785_v46, 0.0  ;;  %3743 = vst.msk [vmem:[%s7169_s21 + $0x20] sm:$0xff] %vm445_vm2, %v3679_v47  ;;  %v3453_v1 = vadd.f32 %v7152_v63, %v3452_v4  ;;  %v4301_v31 = vpop.f32.mrf.mxu1  ;;  %v4467_v46 = vld [vmem:[%s4656_s9 + $0x88] sm:$0xff] }
 0x275   : > { %3746 = vst.msk [vmem:[%s7169_s21 + $0x38] sm:$0xff] %vm445_vm2, %v3682_v29  ;;  %3744 = vst.msk [vmem:[%s7169_s21 + $0x28] sm:$0xff] %vm445_vm2, %v3680_v27  ;;  %v2818_v39 = vmax.f32 %v2786_v18, 0.0  ;;  %v3685_v55 = vadd.f32 %v4456_v14, %v3461_v40  ;;  %v3464_v35 = vadd.f32 %v4301_v31, %v7152_v63  ;;  %v4468_v29 = vld [vmem:[%s4656_s9 + $0xb0] sm:$0xff]  ;;  %v4469_v18 = vld [vmem:[%s4656_s9 + $0xa0] sm:$0xff] }
 0x276   : > { %v2849_v25 = vmin.f32 %v2817_v60, 6.0  ;;  %v3683_v2 = vadd.f32 %v4457_v56, %v3453_v1  ;;  %v3455_v57 = vpop.f32.mrf.mxu1 }
 0x277   : > { %v2850_v26 = vmin.f32 %v2818_v39, 6.0  ;;  %3749 = vst.msk [vmem:[%s7169_s21 + $0x50] sm:$0xff] %vm445_vm2, %v3685_v55  ;;  %v3686_v10 = vadd.f32 %v4458_v59, %v3464_v35  ;;  %v3456_v11 = vadd.f32 %v7152_v63, %v3455_v57  ;;  %v4470_v39 = vld [vmem:[%s4656_s9 + $0xb8] sm:$0xff]  ;;  %v4473_v57 = vld [vmem:[%s4656_s9 + $0xc0] sm:$0xff] }
 0x278   : > { %v4139_v45 = vpack.c.bf16 %v2849_v25, %v2849_v25  ;;  %3747 = vst.msk [vmem:[%s7169_s21 + $0x40] sm:$0xff] %vm445_vm2, %v3683_v2  ;;  %v4304_v16 = vpop.f32.mrf.mxu1  ;;  %v4471_v25 = vld [vmem:[%s4656_s9 + $0xa8] sm:$0xff]  ;;  %v4472_v2 = vld [vmem:[%s4656_s9 + $0xd0] sm:$0xff] }
 0x279   : > { %v4412_v5 = vld [vmem:[#allocation3 + $0xf0] sm:$0xff]   ;;  %v4140_v49 = vpack.c.bf16 %v2850_v26, %v2850_v26  ;;  %3750 = vst.msk [vmem:[%s7169_s21 + $0x58] sm:$0xff] %vm445_vm2, %v3686_v10  ;;  %v3684_v24 = vadd.f32 %v4459_v37, %v3456_v11  ;;  %v3477_v7 = vadd.f32 %v4304_v16, %v7152_v63  ;;  %v4474_v11 = vld [vmem:[%s4656_s9 + $0xd8] sm:$0xff] }
 0x27a   : > { %4350 = vmatprep.mubr.msk.bf16.mxu1 %vm288_vm0, %v4412_v5  ;;  %3009 = vst.msk [vmem:[#allocation3 + $0xf8] sm:$0xf] %vm1954_vm4, %v4139_v45  ;;  %v3468_v36 = vpop.f32.mrf.mxu1 }
 0x27b   : > { %3010 = vst.msk [vmem:[#allocation3 + $0xfc] sm:$0xf] %vm1954_vm4, %v4140_v49  ;;  %v3689_v52 = vadd.f32 %v4460_v22, %v3477_v7  ;;  %v3469_v48 = vadd.f32 %v7152_v63, %v3468_v36 }
 0x27c   : > { %3748 = vst.msk [vmem:[%s7169_s21 + $0x48] sm:$0xff] %vm445_vm2, %v3684_v24  ;;  %v4305_v28 = vpop.f32.mrf.mxu1  ;;  %v4475_v24 = vld [vmem:[%s4656_s9 + $0xc8] sm:$0xff] }
 0x27d   : > { %3753 = vst.msk [vmem:[%s7169_s21 + $0x70] sm:$0xff] %vm445_vm2, %v3689_v52  ;;  %v3687_v54 = vadd.f32 %v4461_v38, %v3469_v48  ;;  %v3480_v9 = vadd.f32 %v4305_v28, %v7152_v63  ;;  %v4476_v48 = vld [vmem:[%s4656_s9 + $0xf0] sm:$0xff] }
 0x27e   : > { %v3471_v58 = vpop.f32.mrf.mxu1 }
 0x27f   : > { %3751 = vst.msk [vmem:[%s7169_s21 + $0x60] sm:$0xff] %vm445_vm2, %v3687_v54  ;;  %v3690_v41 = vadd.f32 %v4462_v8, %v3480_v9  ;;  %v3472_v62 = vadd.f32 %v7152_v63, %v3471_v58  ;;  %v4477_v9 = vld [vmem:[%s4656_s9 + $0xe0] sm:$0xff] }
 0x280   : > { %v4308_v43 = vpop.f32.mrf.mxu1 }
 0x281   : > { %3754 = vst.msk [vmem:[%s7169_s21 + $0x78] sm:$0xff] %vm445_vm2, %v3690_v41  ;;  %v3688_v44 = vadd.f32 %v4463_v17, %v3472_v62  ;;  %v3493_v19 = vadd.f32 %v4308_v43, %v7152_v63  ;;  %v4478_v62 = vld [vmem:[%s4656_s9 + $0xf8] sm:$0xff] }
 0x282   : > { %v4413_v53 = vld [vmem:[#allocation3 + $0xf8] sm:$0xff]   ;;  %v3484_v61 = vpop.f32.mrf.mxu1 }
 0x283   : > { %4351 = vmatmul.mubr.msk.bf16.gmra.mxu1 %vm288_vm0, %v4413_v53  ;;  %3752 = vst.msk [vmem:[%s7169_s21 + $0x68] sm:$0xff] %vm445_vm2, %v3688_v44  ;;  %v3693_v0 = vadd.f32 %v4464_v42, %v3493_v19  ;;  %v3485_v30 = vadd.f32 %v7152_v63, %v3484_v61  ;;  %v4479_v44 = vld [vmem:[%s4656_s9 + $0xe8] sm:$0xff] }
 0x284   : > { %v4309_v33 = vpop.f32.mrf.mxu1 }
 0x285   : > { %3757 = vst.msk [vmem:[%s7169_s21 + $0x90] sm:$0xff] %vm445_vm2, %v3693_v0  ;;  %v3691_v13 = vadd.f32 %v4465_v20, %v3485_v30  ;;  %v3496_v6 = vadd.f32 %v4309_v33, %v7152_v63  ;;  %v4480_v0 = vld [vmem:[%s4656_s9 + $0x110] sm:$0xff] }
 0x286   : > { %v3487_v51 = vpop.f32.mrf.mxu1 }
 0x287   : > { %3755 = vst.msk [vmem:[%s7169_s21 + $0x80] sm:$0xff] %vm445_vm2, %v3691_v13  ;;  %v3694_v32 = vadd.f32 %v4466_v34, %v3496_v6  ;;  %v3488_v23 = vadd.f32 %v7152_v63, %v3487_v51  ;;  %v4481_v13 = vld [vmem:[%s4656_s9 + $0x100] sm:$0xff] }
 0x288   : > { %v4312_v15 = vpop.f32.mrf.mxu1 }
 0x289   : > { %3758 = vst.msk [vmem:[%s7169_s21 + $0x98] sm:$0xff] %vm445_vm2, %v3694_v32  ;;  %v3692_v50 = vadd.f32 %v4467_v46, %v3488_v23  ;;  %v3509_v47 = vadd.f32 %v4312_v15, %v7152_v63  ;;  %v4482_v32 = vld [vmem:[%s4656_s9 + $0x118] sm:$0xff]  ;;  %v4483_v46 = vld [vmem:[%s4656_s9 + $0x108] sm:$0xff] }
 0x28a   : > { %v3500_v21 = vpop.f32.mrf.mxu1 }
 0x28b   : > { %3756 = vst.msk [vmem:[%s7169_s21 + $0x88] sm:$0xff] %vm445_vm2, %v3692_v50  ;;  %v3697_v3 = vadd.f32 %v4468_v29, %v3509_v47  ;;  %v3501_v27 = vadd.f32 %v7152_v63, %v3500_v21 }
 0x28c   : > { %v4313_v12 = vpop.f32.mrf.mxu1 }
 0x28d   : > { %3761 = vst.msk [vmem:[%s7169_s21 + $0xb0] sm:$0xff] %vm445_vm2, %v3697_v3  ;;  %v3695_v40 = vadd.f32 %v4469_v18, %v3501_v27  ;;  %v3512_v60 = vadd.f32 %v4313_v12, %v7152_v63  ;;  %v4484_v3 = vld [vmem:[%s4656_s9 + $0x130] sm:$0xff] }
 0x28e   : > { %v3503_v4 = vpop.f32.mrf.mxu1 }
 0x28f   : > { %3759 = vst.msk [vmem:[%s7169_s21 + $0xa0] sm:$0xff] %vm445_vm2, %v3695_v40  ;;  %v3698_v14 = vadd.f32 %v4470_v39, %v3512_v60  ;;  %v3504_v55 = vadd.f32 %v7152_v63, %v3503_v4  ;;  %v4485_v40 = vld [vmem:[%s4656_s9 + $0x120] sm:$0xff] }
 0x290   : > { %v4316_v1 = vpop.f32.mrf.mxu1 }
 0x291   : > { %3762 = vst.msk [vmem:[%s7169_s21 + $0xb8] sm:$0xff] %vm445_vm2, %v3698_v14  ;;  %v3696_v31 = vadd.f32 %v4471_v25, %v3504_v55  ;;  %v3525_v26 = vadd.f32 %v4316_v1, %v7152_v63  ;;  %v4486_v14 = vld [vmem:[%s4656_s9 + $0x138] sm:$0xff]  ;;  %v4487_v25 = vld [vmem:[%s4656_s9 + $0x128] sm:$0xff] }
 0x292   : > { %v3516_v56 = vpop.f32.mrf.mxu1 }
 0x293   : > { %3760 = vst.msk [vmem:[%s7169_s21 + $0xa8] sm:$0xff] %vm445_vm2, %v3696_v31  ;;  %v3701_v35 = vadd.f32 %v4472_v2, %v3525_v26  ;;  %v3517_v5 = vadd.f32 %v7152_v63, %v3516_v56 }
 0x294   : > { %v4317_v45 = vpop.f32.mrf.mxu1 }
 0x295   : > { %3765 = vst.msk [vmem:[%s7169_s21 + $0xd0] sm:$0xff] %vm445_vm2, %v3701_v35  ;;  %v3699_v49 = vadd.f32 %v4473_v57, %v3517_v5  ;;  %v3528_v59 = vadd.f32 %v4317_v45, %v7152_v63  ;;  %v4488_v35 = vld [vmem:[%s4656_s9 + $0x150] sm:$0xff] }
 0x296   : > { %v3519_v10 = vpop.f32.mrf.mxu1 }
 0x297   : > { %3763 = vst.msk [vmem:[%s7169_s21 + $0xc0] sm:$0xff] %vm445_vm2, %v3699_v49  ;;  %v3702_v16 = vadd.f32 %v4474_v11, %v3528_v59  ;;  %v3520_v37 = vadd.f32 %v7152_v63, %v3519_v10  ;;  %v4489_v49 = vld [vmem:[%s4656_s9 + $0x140] sm:$0xff] }
 0x299   : > { %3766 = vst.msk [vmem:[%s7169_s21 + $0xd8] sm:$0xff] %vm445_vm2, %v3702_v16  ;;  %v3700_v7 = vadd.f32 %v4475_v24, %v3520_v37  ;;  %v4490_v16 = vld [vmem:[%s4656_s9 + $0x158] sm:$0xff] }
 0x29b   : > { %3764 = vst.msk [vmem:[%s7169_s21 + $0xc8] sm:$0xff] %vm445_vm2, %v3700_v7  ;;  %v4491_v7 = vld [vmem:[%s4656_s9 + $0x148] sm:$0xff] }
 0x2a0   : > { %v4320_v36 = vpop.f32.mrf.mxu1 }
 0x2a1   : > { %v3541_v22 = vadd.f32 %v4320_v36, %v7152_v63 }
 0x2a2   : > { %v3532_v52 = vpop.f32.mrf.mxu1 }
 0x2a3   : > { %v3705_v28 = vadd.f32 %v4476_v48, %v3541_v22  ;;  %v3533_v38 = vadd.f32 %v7152_v63, %v3532_v52 }
 0x2a4   : > { %v4321_v54 = vpop.f32.mrf.mxu1 }
 0x2a5   : > { %3769 = vst.msk [vmem:[%s7169_s21 + $0xf0] sm:$0xff] %vm445_vm2, %v3705_v28  ;;  %v3703_v58 = vadd.f32 %v4477_v9, %v3533_v38  ;;  %v3544_v8 = vadd.f32 %v4321_v54, %v7152_v63  ;;  %v4492_v28 = vld [vmem:[%s4656_s9 + $0x170] sm:$0xff] }
 0x2a6   : > { %v3535_v41 = vpop.f32.mrf.mxu1 }
 0x2a7   : > { %3767 = vst.msk [vmem:[%s7169_s21 + $0xe0] sm:$0xff] %vm445_vm2, %v3703_v58  ;;  %v3706_v53 = vadd.f32 %v4478_v62, %v3544_v8  ;;  %v3536_v17 = vadd.f32 %v7152_v63, %v3535_v41  ;;  %v4493_v58 = vld [vmem:[%s4656_s9 + $0x160] sm:$0xff] }
 0x2a9   : > { %3770 = vst.msk [vmem:[%s7169_s21 + $0xf8] sm:$0xff] %vm445_vm2, %v3706_v53  ;;  %v3704_v43 = vadd.f32 %v4479_v44, %v3536_v17  ;;  %v4494_v53 = vld [vmem:[%s4656_s9 + $0x178] sm:$0xff] }
 0x2ab   : > { %3768 = vst.msk [vmem:[%s7169_s21 + $0xe8] sm:$0xff] %vm445_vm2, %v3704_v43  ;;  %v4495_v43 = vld [vmem:[%s4656_s9 + $0x168] sm:$0xff] }
 0x2bd   : > { %v4324_v19 = vpop.f32.mrf.mxu1 }
 0x2be   : > { %v3557_v61 = vadd.f32 %v4324_v19, %v7152_v63 }
 0x2bf   : > { %v3548_v42 = vpop.f32.mrf.mxu1 }
 0x2c0   : > { %v3709_v30 = vadd.f32 %v4480_v0, %v3557_v61  ;;  %v3549_v33 = vadd.f32 %v7152_v63, %v3548_v42 }
 0x2c1   : > { %v4325_v20 = vpop.f32.mrf.mxu1 }
 0x2c2   : > { %3773 = vst.msk [vmem:[%s7169_s21 + $0x110] sm:$0xff] %vm445_vm2, %v3709_v30  ;;  %v3707_v6 = vadd.f32 %v4481_v13, %v3549_v33  ;;  %v3560_v51 = vadd.f32 %v4325_v20, %v7152_v63  ;;  %v4496_v30 = vld [vmem:[%s4656_s9 + $0x190] sm:$0xff] }
 0x2c3   : > { %v3551_v34 = vpop.f32.mrf.mxu1 }
 0x2c4   : > { %3771 = vst.msk [vmem:[%s7169_s21 + $0x100] sm:$0xff] %vm445_vm2, %v3707_v6  ;;  %v3710_v23 = vadd.f32 %v4482_v32, %v3560_v51  ;;  %v3552_v15 = vadd.f32 %v7152_v63, %v3551_v34  ;;  %v4497_v6 = vld [vmem:[%s4656_s9 + $0x180] sm:$0xff] }
 0x2c6   : > { %3774 = vst.msk [vmem:[%s7169_s21 + $0x118] sm:$0xff] %vm445_vm2, %v3710_v23  ;;  %v3708_v50 = vadd.f32 %v4483_v46, %v3552_v15  ;;  %v4498_v23 = vld [vmem:[%s4656_s9 + $0x198] sm:$0xff] }
 0x2c8   : > { %3772 = vst.msk [vmem:[%s7169_s21 + $0x108] sm:$0xff] %vm445_vm2, %v3708_v50  ;;  %v4499_v50 = vld [vmem:[%s4656_s9 + $0x188] sm:$0xff] }
 0x2d0   : > { %v4328_v47 = vpop.f32.mrf.mxu1 }
 0x2d1   : > { %v3573_v21 = vadd.f32 %v4328_v47, %v7152_v63 }
 0x2d2   : > { %v3564_v29 = vpop.f32.mrf.mxu1 }
 0x2d3   : > { %v3713_v27 = vadd.f32 %v4484_v3, %v3573_v21  ;;  %v3565_v12 = vadd.f32 %v7152_v63, %v3564_v29 }
 0x2d4   : > { %v4329_v18 = vpop.f32.mrf.mxu1 }
 0x2d5   : > { %3777 = vst.msk [vmem:[%s7169_s21 + $0x130] sm:$0xff] %vm445_vm2, %v3713_v27  ;;  %v3711_v60 = vadd.f32 %v4485_v40, %v3565_v12  ;;  %v3576_v4 = vadd.f32 %v4329_v18, %v7152_v63  ;;  %v4500_v27 = vld [vmem:[%s4656_s9 + $0x1b0] sm:$0xff] }
 0x2d6   : > { %v3567_v39 = vpop.f32.mrf.mxu1 }
 0x2d7   : > { %3775 = vst.msk [vmem:[%s7169_s21 + $0x120] sm:$0xff] %vm445_vm2, %v3711_v60  ;;  %v3714_v55 = vadd.f32 %v4486_v14, %v3576_v4  ;;  %v3568_v1 = vadd.f32 %v7152_v63, %v3567_v39  ;;  %v4501_v60 = vld [vmem:[%s4656_s9 + $0x1a0] sm:$0xff] }
 0x2d9   : > { %3778 = vst.msk [vmem:[%s7169_s21 + $0x138] sm:$0xff] %vm445_vm2, %v3714_v55  ;;  %v3712_v31 = vadd.f32 %v4487_v25, %v3568_v1  ;;  %v4502_v55 = vld [vmem:[%s4656_s9 + $0x1b8] sm:$0xff] }
 0x2db   : > { %3776 = vst.msk [vmem:[%s7169_s21 + $0x128] sm:$0xff] %vm445_vm2, %v3712_v31  ;;  %v4503_v31 = vld [vmem:[%s4656_s9 + $0x1a8] sm:$0xff] }
 0x2e5   : > { %v4332_v26 = vpop.f32.mrf.mxu1 }
 0x2e6   : > { %v3589_v56 = vadd.f32 %v4332_v26, %v7152_v63 }
 0x2e7   : > { %v3580_v2 = vpop.f32.mrf.mxu1 }
 0x2e8   : > { %v3717_v5 = vadd.f32 %v4488_v35, %v3589_v56  ;;  %v3581_v45 = vadd.f32 %v7152_v63, %v3580_v2 }
 0x2e9   : > { %v4333_v57 = vpop.f32.mrf.mxu1 }
 0x2ea   : > { %3781 = vst.msk [vmem:[%s7169_s21 + $0x150] sm:$0xff] %vm445_vm2, %v3717_v5  ;;  %v3715_v59 = vadd.f32 %v4489_v49, %v3581_v45  ;;  %v3592_v10 = vadd.f32 %v4333_v57, %v7152_v63  ;;  %v4504_v5 = vld [vmem:[%s4656_s9 + $0x1d0] sm:$0xff] }
 0x2eb   : > { %v3583_v11 = vpop.f32.mrf.mxu1 }
 0x2ec   : > { %3779 = vst.msk [vmem:[%s7169_s21 + $0x140] sm:$0xff] %vm445_vm2, %v3715_v59  ;;  %v3718_v37 = vadd.f32 %v4490_v16, %v3592_v10  ;;  %v3584_v24 = vadd.f32 %v7152_v63, %v3583_v11  ;;  %v4505_v59 = vld [vmem:[%s4656_s9 + $0x1c0] sm:$0xff] }
 0x2ee   : > { %3782 = vst.msk [vmem:[%s7169_s21 + $0x158] sm:$0xff] %vm445_vm2, %v3718_v37  ;;  %v3716_v36 = vadd.f32 %v4491_v7, %v3584_v24  ;;  %v4506_v37 = vld [vmem:[%s4656_s9 + $0x1d8] sm:$0xff] }
 0x2f0   : > { %3780 = vst.msk [vmem:[%s7169_s21 + $0x148] sm:$0xff] %vm445_vm2, %v3716_v36  ;;  %v4507_v36 = vld [vmem:[%s4656_s9 + $0x1c8] sm:$0xff] }
 0x2f6   : > { %v4336_v22 = vpop.f32.mrf.mxu1 }
 0x2f7   : > { %v3605_v52 = vadd.f32 %v4336_v22, %v7152_v63 }
 0x2f8   : > { %v3596_v48 = vpop.f32.mrf.mxu1 }
 0x2f9   : > { %v3721_v38 = vadd.f32 %v4492_v28, %v3605_v52  ;;  %v3597_v54 = vadd.f32 %v7152_v63, %v3596_v48 }
 0x2fa   : > { %v4337_v9 = vpop.f32.mrf.mxu1 }
 0x2fb   : > { %3785 = vst.msk [vmem:[%s7169_s21 + $0x170] sm:$0xff] %vm445_vm2, %v3721_v38  ;;  %v3719_v8 = vadd.f32 %v4493_v58, %v3597_v54  ;;  %v3608_v41 = vadd.f32 %v4337_v9, %v7152_v63  ;;  %v4508_v38 = vld [vmem:[%s4656_s9 + $0x1f0] sm:$0xff] }
 0x2fc   : > { %v3599_v62 = vpop.f32.mrf.mxu1 }
 0x2fd   : > { %3783 = vst.msk [vmem:[%s7169_s21 + $0x160] sm:$0xff] %vm445_vm2, %v3719_v8  ;;  %v3722_v17 = vadd.f32 %v4494_v53, %v3608_v41  ;;  %v3600_v44 = vadd.f32 %v7152_v63, %v3599_v62  ;;  %v4509_v8 = vld [vmem:[%s4656_s9 + $0x1e0] sm:$0xff] }
 0x2ff   : > { %3786 = vst.msk [vmem:[%s7169_s21 + $0x178] sm:$0xff] %vm445_vm2, %v3722_v17  ;;  %v3720_v19 = vadd.f32 %v4495_v43, %v3600_v44  ;;  %v4510_v17 = vld [vmem:[%s4656_s9 + $0x1f8] sm:$0xff] }
 0x301   : > { %3784 = vst.msk [vmem:[%s7169_s21 + $0x168] sm:$0xff] %vm445_vm2, %v3720_v19  ;;  %v4511_v19 = vld [vmem:[%s4656_s9 + $0x1e8] sm:$0xff] }
 0x30a   : > { %v4340_v61 = vpop.f32.mrf.mxu1 }
 0x30b   : > { %v3621_v42 = vadd.f32 %v4340_v61, %v7152_v63 }
 0x30c   : > { %v3612_v0 = vpop.f32.mrf.mxu1 }
 0x30d   : > { %v3725_v33 = vadd.f32 %v4496_v30, %v3621_v42  ;;  %v3613_v20 = vadd.f32 %v7152_v63, %v3612_v0 }
 0x30e   : > { %v4341_v13 = vpop.f32.mrf.mxu1 }
 0x30f   : > { %3789 = vst.msk [vmem:[%s7169_s21 + $0x190] sm:$0xff] %vm445_vm2, %v3725_v33  ;;  %v3723_v51 = vadd.f32 %v4497_v6, %v3613_v20  ;;  %v3624_v34 = vadd.f32 %v4341_v13, %v7152_v63 }
 0x310   : > { %v3615_v32 = vpop.f32.mrf.mxu1 }
 0x311   : > { %3787 = vst.msk [vmem:[%s7169_s21 + $0x180] sm:$0xff] %vm445_vm2, %v3723_v51  ;;  %v3726_v15 = vadd.f32 %v4498_v23, %v3624_v34  ;;  %v3616_v46 = vadd.f32 %v7152_v63, %v3615_v32 }
 0x313   : > { %3790 = vst.msk [vmem:[%s7169_s21 + $0x198] sm:$0xff] %vm445_vm2, %v3726_v15  ;;  %v3724_v47 = vadd.f32 %v4499_v50, %v3616_v46 }
 0x315   : > { %3788 = vst.msk [vmem:[%s7169_s21 + $0x188] sm:$0xff] %vm445_vm2, %v3724_v47 }
 0x31d   : > { %v4344_v21 = vpop.f32.mrf.mxu1 }
 0x31e   : > { %v3637_v29 = vadd.f32 %v4344_v21, %v7152_v63 }
 0x31f   : > { %v3628_v3 = vpop.f32.mrf.mxu1 }
 0x320   : > { %v3729_v12 = vadd.f32 %v4500_v27, %v3637_v29  ;;  %v3629_v18 = vadd.f32 %v7152_v63, %v3628_v3 }
 0x321   : > { %v4345_v40 = vpop.f32.mrf.mxu1 }
 0x322   : > { %3793 = vst.msk [vmem:[%s7169_s21 + $0x1b0] sm:$0xff] %vm445_vm2, %v3729_v12  ;;  %v3727_v4 = vadd.f32 %v4501_v60, %v3629_v18  ;;  %v3640_v39 = vadd.f32 %v4345_v40, %v7152_v63 }
 0x323   : > { %v3631_v14 = vpop.f32.mrf.mxu1 }
 0x324   : > { %3791 = vst.msk [vmem:[%s7169_s21 + $0x1a0] sm:$0xff] %vm445_vm2, %v3727_v4  ;;  %v3730_v1 = vadd.f32 %v4502_v55, %v3640_v39  ;;  %v3632_v25 = vadd.f32 %v7152_v63, %v3631_v14 }
 0x326   : > { %3794 = vst.msk [vmem:[%s7169_s21 + $0x1b8] sm:$0xff] %vm445_vm2, %v3730_v1  ;;  %v3728_v26 = vadd.f32 %v4503_v31, %v3632_v25 }
 0x328   : > { %3792 = vst.msk [vmem:[%s7169_s21 + $0x1a8] sm:$0xff] %vm445_vm2, %v3728_v26 }
 0x330   : > { %v4348_v56 = vpop.f32.mrf.mxu1 }
 0x331   : > { %v3653_v2 = vadd.f32 %v4348_v56, %v7152_v63 }
 0x332   : > { %v3644_v35 = vpop.f32.mrf.mxu1 }
 0x333   : > { %v3733_v45 = vadd.f32 %v4504_v5, %v3653_v2  ;;  %v3645_v57 = vadd.f32 %v7152_v63, %v3644_v35 }
 0x334   : > { %v4349_v49 = vpop.f32.mrf.mxu1 }
 0x335   : > { %3797 = vst.msk [vmem:[%s7169_s21 + $0x1d0] sm:$0xff] %vm445_vm2, %v3733_v45  ;;  %v3731_v10 = vadd.f32 %v4505_v59, %v3645_v57  ;;  %v3656_v11 = vadd.f32 %v4349_v49, %v7152_v63 }
 0x336   : > { %v3647_v16 = vpop.f32.mrf.mxu1 }
 0x337   : > { %3795 = vst.msk [vmem:[%s7169_s21 + $0x1c0] sm:$0xff] %vm445_vm2, %v3731_v10  ;;  %v3734_v24 = vadd.f32 %v4506_v37, %v3656_v11  ;;  %v3648_v7 = vadd.f32 %v7152_v63, %v3647_v16 }
 0x339   : > { %3798 = vst.msk [vmem:[%s7169_s21 + $0x1d8] sm:$0xff] %vm445_vm2, %v3734_v24  ;;  %v3732_v22 = vadd.f32 %v4507_v36, %v3648_v7 }
 0x33b   : > { %3796 = vst.msk [vmem:[%s7169_s21 + $0x1c8] sm:$0xff] %vm445_vm2, %v3732_v22 }
 0x343   : > { %v4352_v52 = vpop.f32.mrf.mxu1 }
 0x344   : > { %v3669_v48 = vadd.f32 %v4352_v52, %v7152_v63 }
 0x345   : > { %v3660_v28 = vpop.f32.mrf.mxu1 }
 0x346   : > { %v3737_v54 = vadd.f32 %v4508_v38, %v3669_v48  ;;  %v3661_v9 = vadd.f32 %v7152_v63, %v3660_v28 }
 0x347   : > { %v4353_v58 = vpop.f32.mrf.mxu1 }
 0x348   : > { %3801 = vst.msk [vmem:[%s7169_s21 + $0x1f0] sm:$0xff] %vm445_vm2, %v3737_v54  ;;  %v3735_v41 = vadd.f32 %v4509_v8, %v3661_v9  ;;  %v3672_v62 = vadd.f32 %v4353_v58, %v7152_v63 }
 0x349   : > { %v3663_v53 = vpop.f32.mrf.mxu1 }
 0x34a   : > { %3799 = vst.msk [vmem:[%s7169_s21 + $0x1e0] sm:$0xff] %vm445_vm2, %v3735_v41  ;;  %v3738_v44 = vadd.f32 %v4510_v17, %v3672_v62  ;;  %v3664_v43 = vadd.f32 %v7152_v63, %v3663_v53 }
 0x34c   : > { %3802 = vst.msk [vmem:[%s7169_s21 + $0x1f8] sm:$0xff] %vm445_vm2, %v3738_v44  ;;  %v3736_v61 = vadd.f32 %v4511_v19, %v3664_v43 }
 0x34e   : > { %3800 = vst.msk [vmem:[%s7169_s21 + $0x1e8] sm:$0xff] %vm445_vm2, %v3736_v61 }
 0x34f PF: > { %s17_s24 = sadd.s32 1, %s4518_s24  }
 0x350   : > { %p14_p4 = scmp.ge.s32.totalorder %s17_s24, 4  }
 0x352   :  { %16 = sbr.rel (!%p14_p4) target bundleno = 1 (0x1), region = 82 }

</bundles_post_ra>
